<compile_context>
chip_gen: v6e
topology: v6e:2x2x1
jax: 0.10.0
libtpu: 0.0.40
codegen_flags: <defaults>
</compile_context>

<pallas_src>
import jax
import jax.numpy as jnp
from jax.experimental import pallas as pl
from jax.experimental.pallas import tpu as pltpu


# ----------------------------------------------------------------------------
# Conv2d (+bias+ReLU) Pallas kernel: batch-blocked grid, in-kernel im2col
# staging in VMEM, one full-depth MXU matmul per layer, f32 accumulation.
# ----------------------------------------------------------------------------
def _make_conv_kernel(*, KH, QW, s, C, OH, OW, OC, NB):
    SC = s * C                 # columns contributed by one tap group
    M = NB * OH * OW           # matmul M dimension (all images in the block)

    def kernel(x_ref, w_ref, b_ref, o_ref, p_ref):
        # x_ref: (NB, HP, s, WP, s*C) f32  polyphase view of NB NHWC images
        # w_ref: (KH*KW*C, OC)        bf16 rows ordered (kh, qw, rw, c)
        # b_ref: (1, OC)              f32
        # o_ref: (NB, OH, OW, OC)     f32 or bf16
        # p_ref: (M, KH*KW*C)         bf16 VMEM im2col staging buffer
        for kh in range(KH):
            qh, rh = divmod(kh, s)
            for qw in range(QW):
                g = kh * QW + qw
                # Tap group (kh, qw) covers kernel columns kw = qw*s + rw for
                # all rw in [0, s) and all C input channels at once (SC cols).
                patch = x_ref[:, qh:qh + OH, rh, qw:qw + OW, :]  # (NB,OH,OW,SC)
                p_ref[:, g * SC:(g + 1) * SC] = (
                    patch.reshape(M, SC).astype(jnp.bfloat16))
        # One full-depth MXU matmul for the whole image block.
        acc = jnp.dot(p_ref[...], w_ref[...],
                      preferred_element_type=jnp.float32)
        out = jnp.maximum(acc + b_ref[...], 0.0)
        o_ref[...] = out.reshape(NB, OH, OW, OC).astype(o_ref.dtype)

    return kernel


def _pick_batch_block(B):
    # Keep >= 2 grid steps whenever B >= 2 (so v7x's two TensorCores both get
    # work via the "parallel" grid axis) and cap the block at 8 images so the
    # double-buffered input/output blocks + staging scratch stay well under
    # v5e's 16 MiB default scoped VMEM even at 84x84 inputs.
    if B >= 16:
        return 8
    return max(1, B // 2)


def conv2d_relu_nhwc(x, w_mat, b2, *, KH, KW, stride, out_dtype=jnp.float32):
    """x: (B, H, W, C) f32 NHWC; w_mat: (KH*KW*C, OC) bf16; b2: (1, OC) f32."""
    B, H, W, C = x.shape
    s = stride
    assert KH % s == 0 and KW % s == 0, "kernel size must be a multiple of stride"
    OH = (H - KH) // s + 1
    OW = (W - KW) // s + 1
    OC = w_mat.shape[1]
    QW = KW // s
    K = KH * KW * C
    assert w_mat.shape[0] == K

    # Batch blocking: NB images per grid step, pad B up to a multiple of NB.
    NB = _pick_batch_block(B)
    Bp = -(-B // NB) * NB
    if Bp != B:
        x = jnp.pad(x, ((0, Bp - B), (0, 0), (0, 0), (0, 0)))

    # Pad H, W up to multiples of the stride (no-op for this network's shapes),
    # then do the ZERO-COPY polyphase reshape (B,Hp,Wp,C)->(B,Hp/s,s,Wp/s,s*C)
    # so every strided conv tap becomes a unit-stride slice inside the kernel
    # and the input is read from HBM exactly once.
    Hp = -(-H // s) * s
    Wp = -(-W // s) * s
    if (Hp, Wp) != (H, W):
        x = jnp.pad(x, ((0, 0), (0, Hp - H), (0, Wp - W), (0, 0)))
    HP, WP = Hp // s, Wp // s
    xr = x.reshape(Bp, HP, s, WP, s * C)

    kernel = _make_conv_kernel(KH=KH, QW=QW, s=s, C=C, OH=OH, OW=OW, OC=OC, NB=NB)
    out = pl.pallas_call(
        kernel,
        out_shape=jax.ShapeDtypeStruct((Bp, OH, OW, OC), out_dtype),
        grid=(Bp // NB,),
        in_specs=[
            pl.BlockSpec((NB, HP, s, WP, s * C), lambda i: (i, 0, 0, 0, 0)),
            pl.BlockSpec((K, OC), lambda i: (0, 0)),
            pl.BlockSpec((1, OC), lambda i: (0, 0)),
        ],
        out_specs=pl.BlockSpec((NB, OH, OW, OC), lambda i: (i, 0, 0, 0)),
        scratch_shapes=[pltpu.VMEM((NB * OH * OW, K), jnp.bfloat16)],
        compiler_params=pltpu.CompilerParams(
            dimension_semantics=("parallel",)),
    )(xr, w_mat, b2)
    return out[:B] if Bp != B else out


# ----------------------------------------------------------------------------
# Fused fc1(+ReLU)+fc2 Pallas kernel: hidden activation stays in VMEM, bf16
# MXU operands, f32 accumulation, output padded to 128 lanes for dense stores.
# ----------------------------------------------------------------------------
def _fc_fused_kernel(x_ref, w1_ref, b1_ref, w2_ref, b2_ref, o_ref):
    x = x_ref[...].astype(jnp.bfloat16)          # no-op when fed bf16 conv3 out
    h = jnp.dot(x, w1_ref[...], preferred_element_type=jnp.float32)
    h = jnp.maximum(h + b1_ref[...], 0.0)
    q = jnp.dot(h.astype(jnp.bfloat16), w2_ref[...],
                preferred_element_type=jnp.float32)
    o_ref[...] = (q + b2_ref[...]).astype(o_ref.dtype)


def fused_fc(x, w1, b1, w2, b2, *, num_actions):
    """x: (M, K1) bf16; w1: (K1, 512) bf16; w2: (512, NP>=128) bf16."""
    M, K1 = x.shape
    HID = w1.shape[1]
    NP = w2.shape[1]
    TM = M if M <= 256 else 256          # larger row tiles over the resident w1
    Mp = -(-M // TM) * TM
    if Mp != M:
        x = jnp.pad(x, ((0, Mp - M), (0, 0)))
    out = pl.pallas_call(
        _fc_fused_kernel,
        out_shape=jax.ShapeDtypeStruct((Mp, NP), jnp.float32),
        grid=(Mp // TM,),
        in_specs=[
            pl.BlockSpec((TM, K1), lambda i: (i, 0)),
            pl.BlockSpec((K1, HID), lambda i: (0, 0)),
            pl.BlockSpec((1, HID), lambda i: (0, 0)),
            pl.BlockSpec((HID, NP), lambda i: (0, 0)),
            pl.BlockSpec((1, NP), lambda i: (0, 0)),
        ],
        out_specs=pl.BlockSpec((TM, NP), lambda i: (i, 0)),
        compiler_params=pltpu.CompilerParams(
            dimension_semantics=("parallel",)),
    )(x, w1, b1, w2, b2)
    return out[:M, :num_actions]


# ----------------------------------------------------------------------------
# Parameter init (PyTorch-default-style uniform bounds) + kernel-ready prep
# ----------------------------------------------------------------------------
def conv2d_size_out(size, kernel_size, stride):
    return (size - (kernel_size - 1) - 1) // stride + 1


def init_qnetwork_params(key, input_shape, num_actions):
    c, h, w = input_shape
    convw = conv2d_size_out(conv2d_size_out(conv2d_size_out(w, 8, 4), 4, 2), 3, 1)
    convh = conv2d_size_out(conv2d_size_out(conv2d_size_out(h, 8, 4), 4, 2), 3, 1)
    linear_input_size = convw * convh * 64

    keys = jax.random.split(key, 10)

    def uni(k, shape, fan_in):
        bound = 1.0 / jnp.sqrt(float(fan_in))
        return jax.random.uniform(k, shape, jnp.float32, -bound, bound)

    return {
        "c1w": uni(keys[0], (32, c, 8, 8), c * 8 * 8),
        "c1b": uni(keys[1], (32,), c * 8 * 8),
        "c2w": uni(keys[2], (64, 32, 4, 4), 32 * 4 * 4),
        "c2b": uni(keys[3], (64,), 32 * 4 * 4),
        "c3w": uni(keys[4], (64, 64, 3, 3), 64 * 3 * 3),
        "c3b": uni(keys[5], (64,), 64 * 3 * 3),
        "f1w": uni(keys[6], (linear_input_size, 512), linear_input_size),
        "f1b": uni(keys[7], (512,), linear_input_size),
        "f2w": uni(keys[8], (512, num_actions), 512),
        "f2b": uni(keys[9], (num_actions,), 512),
    }


def prepare_params(params, num_actions):
    """Lay weights out for the kernels: tap-group row order, bf16, folded 1/255
    scale in conv1, lane-padded final layer."""
    def conv_mat(w, stride, scale=1.0):
        OC, C, KH, KW = w.shape
        s = stride
        QW = KW // s
        m = jnp.transpose(w, (2, 3, 1, 0))       # (KH, KW, C, OC)
        m = m.reshape(KH, QW, s, C, OC)          # kw = qw*s + rw
        m = m.reshape(KH * KW * C, OC) * scale   # rows ordered (kh, qw, rw, c)
        return m.astype(jnp.bfloat16)

    NP = ((num_actions + 127) // 128) * 128
    w2p = jnp.zeros((params["f2w"].shape[0], NP), jnp.float32)
    w2p = w2p.at[:, :num_actions].set(params["f2w"])
    b2p = jnp.zeros((1, NP), jnp.float32).at[0, :num_actions].set(params["f2b"])

    return {
        "c1w": conv_mat(params["c1w"], 4, scale=1.0 / 255.0),  # fold x/255 here
        "c1b": params["c1b"].reshape(1, -1).astype(jnp.float32),
        "c2w": conv_mat(params["c2w"], 2),
        "c2b": params["c2b"].reshape(1, -1).astype(jnp.float32),
        "c3w": conv_mat(params["c3w"], 1),
        "c3b": params["c3b"].reshape(1, -1).astype(jnp.float32),
        # fc1 rows correspond to the NHWC (h, w, c) flatten order; weights are
        # freshly initialized i.i.d. so this is equivalent to PyTorch's (c,h,w)
        # order.  # TODO(synk): permute fc1 rows if importing trained torch weights.
        "f1w": params["f1w"].astype(jnp.bfloat16),
        "f1b": params["f1b"].reshape(1, -1).astype(jnp.float32),
        "f2w": w2p.astype(jnp.bfloat16),
        "f2b": b2p,
    }


# ----------------------------------------------------------------------------
# Full forward pass (mirrors QNetwork.forward)
# ----------------------------------------------------------------------------
def qnetwork_forward(prep, x, num_actions):
    # PyTorch-style NCHW input; one transpose to NHWC, then channels-last all
    # the way (no inter-layer layout round-trips).
    x = jnp.transpose(x, (0, 2, 3, 1)).astype(jnp.float32)
    h = conv2d_relu_nhwc(x, prep["c1w"], prep["c1b"], KH=8, KW=8, stride=4)
    h = conv2d_relu_nhwc(h, prep["c2w"], prep["c2b"], KH=4, KW=4, stride=2)
    # conv3 output feeds the fc kernel (full-block loads only), so store bf16.
    h = conv2d_relu_nhwc(h, prep["c3w"], prep["c3b"], KH=3, KW=3, stride=1,
                         out_dtype=jnp.bfloat16)
    B = h.shape[0]
    h = h.reshape(B, -1)  # (h, w, c) flatten; fc1 rows were initialized in this order
    return fused_fc(h, prep["f1w"], prep["f1b"], prep["f2w"], prep["f2b"],
                    num_actions=num_actions)


if __name__ == "__main__":
    # Small but valid shapes for the 8/4, 4/2, 3/1 conv stack:
    # 36 -> 8 -> 3 -> 1 spatially; linear input = 1*1*64 = 64.
    input_shape = (4, 36, 36)   # (C, H, W)
    num_actions = 6
    batch = 2                   # -> NB=1, conv grid=(2,) (2 parallel steps)

    key = jax.random.PRNGKey(0)
    pkey, xkey = jax.random.split(key)
    params = init_qnetwork_params(pkey, input_shape, num_actions)
    prep = prepare_params(params, num_actions)

    # Raw-pixel-style input in [0, 255] (NCHW, like PyTorch).
    x = jax.random.uniform(
        xkey, (batch,) + input_shape, jnp.float32, minval=0.0, maxval=255.0
    )

    fwd = jax.jit(lambda p, xx: qnetwork_forward(p, xx, num_actions))
    q_values = fwd(prep, x)
    jax.block_until_ready(q_values)
    assert q_values.shape == (batch, num_actions), q_values.shape
    assert bool(jnp.all(jnp.isfinite(q_values)))
    print("KERNEL_OK")
</pallas_src>

<mosaic_0001>
module attributes {stable_mosaic.version = 11 : i64} {
  func.func @kernel(%arg0: i32, %arg1: memref<1x9x4x9x16xf32, #tpu.memory_space<vmem>>, %arg2: memref<256x32xbf16, #tpu.memory_space<vmem>>, %arg3: memref<1x32xf32, #tpu.memory_space<vmem>>, %arg4: memref<1x8x8x32xf32, #tpu.memory_space<vmem>>, %arg5: memref<64x256xbf16, #tpu.memory_space<vmem>>) attributes {dimension_semantics = [#tpu.dimension_semantics<parallel>], iteration_bounds = array<i64: 2>, scalar_prefetch = 0 : i64, scratch_operands = 1 : i64, tpu.core_type = #tpu.core_type<tc>, window_params = [{transform_indices = @transform_0, window_bounds = array<i64: 1, 9, 4, 9, 16>}, {pipeline_mode = #tpu.pipeline_mode<synchronous>, transform_indices = @transform_1, window_bounds = array<i64: 256, 32>}, {pipeline_mode = #tpu.pipeline_mode<synchronous>, transform_indices = @transform_2, window_bounds = array<i64: 1, 32>}, {transform_indices = @transform_3, window_bounds = array<i64: 1, 8, 8, 32>}]} {
    %c0 = arith.constant 0 : index
    %c0_0 = arith.constant 0 : index
    %c0_1 = arith.constant 0 : index
    %c0_2 = arith.constant 0 : index
    %c0_3 = arith.constant 0 : index
    %0 = vector.load %arg1[%c0, %c0_0, %c0_1, %c0_2, %c0_3] : memref<1x9x4x9x16xf32, #tpu.memory_space<vmem>>, vector<1x8x1x8x16xf32>
    %1 = vector.shape_cast %0 : vector<1x8x1x8x16xf32> to vector<1x8x8x16xf32>
    %2 = vector.shape_cast %1 : vector<1x8x8x16xf32> to vector<64x16xf32>
    %3 = arith.truncf %2 : vector<64x16xf32> to vector<64x16xbf16>
    %c0_4 = arith.constant 0 : index
    %c0_5 = arith.constant 0 : index
    %4 = vector.load %arg5[%c0_4, %c0_5] : memref<64x256xbf16, #tpu.memory_space<vmem>>, vector<64x16xbf16>
    tpu.vector_store %arg5[%c0_4, %c0_5], %3 {strides = array<i32>} : memref<64x256xbf16, #tpu.memory_space<vmem>>, vector<64x16xbf16>,
    %c0_6 = arith.constant 0 : index
    %c0_7 = arith.constant 0 : index
    %c0_8 = arith.constant 0 : index
    %c1 = arith.constant 1 : index
    %c0_9 = arith.constant 0 : index
    %5 = vector.load %arg1[%c0_6, %c0_7, %c0_8, %c1, %c0_9] : memref<1x9x4x9x16xf32, #tpu.memory_space<vmem>>, vector<1x8x1x8x16xf32>
    %6 = vector.shape_cast %5 : vector<1x8x1x8x16xf32> to vector<1x8x8x16xf32>
    %7 = vector.shape_cast %6 : vector<1x8x8x16xf32> to vector<64x16xf32>
    %8 = arith.truncf %7 : vector<64x16xf32> to vector<64x16xbf16>
    %c0_10 = arith.constant 0 : index
    %c16 = arith.constant 16 : index
    %9 = vector.load %arg5[%c0_10, %c16] : memref<64x256xbf16, #tpu.memory_space<vmem>>, vector<64x16xbf16>
    tpu.vector_store %arg5[%c0_10, %c16], %8 {strides = array<i32>} : memref<64x256xbf16, #tpu.memory_space<vmem>>, vector<64x16xbf16>,
    %c0_11 = arith.constant 0 : index
    %c0_12 = arith.constant 0 : index
    %c1_13 = arith.constant 1 : index
    %c0_14 = arith.constant 0 : index
    %c0_15 = arith.constant 0 : index
    %10 = vector.load %arg1[%c0_11, %c0_12, %c1_13, %c0_14, %c0_15] : memref<1x9x4x9x16xf32, #tpu.memory_space<vmem>>, vector<1x8x1x8x16xf32>
    %11 = vector.shape_cast %10 : vector<1x8x1x8x16xf32> to vector<1x8x8x16xf32>
    %12 = vector.shape_cast %11 : vector<1x8x8x16xf32> to vector<64x16xf32>
    %13 = arith.truncf %12 : vector<64x16xf32> to vector<64x16xbf16>
    %c0_16 = arith.constant 0 : index
    %c32 = arith.constant 32 : index
    %14 = vector.load %arg5[%c0_16, %c32] : memref<64x256xbf16, #tpu.memory_space<vmem>>, vector<64x16xbf16>
    tpu.vector_store %arg5[%c0_16, %c32], %13 {strides = array<i32>} : memref<64x256xbf16, #tpu.memory_space<vmem>>, vector<64x16xbf16>,
    %c0_17 = arith.constant 0 : index
    %c0_18 = arith.constant 0 : index
    %c1_19 = arith.constant 1 : index
    %c1_20 = arith.constant 1 : index
    %c0_21 = arith.constant 0 : index
    %15 = vector.load %arg1[%c0_17, %c0_18, %c1_19, %c1_20, %c0_21] : memref<1x9x4x9x16xf32, #tpu.memory_space<vmem>>, vector<1x8x1x8x16xf32>
    %16 = vector.shape_cast %15 : vector<1x8x1x8x16xf32> to vector<1x8x8x16xf32>
    %17 = vector.shape_cast %16 : vector<1x8x8x16xf32> to vector<64x16xf32>
    %18 = arith.truncf %17 : vector<64x16xf32> to vector<64x16xbf16>
    %c0_22 = arith.constant 0 : index
    %c48 = arith.constant 48 : index
    %19 = vector.load %arg5[%c0_22, %c48] : memref<64x256xbf16, #tpu.memory_space<vmem>>, vector<64x16xbf16>
    tpu.vector_store %arg5[%c0_22, %c48], %18 {strides = array<i32>} : memref<64x256xbf16, #tpu.memory_space<vmem>>, vector<64x16xbf16>,
    %c0_23 = arith.constant 0 : index
    %c0_24 = arith.constant 0 : index
    %c2 = arith.constant 2 : index
    %c0_25 = arith.constant 0 : index
    %c0_26 = arith.constant 0 : index
    %20 = vector.load %arg1[%c0_23, %c0_24, %c2, %c0_25, %c0_26] : memref<1x9x4x9x16xf32, #tpu.memory_space<vmem>>, vector<1x8x1x8x16xf32>
    %21 = vector.shape_cast %20 : vector<1x8x1x8x16xf32> to vector<1x8x8x16xf32>
    %22 = vector.shape_cast %21 : vector<1x8x8x16xf32> to vector<64x16xf32>
    %23 = arith.truncf %22 : vector<64x16xf32> to vector<64x16xbf16>
    %c0_27 = arith.constant 0 : index
    %c64 = arith.constant 64 : index
    %24 = vector.load %arg5[%c0_27, %c64] : memref<64x256xbf16, #tpu.memory_space<vmem>>, vector<64x16xbf16>
    tpu.vector_store %arg5[%c0_27, %c64], %23 {strides = array<i32>} : memref<64x256xbf16, #tpu.memory_space<vmem>>, vector<64x16xbf16>,
    %c0_28 = arith.constant 0 : index
    %c0_29 = arith.constant 0 : index
    %c2_30 = arith.constant 2 : index
    %c1_31 = arith.constant 1 : index
    %c0_32 = arith.constant 0 : index
    %25 = vector.load %arg1[%c0_28, %c0_29, %c2_30, %c1_31, %c0_32] : memref<1x9x4x9x16xf32, #tpu.memory_space<vmem>>, vector<1x8x1x8x16xf32>
    %26 = vector.shape_cast %25 : vector<1x8x1x8x16xf32> to vector<1x8x8x16xf32>
    %27 = vector.shape_cast %26 : vector<1x8x8x16xf32> to vector<64x16xf32>
    %28 = arith.truncf %27 : vector<64x16xf32> to vector<64x16xbf16>
    %c0_33 = arith.constant 0 : index
    %c80 = arith.constant 80 : index
    %29 = vector.load %arg5[%c0_33, %c80] : memref<64x256xbf16, #tpu.memory_space<vmem>>, vector<64x16xbf16>
    tpu.vector_store %arg5[%c0_33, %c80], %28 {strides = array<i32>} : memref<64x256xbf16, #tpu.memory_space<vmem>>, vector<64x16xbf16>,
    %c0_34 = arith.constant 0 : index
    %c0_35 = arith.constant 0 : index
    %c3 = arith.constant 3 : index
    %c0_36 = arith.constant 0 : index
    %c0_37 = arith.constant 0 : index
    %30 = vector.load %arg1[%c0_34, %c0_35, %c3, %c0_36, %c0_37] : memref<1x9x4x9x16xf32, #tpu.memory_space<vmem>>, vector<1x8x1x8x16xf32>
    %31 = vector.shape_cast %30 : vector<1x8x1x8x16xf32> to vector<1x8x8x16xf32>
    %32 = vector.shape_cast %31 : vector<1x8x8x16xf32> to vector<64x16xf32>
    %33 = arith.truncf %32 : vector<64x16xf32> to vector<64x16xbf16>
    %c0_38 = arith.constant 0 : index
    %c96 = arith.constant 96 : index
    %34 = vector.load %arg5[%c0_38, %c96] : memref<64x256xbf16, #tpu.memory_space<vmem>>, vector<64x16xbf16>
    tpu.vector_store %arg5[%c0_38, %c96], %33 {strides = array<i32>} : memref<64x256xbf16, #tpu.memory_space<vmem>>, vector<64x16xbf16>,
    %c0_39 = arith.constant 0 : index
    %c0_40 = arith.constant 0 : index
    %c3_41 = arith.constant 3 : index
    %c1_42 = arith.constant 1 : index
    %c0_43 = arith.constant 0 : index
    %35 = vector.load %arg1[%c0_39, %c0_40, %c3_41, %c1_42, %c0_43] : memref<1x9x4x9x16xf32, #tpu.memory_space<vmem>>, vector<1x8x1x8x16xf32>
    %36 = vector.shape_cast %35 : vector<1x8x1x8x16xf32> to vector<1x8x8x16xf32>
    %37 = vector.shape_cast %36 : vector<1x8x8x16xf32> to vector<64x16xf32>
    %38 = arith.truncf %37 : vector<64x16xf32> to vector<64x16xbf16>
    %c0_44 = arith.constant 0 : index
    %c112 = arith.constant 112 : index
    %39 = vector.load %arg5[%c0_44, %c112] : memref<64x256xbf16, #tpu.memory_space<vmem>>, vector<64x16xbf16>
    tpu.vector_store %arg5[%c0_44, %c112], %38 {strides = array<i32>} : memref<64x256xbf16, #tpu.memory_space<vmem>>, vector<64x16xbf16>,
    %c0_45 = arith.constant 0 : index
    %c1_46 = arith.constant 1 : index
    %c0_47 = arith.constant 0 : index
    %c0_48 = arith.constant 0 : index
    %c0_49 = arith.constant 0 : index
    %40 = vector.load %arg1[%c0_45, %c1_46, %c0_47, %c0_48, %c0_49] : memref<1x9x4x9x16xf32, #tpu.memory_space<vmem>>, vector<1x8x1x8x16xf32>
    %41 = vector.shape_cast %40 : vector<1x8x1x8x16xf32> to vector<1x8x8x16xf32>
    %42 = vector.shape_cast %41 : vector<1x8x8x16xf32> to vector<64x16xf32>
    %43 = arith.truncf %42 : vector<64x16xf32> to vector<64x16xbf16>
    %c0_50 = arith.constant 0 : index
    %c128 = arith.constant 128 : index
    %44 = vector.load %arg5[%c0_50, %c128] : memref<64x256xbf16, #tpu.memory_space<vmem>>, vector<64x16xbf16>
    tpu.vector_store %arg5[%c0_50, %c128], %43 {strides = array<i32>} : memref<64x256xbf16, #tpu.memory_space<vmem>>, vector<64x16xbf16>,
    %c0_51 = arith.constant 0 : index
    %c1_52 = arith.constant 1 : index
    %c0_53 = arith.constant 0 : index
    %c1_54 = arith.constant 1 : index
    %c0_55 = arith.constant 0 : index
    %45 = vector.load %arg1[%c0_51, %c1_52, %c0_53, %c1_54, %c0_55] : memref<1x9x4x9x16xf32, #tpu.memory_space<vmem>>, vector<1x8x1x8x16xf32>
    %46 = vector.shape_cast %45 : vector<1x8x1x8x16xf32> to vector<1x8x8x16xf32>
    %47 = vector.shape_cast %46 : vector<1x8x8x16xf32> to vector<64x16xf32>
    %48 = arith.truncf %47 : vector<64x16xf32> to vector<64x16xbf16>
    %c0_56 = arith.constant 0 : index
    %c144 = arith.constant 144 : index
    %49 = vector.load %arg5[%c0_56, %c144] : memref<64x256xbf16, #tpu.memory_space<vmem>>, vector<64x16xbf16>
    tpu.vector_store %arg5[%c0_56, %c144], %48 {strides = array<i32>} : memref<64x256xbf16, #tpu.memory_space<vmem>>, vector<64x16xbf16>,
    %c0_57 = arith.constant 0 : index
    %c1_58 = arith.constant 1 : index
    %c1_59 = arith.constant 1 : index
    %c0_60 = arith.constant 0 : index
    %c0_61 = arith.constant 0 : index
    %50 = vector.load %arg1[%c0_57, %c1_58, %c1_59, %c0_60, %c0_61] : memref<1x9x4x9x16xf32, #tpu.memory_space<vmem>>, vector<1x8x1x8x16xf32>
    %51 = vector.shape_cast %50 : vector<1x8x1x8x16xf32> to vector<1x8x8x16xf32>
    %52 = vector.shape_cast %51 : vector<1x8x8x16xf32> to vector<64x16xf32>
    %53 = arith.truncf %52 : vector<64x16xf32> to vector<64x16xbf16>
    %c0_62 = arith.constant 0 : index
    %c160 = arith.constant 160 : index
    %54 = vector.load %arg5[%c0_62, %c160] : memref<64x256xbf16, #tpu.memory_space<vmem>>, vector<64x16xbf16>
    tpu.vector_store %arg5[%c0_62, %c160], %53 {strides = array<i32>} : memref<64x256xbf16, #tpu.memory_space<vmem>>, vector<64x16xbf16>,
    %c0_63 = arith.constant 0 : index
    %c1_64 = arith.constant 1 : index
    %c1_65 = arith.constant 1 : index
    %c1_66 = arith.constant 1 : index
    %c0_67 = arith.constant 0 : index
    %55 = vector.load %arg1[%c0_63, %c1_64, %c1_65, %c1_66, %c0_67] : memref<1x9x4x9x16xf32, #tpu.memory_space<vmem>>, vector<1x8x1x8x16xf32>
    %56 = vector.shape_cast %55 : vector<1x8x1x8x16xf32> to vector<1x8x8x16xf32>
    %57 = vector.shape_cast %56 : vector<1x8x8x16xf32> to vector<64x16xf32>
    %58 = arith.truncf %57 : vector<64x16xf32> to vector<64x16xbf16>
    %c0_68 = arith.constant 0 : index
    %c176 = arith.constant 176 : index
    %59 = vector.load %arg5[%c0_68, %c176] : memref<64x256xbf16, #tpu.memory_space<vmem>>, vector<64x16xbf16>
    tpu.vector_store %arg5[%c0_68, %c176], %58 {strides = array<i32>} : memref<64x256xbf16, #tpu.memory_space<vmem>>, vector<64x16xbf16>,
    %c0_69 = arith.constant 0 : index
    %c1_70 = arith.constant 1 : index
    %c2_71 = arith.constant 2 : index
    %c0_72 = arith.constant 0 : index
    %c0_73 = arith.constant 0 : index
    %60 = vector.load %arg1[%c0_69, %c1_70, %c2_71, %c0_72, %c0_73] : memref<1x9x4x9x16xf32, #tpu.memory_space<vmem>>, vector<1x8x1x8x16xf32>
    %61 = vector.shape_cast %60 : vector<1x8x1x8x16xf32> to vector<1x8x8x16xf32>
    %62 = vector.shape_cast %61 : vector<1x8x8x16xf32> to vector<64x16xf32>
    %63 = arith.truncf %62 : vector<64x16xf32> to vector<64x16xbf16>
    %c0_74 = arith.constant 0 : index
    %c192 = arith.constant 192 : index
    %64 = vector.load %arg5[%c0_74, %c192] : memref<64x256xbf16, #tpu.memory_space<vmem>>, vector<64x16xbf16>
    tpu.vector_store %arg5[%c0_74, %c192], %63 {strides = array<i32>} : memref<64x256xbf16, #tpu.memory_space<vmem>>, vector<64x16xbf16>,
    %c0_75 = arith.constant 0 : index
    %c1_76 = arith.constant 1 : index
    %c2_77 = arith.constant 2 : index
    %c1_78 = arith.constant 1 : index
    %c0_79 = arith.constant 0 : index
    %65 = vector.load %arg1[%c0_75, %c1_76, %c2_77, %c1_78, %c0_79] : memref<1x9x4x9x16xf32, #tpu.memory_space<vmem>>, vector<1x8x1x8x16xf32>
    %66 = vector.shape_cast %65 : vector<1x8x1x8x16xf32> to vector<1x8x8x16xf32>
    %67 = vector.shape_cast %66 : vector<1x8x8x16xf32> to vector<64x16xf32>
    %68 = arith.truncf %67 : vector<64x16xf32> to vector<64x16xbf16>
    %c0_80 = arith.constant 0 : index
    %c208 = arith.constant 208 : index
    %69 = vector.load %arg5[%c0_80, %c208] : memref<64x256xbf16, #tpu.memory_space<vmem>>, vector<64x16xbf16>
    tpu.vector_store %arg5[%c0_80, %c208], %68 {strides = array<i32>} : memref<64x256xbf16, #tpu.memory_space<vmem>>, vector<64x16xbf16>,
    %c0_81 = arith.constant 0 : index
    %c1_82 = arith.constant 1 : index
    %c3_83 = arith.constant 3 : index
    %c0_84 = arith.constant 0 : index
    %c0_85 = arith.constant 0 : index
    %70 = vector.load %arg1[%c0_81, %c1_82, %c3_83, %c0_84, %c0_85] : memref<1x9x4x9x16xf32, #tpu.memory_space<vmem>>, vector<1x8x1x8x16xf32>
    %71 = vector.shape_cast %70 : vector<1x8x1x8x16xf32> to vector<1x8x8x16xf32>
    %72 = vector.shape_cast %71 : vector<1x8x8x16xf32> to vector<64x16xf32>
    %73 = arith.truncf %72 : vector<64x16xf32> to vector<64x16xbf16>
    %c0_86 = arith.constant 0 : index
    %c224 = arith.constant 224 : index
    %74 = vector.load %arg5[%c0_86, %c224] : memref<64x256xbf16, #tpu.memory_space<vmem>>, vector<64x16xbf16>
    tpu.vector_store %arg5[%c0_86, %c224], %73 {strides = array<i32>} : memref<64x256xbf16, #tpu.memory_space<vmem>>, vector<64x16xbf16>,
    %c0_87 = arith.constant 0 : index
    %c1_88 = arith.constant 1 : index
    %c3_89 = arith.constant 3 : index
    %c1_90 = arith.constant 1 : index
    %c0_91 = arith.constant 0 : index
    %75 = vector.load %arg1[%c0_87, %c1_88, %c3_89, %c1_90, %c0_91] : memref<1x9x4x9x16xf32, #tpu.memory_space<vmem>>, vector<1x8x1x8x16xf32>
    %76 = vector.shape_cast %75 : vector<1x8x1x8x16xf32> to vector<1x8x8x16xf32>
    %77 = vector.shape_cast %76 : vector<1x8x8x16xf32> to vector<64x16xf32>
    %78 = arith.truncf %77 : vector<64x16xf32> to vector<64x16xbf16>
    %c0_92 = arith.constant 0 : index
    %c240 = arith.constant 240 : index
    %79 = vector.load %arg5[%c0_92, %c240] : memref<64x256xbf16, #tpu.memory_space<vmem>>, vector<64x16xbf16>
    tpu.vector_store %arg5[%c0_92, %c240], %78 {strides = array<i32>} : memref<64x256xbf16, #tpu.memory_space<vmem>>, vector<64x16xbf16>,
    %c0_93 = arith.constant 0 : index
    %c0_94 = arith.constant 0 : index
    %80 = vector.load %arg5[%c0_93, %c0_94] : memref<64x256xbf16, #tpu.memory_space<vmem>>, vector<64x256xbf16>
    %c0_95 = arith.constant 0 : index
    %c0_96 = arith.constant 0 : index
    %81 = vector.load %arg2[%c0_95, %c0_96] : memref<256x32xbf16, #tpu.memory_space<vmem>>, vector<256x32xbf16>
    %cst = arith.constant dense<0.000000e+00> : vector<64x32xf32>
    %82 = tpu.matmul %80, %81, %cst {dimension_numbers = #tpu.dot_dimension_numbers<[1], [0], [0], [1], [0, 0, 1, 1], [], []>} : vector<64x256xbf16>, vector<256x32xbf16>, vector<64x32xf32> -> vector<64x32xf32>
    %c0_97 = arith.constant 0 : index
    %c0_98 = arith.constant 0 : index
    %83 = vector.load %arg3[%c0_97, %c0_98] : memref<1x32xf32, #tpu.memory_space<vmem>>, vector<1x32xf32>
    %84 = vector.broadcast %83 : vector<1x32xf32> to vector<64x32xf32>
    %85 = arith.addf %82, %84 : vector<64x32xf32>
    %cst_99 = arith.constant 0.000000e+00 : f32
    %86 = vector.broadcast %cst_99 : f32 to vector<64x32xf32>
    %87 = arith.maximumf %85, %86 : vector<64x32xf32>
    %88 = vector.shape_cast %87 : vector<64x32xf32> to vector<1x8x8x32xf32>
    %c0_100 = arith.constant 0 : index
    %c0_101 = arith.constant 0 : index
    %c0_102 = arith.constant 0 : index
    %c0_103 = arith.constant 0 : index
    %89 = vector.load %arg4[%c0_100, %c0_101, %c0_102, %c0_103] : memref<1x8x8x32xf32, #tpu.memory_space<vmem>>, vector<1x8x8x32xf32>
    tpu.vector_store %arg4[%c0_100, %c0_101, %c0_102, %c0_103], %88 {strides = array<i32>} : memref<1x8x8x32xf32, #tpu.memory_space<vmem>>, vector<1x8x8x32xf32>,
    return
  }
  func.func @transform_0(%arg0: i32) -> (i32, i32, i32, i32, i32) {
    %c0_i32 = arith.constant 0 : i32
    %c0_i32_0 = arith.constant 0 : i32
    %c0_i32_1 = arith.constant 0 : i32
    %c0_i32_2 = arith.constant 0 : i32
    %c0_i32_3 = arith.constant 0 : i32
    return %arg0, %c0_i32, %c0_i32_0, %c0_i32_1, %c0_i32_2 : i32, i32, i32, i32, i32
  }
  func.func @transform_1(%arg0: i32) -> (i32, i32) {
    %c0_i32 = arith.constant 0 : i32
    %c0_i32_0 = arith.constant 0 : i32
    %c0_i32_1 = arith.constant 0 : i32
    return %c0_i32, %c0_i32_0 : i32, i32
  }
  func.func @transform_2(%arg0: i32) -> (i32, i32) {
    %c0_i32 = arith.constant 0 : i32
    %c0_i32_0 = arith.constant 0 : i32
    %c0_i32_1 = arith.constant 0 : i32
    return %c0_i32, %c0_i32_0 : i32, i32
  }
  func.func @transform_3(%arg0: i32) -> (i32, i32, i32, i32) {
    %c0_i32 = arith.constant 0 : i32
    %c0_i32_0 = arith.constant 0 : i32
    %c0_i32_1 = arith.constant 0 : i32
    %c0_i32_2 = arith.constant 0 : i32
    return %arg0, %c0_i32, %c0_i32_0, %c0_i32_1 : i32, i32, i32, i32
  }
}

module attributes {stable_mosaic.version = 11 : i64} {
  func.func @kernel(%arg0: i32, %arg1: memref<1x4x2x4x64xf32, #tpu.memory_space<vmem>>, %arg2: memref<512x64xbf16, #tpu.memory_space<vmem>>, %arg3: memref<1x64xf32, #tpu.memory_space<vmem>>, %arg4: memref<1x3x3x64xf32, #tpu.memory_space<vmem>>, %arg5: memref<9x512xbf16, #tpu.memory_space<vmem>>) attributes {dimension_semantics = [#tpu.dimension_semantics<parallel>], iteration_bounds = array<i64: 2>, scalar_prefetch = 0 : i64, scratch_operands = 1 : i64, tpu.core_type = #tpu.core_type<tc>, window_params = [{transform_indices = @transform_0, window_bounds = array<i64: 1, 4, 2, 4, 64>}, {pipeline_mode = #tpu.pipeline_mode<synchronous>, transform_indices = @transform_1, window_bounds = array<i64: 512, 64>}, {pipeline_mode = #tpu.pipeline_mode<synchronous>, transform_indices = @transform_2, window_bounds = array<i64: 1, 64>}, {transform_indices = @transform_3, window_bounds = array<i64: 1, 3, 3, 64>}]} {
    %c0 = arith.constant 0 : index
    %c0_0 = arith.constant 0 : index
    %c0_1 = arith.constant 0 : index
    %c0_2 = arith.constant 0 : index
    %c0_3 = arith.constant 0 : index
    %0 = vector.load %arg1[%c0, %c0_0, %c0_1, %c0_2, %c0_3] : memref<1x4x2x4x64xf32, #tpu.memory_space<vmem>>, vector<1x3x1x3x64xf32>
    %1 = vector.shape_cast %0 : vector<1x3x1x3x64xf32> to vector<1x3x3x64xf32>
    %2 = vector.shape_cast %1 : vector<1x3x3x64xf32> to vector<9x64xf32>
    %3 = arith.truncf %2 : vector<9x64xf32> to vector<9x64xbf16>
    %c0_4 = arith.constant 0 : index
    %c0_5 = arith.constant 0 : index
    %4 = vector.load %arg5[%c0_4, %c0_5] : memref<9x512xbf16, #tpu.memory_space<vmem>>, vector<9x64xbf16>
    tpu.vector_store %arg5[%c0_4, %c0_5], %3 {strides = array<i32>} : memref<9x512xbf16, #tpu.memory_space<vmem>>, vector<9x64xbf16>,
    %c0_6 = arith.constant 0 : index
    %c0_7 = arith.constant 0 : index
    %c0_8 = arith.constant 0 : index
    %c1 = arith.constant 1 : index
    %c0_9 = arith.constant 0 : index
    %5 = vector.load %arg1[%c0_6, %c0_7, %c0_8, %c1, %c0_9] : memref<1x4x2x4x64xf32, #tpu.memory_space<vmem>>, vector<1x3x1x3x64xf32>
    %6 = vector.shape_cast %5 : vector<1x3x1x3x64xf32> to vector<1x3x3x64xf32>
    %7 = vector.shape_cast %6 : vector<1x3x3x64xf32> to vector<9x64xf32>
    %8 = arith.truncf %7 : vector<9x64xf32> to vector<9x64xbf16>
    %c0_10 = arith.constant 0 : index
    %c64 = arith.constant 64 : index
    %9 = vector.load %arg5[%c0_10, %c64] : memref<9x512xbf16, #tpu.memory_space<vmem>>, vector<9x64xbf16>
    tpu.vector_store %arg5[%c0_10, %c64], %8 {strides = array<i32>} : memref<9x512xbf16, #tpu.memory_space<vmem>>, vector<9x64xbf16>,
    %c0_11 = arith.constant 0 : index
    %c0_12 = arith.constant 0 : index
    %c1_13 = arith.constant 1 : index
    %c0_14 = arith.constant 0 : index
    %c0_15 = arith.constant 0 : index
    %10 = vector.load %arg1[%c0_11, %c0_12, %c1_13, %c0_14, %c0_15] : memref<1x4x2x4x64xf32, #tpu.memory_space<vmem>>, vector<1x3x1x3x64xf32>
    %11 = vector.shape_cast %10 : vector<1x3x1x3x64xf32> to vector<1x3x3x64xf32>
    %12 = vector.shape_cast %11 : vector<1x3x3x64xf32> to vector<9x64xf32>
    %13 = arith.truncf %12 : vector<9x64xf32> to vector<9x64xbf16>
    %c0_16 = arith.constant 0 : index
    %c128 = arith.constant 128 : index
    %14 = vector.load %arg5[%c0_16, %c128] : memref<9x512xbf16, #tpu.memory_space<vmem>>, vector<9x64xbf16>
    tpu.vector_store %arg5[%c0_16, %c128], %13 {strides = array<i32>} : memref<9x512xbf16, #tpu.memory_space<vmem>>, vector<9x64xbf16>,
    %c0_17 = arith.constant 0 : index
    %c0_18 = arith.constant 0 : index
    %c1_19 = arith.constant 1 : index
    %c1_20 = arith.constant 1 : index
    %c0_21 = arith.constant 0 : index
    %15 = vector.load %arg1[%c0_17, %c0_18, %c1_19, %c1_20, %c0_21] : memref<1x4x2x4x64xf32, #tpu.memory_space<vmem>>, vector<1x3x1x3x64xf32>
    %16 = vector.shape_cast %15 : vector<1x3x1x3x64xf32> to vector<1x3x3x64xf32>
    %17 = vector.shape_cast %16 : vector<1x3x3x64xf32> to vector<9x64xf32>
    %18 = arith.truncf %17 : vector<9x64xf32> to vector<9x64xbf16>
    %c0_22 = arith.constant 0 : index
    %c192 = arith.constant 192 : index
    %19 = vector.load %arg5[%c0_22, %c192] : memref<9x512xbf16, #tpu.memory_space<vmem>>, vector<9x64xbf16>
    tpu.vector_store %arg5[%c0_22, %c192], %18 {strides = array<i32>} : memref<9x512xbf16, #tpu.memory_space<vmem>>, vector<9x64xbf16>,
    %c0_23 = arith.constant 0 : index
    %c1_24 = arith.constant 1 : index
    %c0_25 = arith.constant 0 : index
    %c0_26 = arith.constant 0 : index
    %c0_27 = arith.constant 0 : index
    %20 = vector.load %arg1[%c0_23, %c1_24, %c0_25, %c0_26, %c0_27] : memref<1x4x2x4x64xf32, #tpu.memory_space<vmem>>, vector<1x3x1x3x64xf32>
    %21 = vector.shape_cast %20 : vector<1x3x1x3x64xf32> to vector<1x3x3x64xf32>
    %22 = vector.shape_cast %21 : vector<1x3x3x64xf32> to vector<9x64xf32>
    %23 = arith.truncf %22 : vector<9x64xf32> to vector<9x64xbf16>
    %c0_28 = arith.constant 0 : index
    %c256 = arith.constant 256 : index
    %24 = vector.load %arg5[%c0_28, %c256] : memref<9x512xbf16, #tpu.memory_space<vmem>>, vector<9x64xbf16>
    tpu.vector_store %arg5[%c0_28, %c256], %23 {strides = array<i32>} : memref<9x512xbf16, #tpu.memory_space<vmem>>, vector<9x64xbf16>,
    %c0_29 = arith.constant 0 : index
    %c1_30 = arith.constant 1 : index
    %c0_31 = arith.constant 0 : index
    %c1_32 = arith.constant 1 : index
    %c0_33 = arith.constant 0 : index
    %25 = vector.load %arg1[%c0_29, %c1_30, %c0_31, %c1_32, %c0_33] : memref<1x4x2x4x64xf32, #tpu.memory_space<vmem>>, vector<1x3x1x3x64xf32>
    %26 = vector.shape_cast %25 : vector<1x3x1x3x64xf32> to vector<1x3x3x64xf32>
    %27 = vector.shape_cast %26 : vector<1x3x3x64xf32> to vector<9x64xf32>
    %28 = arith.truncf %27 : vector<9x64xf32> to vector<9x64xbf16>
    %c0_34 = arith.constant 0 : index
    %c320 = arith.constant 320 : index
    %29 = vector.load %arg5[%c0_34, %c320] : memref<9x512xbf16, #tpu.memory_space<vmem>>, vector<9x64xbf16>
    tpu.vector_store %arg5[%c0_34, %c320], %28 {strides = array<i32>} : memref<9x512xbf16, #tpu.memory_space<vmem>>, vector<9x64xbf16>,
    %c0_35 = arith.constant 0 : index
    %c1_36 = arith.constant 1 : index
    %c1_37 = arith.constant 1 : index
    %c0_38 = arith.constant 0 : index
    %c0_39 = arith.constant 0 : index
    %30 = vector.load %arg1[%c0_35, %c1_36, %c1_37, %c0_38, %c0_39] : memref<1x4x2x4x64xf32, #tpu.memory_space<vmem>>, vector<1x3x1x3x64xf32>
    %31 = vector.shape_cast %30 : vector<1x3x1x3x64xf32> to vector<1x3x3x64xf32>
    %32 = vector.shape_cast %31 : vector<1x3x3x64xf32> to vector<9x64xf32>
    %33 = arith.truncf %32 : vector<9x64xf32> to vector<9x64xbf16>
    %c0_40 = arith.constant 0 : index
    %c384 = arith.constant 384 : index
    %34 = vector.load %arg5[%c0_40, %c384] : memref<9x512xbf16, #tpu.memory_space<vmem>>, vector<9x64xbf16>
    tpu.vector_store %arg5[%c0_40, %c384], %33 {strides = array<i32>} : memref<9x512xbf16, #tpu.memory_space<vmem>>, vector<9x64xbf16>,
    %c0_41 = arith.constant 0 : index
    %c1_42 = arith.constant 1 : index
    %c1_43 = arith.constant 1 : index
    %c1_44 = arith.constant 1 : index
    %c0_45 = arith.constant 0 : index
    %35 = vector.load %arg1[%c0_41, %c1_42, %c1_43, %c1_44, %c0_45] : memref<1x4x2x4x64xf32, #tpu.memory_space<vmem>>, vector<1x3x1x3x64xf32>
    %36 = vector.shape_cast %35 : vector<1x3x1x3x64xf32> to vector<1x3x3x64xf32>
    %37 = vector.shape_cast %36 : vector<1x3x3x64xf32> to vector<9x64xf32>
    %38 = arith.truncf %37 : vector<9x64xf32> to vector<9x64xbf16>
    %c0_46 = arith.constant 0 : index
    %c448 = arith.constant 448 : index
    %39 = vector.load %arg5[%c0_46, %c448] : memref<9x512xbf16, #tpu.memory_space<vmem>>, vector<9x64xbf16>
    tpu.vector_store %arg5[%c0_46, %c448], %38 {strides = array<i32>} : memref<9x512xbf16, #tpu.memory_space<vmem>>, vector<9x64xbf16>,
    %c0_47 = arith.constant 0 : index
    %c0_48 = arith.constant 0 : index
    %40 = vector.load %arg5[%c0_47, %c0_48] : memref<9x512xbf16, #tpu.memory_space<vmem>>, vector<9x512xbf16>
    %c0_49 = arith.constant 0 : index
    %c0_50 = arith.constant 0 : index
    %41 = vector.load %arg2[%c0_49, %c0_50] : memref<512x64xbf16, #tpu.memory_space<vmem>>, vector<512x64xbf16>
    %cst = arith.constant dense<0.000000e+00> : vector<9x64xf32>
    %42 = tpu.matmul %40, %41, %cst {dimension_numbers = #tpu.dot_dimension_numbers<[1], [0], [0], [1], [0, 0, 1, 1], [], []>} : vector<9x512xbf16>, vector<512x64xbf16>, vector<9x64xf32> -> vector<9x64xf32>
    %c0_51 = arith.constant 0 : index
    %c0_52 = arith.constant 0 : index
    %43 = vector.load %arg3[%c0_51, %c0_52] : memref<1x64xf32, #tpu.memory_space<vmem>>, vector<1x64xf32>
    %44 = vector.broadcast %43 : vector<1x64xf32> to vector<9x64xf32>
    %45 = arith.addf %42, %44 : vector<9x64xf32>
    %cst_53 = arith.constant 0.000000e+00 : f32
    %46 = vector.broadcast %cst_53 : f32 to vector<9x64xf32>
    %47 = arith.maximumf %45, %46 : vector<9x64xf32>
    %48 = vector.shape_cast %47 : vector<9x64xf32> to vector<1x3x3x64xf32>
    %c0_54 = arith.constant 0 : index
    %c0_55 = arith.constant 0 : index
    %c0_56 = arith.constant 0 : index
    %c0_57 = arith.constant 0 : index
    %49 = vector.load %arg4[%c0_54, %c0_55, %c0_56, %c0_57] : memref<1x3x3x64xf32, #tpu.memory_space<vmem>>, vector<1x3x3x64xf32>
    tpu.vector_store %arg4[%c0_54, %c0_55, %c0_56, %c0_57], %48 {strides = array<i32>} : memref<1x3x3x64xf32, #tpu.memory_space<vmem>>, vector<1x3x3x64xf32>,
    return
  }
  func.func @transform_0(%arg0: i32) -> (i32, i32, i32, i32, i32) {
    %c0_i32 = arith.constant 0 : i32
    %c0_i32_0 = arith.constant 0 : i32
    %c0_i32_1 = arith.constant 0 : i32
    %c0_i32_2 = arith.constant 0 : i32
    %c0_i32_3 = arith.constant 0 : i32
    return %arg0, %c0_i32, %c0_i32_0, %c0_i32_1, %c0_i32_2 : i32, i32, i32, i32, i32
  }
  func.func @transform_1(%arg0: i32) -> (i32, i32) {
    %c0_i32 = arith.constant 0 : i32
    %c0_i32_0 = arith.constant 0 : i32
    %c0_i32_1 = arith.constant 0 : i32
    return %c0_i32, %c0_i32_0 : i32, i32
  }
  func.func @transform_2(%arg0: i32) -> (i32, i32) {
    %c0_i32 = arith.constant 0 : i32
    %c0_i32_0 = arith.constant 0 : i32
    %c0_i32_1 = arith.constant 0 : i32
    return %c0_i32, %c0_i32_0 : i32, i32
  }
  func.func @transform_3(%arg0: i32) -> (i32, i32, i32, i32) {
    %c0_i32 = arith.constant 0 : i32
    %c0_i32_0 = arith.constant 0 : i32
    %c0_i32_1 = arith.constant 0 : i32
    %c0_i32_2 = arith.constant 0 : i32
    return %arg0, %c0_i32, %c0_i32_0, %c0_i32_1 : i32, i32, i32, i32
  }
}

module attributes {stable_mosaic.version = 11 : i64} {
  func.func @kernel(%arg0: i32, %arg1: memref<1x3x1x3x64xf32, #tpu.memory_space<vmem>>, %arg2: memref<576x64xbf16, #tpu.memory_space<vmem>>, %arg3: memref<1x64xf32, #tpu.memory_space<vmem>>, %arg4: memref<1x1x1x64xbf16, #tpu.memory_space<vmem>>, %arg5: memref<1x576xbf16, #tpu.memory_space<vmem>>) attributes {dimension_semantics = [#tpu.dimension_semantics<parallel>], iteration_bounds = array<i64: 2>, scalar_prefetch = 0 : i64, scratch_operands = 1 : i64, tpu.core_type = #tpu.core_type<tc>, window_params = [{transform_indices = @transform_0, window_bounds = array<i64: 1, 3, 1, 3, 64>}, {pipeline_mode = #tpu.pipeline_mode<synchronous>, transform_indices = @transform_1, window_bounds = array<i64: 576, 64>}, {pipeline_mode = #tpu.pipeline_mode<synchronous>, transform_indices = @transform_2, window_bounds = array<i64: 1, 64>}, {transform_indices = @transform_3, window_bounds = array<i64: 1, 1, 1, 64>}]} {
    %c0 = arith.constant 0 : index
    %c0_0 = arith.constant 0 : index
    %c0_1 = arith.constant 0 : index
    %c0_2 = arith.constant 0 : index
    %c0_3 = arith.constant 0 : index
    %0 = vector.load %arg1[%c0, %c0_0, %c0_1, %c0_2, %c0_3] : memref<1x3x1x3x64xf32, #tpu.memory_space<vmem>>, vector<1x1x1x1x64xf32>
    %1 = vector.shape_cast %0 : vector<1x1x1x1x64xf32> to vector<1x1x1x64xf32>
    %2 = vector.shape_cast %1 : vector<1x1x1x64xf32> to vector<1x64xf32>
    %3 = arith.truncf %2 : vector<1x64xf32> to vector<1x64xbf16>
    %c0_4 = arith.constant 0 : index
    %c0_5 = arith.constant 0 : index
    %4 = vector.load %arg5[%c0_4, %c0_5] : memref<1x576xbf16, #tpu.memory_space<vmem>>, vector<1x64xbf16>
    tpu.vector_store %arg5[%c0_4, %c0_5], %3 {strides = array<i32>} : memref<1x576xbf16, #tpu.memory_space<vmem>>, vector<1x64xbf16>,
    %c0_6 = arith.constant 0 : index
    %c0_7 = arith.constant 0 : index
    %c0_8 = arith.constant 0 : index
    %c1 = arith.constant 1 : index
    %c0_9 = arith.constant 0 : index
    %5 = vector.load %arg1[%c0_6, %c0_7, %c0_8, %c1, %c0_9] : memref<1x3x1x3x64xf32, #tpu.memory_space<vmem>>, vector<1x1x1x1x64xf32>
    %6 = vector.shape_cast %5 : vector<1x1x1x1x64xf32> to vector<1x1x1x64xf32>
    %7 = vector.shape_cast %6 : vector<1x1x1x64xf32> to vector<1x64xf32>
    %8 = arith.truncf %7 : vector<1x64xf32> to vector<1x64xbf16>
    %c0_10 = arith.constant 0 : index
    %c64 = arith.constant 64 : index
    %9 = vector.load %arg5[%c0_10, %c64] : memref<1x576xbf16, #tpu.memory_space<vmem>>, vector<1x64xbf16>
    tpu.vector_store %arg5[%c0_10, %c64], %8 {strides = array<i32>} : memref<1x576xbf16, #tpu.memory_space<vmem>>, vector<1x64xbf16>,
    %c0_11 = arith.constant 0 : index
    %c0_12 = arith.constant 0 : index
    %c0_13 = arith.constant 0 : index
    %c2 = arith.constant 2 : index
    %c0_14 = arith.constant 0 : index
    %10 = vector.load %arg1[%c0_11, %c0_12, %c0_13, %c2, %c0_14] : memref<1x3x1x3x64xf32, #tpu.memory_space<vmem>>, vector<1x1x1x1x64xf32>
    %11 = vector.shape_cast %10 : vector<1x1x1x1x64xf32> to vector<1x1x1x64xf32>
    %12 = vector.shape_cast %11 : vector<1x1x1x64xf32> to vector<1x64xf32>
    %13 = arith.truncf %12 : vector<1x64xf32> to vector<1x64xbf16>
    %c0_15 = arith.constant 0 : index
    %c128 = arith.constant 128 : index
    %14 = vector.load %arg5[%c0_15, %c128] : memref<1x576xbf16, #tpu.memory_space<vmem>>, vector<1x64xbf16>
    tpu.vector_store %arg5[%c0_15, %c128], %13 {strides = array<i32>} : memref<1x576xbf16, #tpu.memory_space<vmem>>, vector<1x64xbf16>,
    %c0_16 = arith.constant 0 : index
    %c1_17 = arith.constant 1 : index
    %c0_18 = arith.constant 0 : index
    %c0_19 = arith.constant 0 : index
    %c0_20 = arith.constant 0 : index
    %15 = vector.load %arg1[%c0_16, %c1_17, %c0_18, %c0_19, %c0_20] : memref<1x3x1x3x64xf32, #tpu.memory_space<vmem>>, vector<1x1x1x1x64xf32>
    %16 = vector.shape_cast %15 : vector<1x1x1x1x64xf32> to vector<1x1x1x64xf32>
    %17 = vector.shape_cast %16 : vector<1x1x1x64xf32> to vector<1x64xf32>
    %18 = arith.truncf %17 : vector<1x64xf32> to vector<1x64xbf16>
    %c0_21 = arith.constant 0 : index
    %c192 = arith.constant 192 : index
    %19 = vector.load %arg5[%c0_21, %c192] : memref<1x576xbf16, #tpu.memory_space<vmem>>, vector<1x64xbf16>
    tpu.vector_store %arg5[%c0_21, %c192], %18 {strides = array<i32>} : memref<1x576xbf16, #tpu.memory_space<vmem>>, vector<1x64xbf16>,
    %c0_22 = arith.constant 0 : index
    %c1_23 = arith.constant 1 : index
    %c0_24 = arith.constant 0 : index
    %c1_25 = arith.constant 1 : index
    %c0_26 = arith.constant 0 : index
    %20 = vector.load %arg1[%c0_22, %c1_23, %c0_24, %c1_25, %c0_26] : memref<1x3x1x3x64xf32, #tpu.memory_space<vmem>>, vector<1x1x1x1x64xf32>
    %21 = vector.shape_cast %20 : vector<1x1x1x1x64xf32> to vector<1x1x1x64xf32>
    %22 = vector.shape_cast %21 : vector<1x1x1x64xf32> to vector<1x64xf32>
    %23 = arith.truncf %22 : vector<1x64xf32> to vector<1x64xbf16>
    %c0_27 = arith.constant 0 : index
    %c256 = arith.constant 256 : index
    %24 = vector.load %arg5[%c0_27, %c256] : memref<1x576xbf16, #tpu.memory_space<vmem>>, vector<1x64xbf16>
    tpu.vector_store %arg5[%c0_27, %c256], %23 {strides = array<i32>} : memref<1x576xbf16, #tpu.memory_space<vmem>>, vector<1x64xbf16>,
    %c0_28 = arith.constant 0 : index
    %c1_29 = arith.constant 1 : index
    %c0_30 = arith.constant 0 : index
    %c2_31 = arith.constant 2 : index
    %c0_32 = arith.constant 0 : index
    %25 = vector.load %arg1[%c0_28, %c1_29, %c0_30, %c2_31, %c0_32] : memref<1x3x1x3x64xf32, #tpu.memory_space<vmem>>, vector<1x1x1x1x64xf32>
    %26 = vector.shape_cast %25 : vector<1x1x1x1x64xf32> to vector<1x1x1x64xf32>
    %27 = vector.shape_cast %26 : vector<1x1x1x64xf32> to vector<1x64xf32>
    %28 = arith.truncf %27 : vector<1x64xf32> to vector<1x64xbf16>
    %c0_33 = arith.constant 0 : index
    %c320 = arith.constant 320 : index
    %29 = vector.load %arg5[%c0_33, %c320] : memref<1x576xbf16, #tpu.memory_space<vmem>>, vector<1x64xbf16>
    tpu.vector_store %arg5[%c0_33, %c320], %28 {strides = array<i32>} : memref<1x576xbf16, #tpu.memory_space<vmem>>, vector<1x64xbf16>,
    %c0_34 = arith.constant 0 : index
    %c2_35 = arith.constant 2 : index
    %c0_36 = arith.constant 0 : index
    %c0_37 = arith.constant 0 : index
    %c0_38 = arith.constant 0 : index
    %30 = vector.load %arg1[%c0_34, %c2_35, %c0_36, %c0_37, %c0_38] : memref<1x3x1x3x64xf32, #tpu.memory_space<vmem>>, vector<1x1x1x1x64xf32>
    %31 = vector.shape_cast %30 : vector<1x1x1x1x64xf32> to vector<1x1x1x64xf32>
    %32 = vector.shape_cast %31 : vector<1x1x1x64xf32> to vector<1x64xf32>
    %33 = arith.truncf %32 : vector<1x64xf32> to vector<1x64xbf16>
    %c0_39 = arith.constant 0 : index
    %c384 = arith.constant 384 : index
    %34 = vector.load %arg5[%c0_39, %c384] : memref<1x576xbf16, #tpu.memory_space<vmem>>, vector<1x64xbf16>
    tpu.vector_store %arg5[%c0_39, %c384], %33 {strides = array<i32>} : memref<1x576xbf16, #tpu.memory_space<vmem>>, vector<1x64xbf16>,
    %c0_40 = arith.constant 0 : index
    %c2_41 = arith.constant 2 : index
    %c0_42 = arith.constant 0 : index
    %c1_43 = arith.constant 1 : index
    %c0_44 = arith.constant 0 : index
    %35 = vector.load %arg1[%c0_40, %c2_41, %c0_42, %c1_43, %c0_44] : memref<1x3x1x3x64xf32, #tpu.memory_space<vmem>>, vector<1x1x1x1x64xf32>
    %36 = vector.shape_cast %35 : vector<1x1x1x1x64xf32> to vector<1x1x1x64xf32>
    %37 = vector.shape_cast %36 : vector<1x1x1x64xf32> to vector<1x64xf32>
    %38 = arith.truncf %37 : vector<1x64xf32> to vector<1x64xbf16>
    %c0_45 = arith.constant 0 : index
    %c448 = arith.constant 448 : index
    %39 = vector.load %arg5[%c0_45, %c448] : memref<1x576xbf16, #tpu.memory_space<vmem>>, vector<1x64xbf16>
    tpu.vector_store %arg5[%c0_45, %c448], %38 {strides = array<i32>} : memref<1x576xbf16, #tpu.memory_space<vmem>>, vector<1x64xbf16>,
    %c0_46 = arith.constant 0 : index
    %c2_47 = arith.constant 2 : index
    %c0_48 = arith.constant 0 : index
    %c2_49 = arith.constant 2 : index
    %c0_50 = arith.constant 0 : index
    %40 = vector.load %arg1[%c0_46, %c2_47, %c0_48, %c2_49, %c0_50] : memref<1x3x1x3x64xf32, #tpu.memory_space<vmem>>, vector<1x1x1x1x64xf32>
    %41 = vector.shape_cast %40 : vector<1x1x1x1x64xf32> to vector<1x1x1x64xf32>
    %42 = vector.shape_cast %41 : vector<1x1x1x64xf32> to vector<1x64xf32>
    %43 = arith.truncf %42 : vector<1x64xf32> to vector<1x64xbf16>
    %c0_51 = arith.constant 0 : index
    %c512 = arith.constant 512 : index
    %44 = vector.load %arg5[%c0_51, %c512] : memref<1x576xbf16, #tpu.memory_space<vmem>>, vector<1x64xbf16>
    tpu.vector_store %arg5[%c0_51, %c512], %43 {strides = array<i32>} : memref<1x576xbf16, #tpu.memory_space<vmem>>, vector<1x64xbf16>,
    %c0_52 = arith.constant 0 : index
    %c0_53 = arith.constant 0 : index
    %45 = vector.load %arg5[%c0_52, %c0_53] : memref<1x576xbf16, #tpu.memory_space<vmem>>, vector<1x576xbf16>
    %c0_54 = arith.constant 0 : index
    %c0_55 = arith.constant 0 : index
    %46 = vector.load %arg2[%c0_54, %c0_55] : memref<576x64xbf16, #tpu.memory_space<vmem>>, vector<576x64xbf16>
    %cst = arith.constant dense<0.000000e+00> : vector<1x64xf32>
    %47 = tpu.matmul %45, %46, %cst {dimension_numbers = #tpu.dot_dimension_numbers<[1], [0], [0], [1], [0, 0, 1, 1], [], []>} : vector<1x576xbf16>, vector<576x64xbf16>, vector<1x64xf32> -> vector<1x64xf32>
    %c0_56 = arith.constant 0 : index
    %c0_57 = arith.constant 0 : index
    %48 = vector.load %arg3[%c0_56, %c0_57] : memref<1x64xf32, #tpu.memory_space<vmem>>, vector<1x64xf32>
    %49 = arith.addf %47, %48 : vector<1x64xf32>
    %cst_58 = arith.constant 0.000000e+00 : f32
    %50 = vector.broadcast %cst_58 : f32 to vector<1x64xf32>
    %51 = arith.maximumf %49, %50 : vector<1x64xf32>
    %52 = vector.shape_cast %51 : vector<1x64xf32> to vector<1x1x1x64xf32>
    %53 = arith.truncf %52 : vector<1x1x1x64xf32> to vector<1x1x1x64xbf16>
    %c0_59 = arith.constant 0 : index
    %c0_60 = arith.constant 0 : index
    %c0_61 = arith.constant 0 : index
    %c0_62 = arith.constant 0 : index
    %54 = vector.load %arg4[%c0_59, %c0_60, %c0_61, %c0_62] : memref<1x1x1x64xbf16, #tpu.memory_space<vmem>>, vector<1x1x1x64xbf16>
    tpu.vector_store %arg4[%c0_59, %c0_60, %c0_61, %c0_62], %53 {strides = array<i32>} : memref<1x1x1x64xbf16, #tpu.memory_space<vmem>>, vector<1x1x1x64xbf16>,
    return
  }
  func.func @transform_0(%arg0: i32) -> (i32, i32, i32, i32, i32) {
    %c0_i32 = arith.constant 0 : i32
    %c0_i32_0 = arith.constant 0 : i32
    %c0_i32_1 = arith.constant 0 : i32
    %c0_i32_2 = arith.constant 0 : i32
    %c0_i32_3 = arith.constant 0 : i32
    return %arg0, %c0_i32, %c0_i32_0, %c0_i32_1, %c0_i32_2 : i32, i32, i32, i32, i32
  }
  func.func @transform_1(%arg0: i32) -> (i32, i32) {
    %c0_i32 = arith.constant 0 : i32
    %c0_i32_0 = arith.constant 0 : i32
    %c0_i32_1 = arith.constant 0 : i32
    return %c0_i32, %c0_i32_0 : i32, i32
  }
  func.func @transform_2(%arg0: i32) -> (i32, i32) {
    %c0_i32 = arith.constant 0 : i32
    %c0_i32_0 = arith.constant 0 : i32
    %c0_i32_1 = arith.constant 0 : i32
    return %c0_i32, %c0_i32_0 : i32, i32
  }
  func.func @transform_3(%arg0: i32) -> (i32, i32, i32, i32) {
    %c0_i32 = arith.constant 0 : i32
    %c0_i32_0 = arith.constant 0 : i32
    %c0_i32_1 = arith.constant 0 : i32
    %c0_i32_2 = arith.constant 0 : i32
    return %arg0, %c0_i32, %c0_i32_0, %c0_i32_1 : i32, i32, i32, i32
  }
}

module attributes {stable_mosaic.version = 11 : i64} {
  func.func @_fc_fused_kernel(%arg0: i32, %arg1: memref<2x64xbf16, #tpu.memory_space<vmem>>, %arg2: memref<64x512xbf16, #tpu.memory_space<vmem>>, %arg3: memref<1x512xf32, #tpu.memory_space<vmem>>, %arg4: memref<512x128xbf16, #tpu.memory_space<vmem>>, %arg5: memref<1x128xf32, #tpu.memory_space<vmem>>, %arg6: memref<2x128xf32, #tpu.memory_space<vmem>>) attributes {dimension_semantics = [#tpu.dimension_semantics<parallel>], iteration_bounds = array<i64: 1>, scalar_prefetch = 0 : i64, scratch_operands = 0 : i64, tpu.core_type = #tpu.core_type<tc>, window_params = [{transform_indices = @transform_0, window_bounds = array<i64: 2, 64>}, {pipeline_mode = #tpu.pipeline_mode<synchronous>, transform_indices = @transform_1, window_bounds = array<i64: 64, 512>}, {pipeline_mode = #tpu.pipeline_mode<synchronous>, transform_indices = @transform_2, window_bounds = array<i64: 1, 512>}, {pipeline_mode = #tpu.pipeline_mode<synchronous>, transform_indices = @transform_3, window_bounds = array<i64: 512, 128>}, {pipeline_mode = #tpu.pipeline_mode<synchronous>, transform_indices = @transform_4, window_bounds = array<i64: 1, 128>}, {transform_indices = @transform_5, window_bounds = array<i64: 2, 128>}]} {
    %c0 = arith.constant 0 : index
    %c0_0 = arith.constant 0 : index
    %0 = vector.load %arg1[%c0, %c0_0] : memref<2x64xbf16, #tpu.memory_space<vmem>>, vector<2x64xbf16>
    %c0_1 = arith.constant 0 : index
    %c0_2 = arith.constant 0 : index
    %1 = vector.load %arg2[%c0_1, %c0_2] : memref<64x512xbf16, #tpu.memory_space<vmem>>, vector<64x512xbf16>
    %cst = arith.constant dense<0.000000e+00> : vector<2x512xf32>
    %2 = tpu.matmul %0, %1, %cst {dimension_numbers = #tpu.dot_dimension_numbers<[1], [0], [0], [1], [0, 0, 1, 1], [], []>} : vector<2x64xbf16>, vector<64x512xbf16>, vector<2x512xf32> -> vector<2x512xf32>
    %c0_3 = arith.constant 0 : index
    %c0_4 = arith.constant 0 : index
    %3 = vector.load %arg3[%c0_3, %c0_4] : memref<1x512xf32, #tpu.memory_space<vmem>>, vector<1x512xf32>
    %4 = vector.broadcast %3 : vector<1x512xf32> to vector<2x512xf32>
    %5 = arith.addf %2, %4 : vector<2x512xf32>
    %cst_5 = arith.constant 0.000000e+00 : f32
    %6 = vector.broadcast %cst_5 : f32 to vector<2x512xf32>
    %7 = arith.maximumf %5, %6 : vector<2x512xf32>
    %8 = arith.truncf %7 : vector<2x512xf32> to vector<2x512xbf16>
    %c0_6 = arith.constant 0 : index
    %c0_7 = arith.constant 0 : index
    %9 = vector.load %arg4[%c0_6, %c0_7] : memref<512x128xbf16, #tpu.memory_space<vmem>>, vector<512x128xbf16>
    %cst_8 = arith.constant dense<0.000000e+00> : vector<2x128xf32>
    %10 = tpu.matmul %8, %9, %cst_8 {dimension_numbers = #tpu.dot_dimension_numbers<[1], [0], [0], [1], [0, 0, 1, 1], [], []>} : vector<2x512xbf16>, vector<512x128xbf16>, vector<2x128xf32> -> vector<2x128xf32>
    %c0_9 = arith.constant 0 : index
    %c0_10 = arith.constant 0 : index
    %11 = vector.load %arg5[%c0_9, %c0_10] : memref<1x128xf32, #tpu.memory_space<vmem>>, vector<1x128xf32>
    %12 = vector.broadcast %11 : vector<1x128xf32> to vector<2x128xf32>
    %13 = arith.addf %10, %12 : vector<2x128xf32>
    %c0_11 = arith.constant 0 : index
    %c0_12 = arith.constant 0 : index
    %14 = vector.load %arg6[%c0_11, %c0_12] : memref<2x128xf32, #tpu.memory_space<vmem>>, vector<2x128xf32>
    tpu.vector_store %arg6[%c0_11, %c0_12], %13 {strides = array<i32>} : memref<2x128xf32, #tpu.memory_space<vmem>>, vector<2x128xf32>,
    return
  }
  func.func @transform_0(%arg0: i32) -> (i32, i32) {
    %c0_i32 = arith.constant 0 : i32
    %c0_i32_0 = arith.constant 0 : i32
    return %arg0, %c0_i32 : i32, i32
  }
  func.func @transform_1(%arg0: i32) -> (i32, i32) {
    %c0_i32 = arith.constant 0 : i32
    %c0_i32_0 = arith.constant 0 : i32
    %c0_i32_1 = arith.constant 0 : i32
    return %c0_i32, %c0_i32_0 : i32, i32
  }
  func.func @transform_2(%arg0: i32) -> (i32, i32) {
    %c0_i32 = arith.constant 0 : i32
    %c0_i32_0 = arith.constant 0 : i32
    %c0_i32_1 = arith.constant 0 : i32
    return %c0_i32, %c0_i32_0 : i32, i32
  }
  func.func @transform_3(%arg0: i32) -> (i32, i32) {
    %c0_i32 = arith.constant 0 : i32
    %c0_i32_0 = arith.constant 0 : i32
    %c0_i32_1 = arith.constant 0 : i32
    return %c0_i32, %c0_i32_0 : i32, i32
  }
  func.func @transform_4(%arg0: i32) -> (i32, i32) {
    %c0_i32 = arith.constant 0 : i32
    %c0_i32_0 = arith.constant 0 : i32
    %c0_i32_1 = arith.constant 0 : i32
    return %c0_i32, %c0_i32_0 : i32, i32
  }
  func.func @transform_5(%arg0: i32) -> (i32, i32) {
    %c0_i32 = arith.constant 0 : i32
    %c0_i32_0 = arith.constant 0 : i32
    return %arg0, %c0_i32 : i32, i32
  }
}

</mosaic_0001>

<bundles_post_ra>
// kernel: _lambda_.4
= control target key start
LH: loop header
LB: loop body
LE: loop exit
PB: predicated region body
PF: predicated region fallthrough
CT: control target
= control target key end

     0   :  { %s2038_s12 = smov 0   ;;  %s2526_s0 = inlined_call_operand.vmem [shape: f32[2,9,4,9,16], index: 0, kind: input, shape index: {}]   ;;  %s2527_s1 = inlined_call_operand.vmem [shape: bf16[256,32], index: 1, kind: input, shape index: {}]   ;;  %s2528_s2 = inlined_call_operand.vmem [shape: f32[1,32], index: 2, kind: input, shape index: {}]   ;;  %s2529_s3 = inlined_call_operand.vmem [shape: f32[2,8,8,32], index: 3, kind: output, shape index: {}]  }
   0x1 LB: > { %s1499_s13 = sadd.s32 4294967295, %s2009_s12   ;;  %p1503_p0 = scmp.ge.s32.totalorder %s2009_s12, 1  ;;  %s2009_s12 = sphi %s2038_s12, %s13_s12  }
   0x2   : > { %p137_p1 = scmp.lt.s32.totalorder %s2009_s12, 3 }
   0x4   : > { %p138_p2 = pnand %p1503_p0, %p137_p1 }
   0x5   : > { %p161_p3 = scmp.lt.s32.totalorder (!%p138_p2), %s1499_s13, 1  ;;  %s2011_s18 = smov (!%p138_p2), 16  }
   0x6   : > { %141 = sbr.rel (%p138_p2) target bundleno = 569 (0x239), region = 32  ;;  %s2012_s19 = smov (!%p138_p2), 32  }
   0x7   : > { %s2013_s20 = smov (!%p138_p2), 48   ;;  %s2014_s21 = smov (!%p138_p2), 64  }
   0x8   : > { %s2015_s22 = smov (!%p138_p2), 80   ;;  %s2016_s10 = smov (!%p138_p2), 96  }
   0x9   : > { %s2017_s8 = smov (!%p138_p2), 112  }
   0xb   : > { %s2531_s13 = smov (!%p161_p3, %s1499_s13), 1  ;;  %vm212_vm0 = vcmask 125952   ;;  %vm277_vm1 = vcmask 257152   ;;  %vm343_vm2 = vcmask 388352   ;;  %vm408_vm3 = vcmask 519552  }
   0xc   : > { %s1959_s14 = smul.u32 576, %s2531_s13  ;;  %vm474_vm4 = vcmask 650752   ;;  %vm539_vm5 = vcmask 781952   ;;  %vm605_vm6 = vcmask 913152   ;;  %vm670_vm7 = vcmask 1044352  }
   0xd   : > { %vm1435_vm8 = vcmask 261120  }
   0xe   : > { %s2052_s17 = scalar_lea.vmem %s2526_s0, %s1959_s14 }
   0xf   : > { %v225_v0 = vld [vmem:[%s2052_s17 + $0x101] sm:$0xff]  ;;  %v1524_v12 = vld [vmem:[%s2052_s17 + $0x50] sm:$0xff] }
  0x10   : > { %v221_v1 = vld [vmem:[%s2052_s17 + $0x1] sm:$0xff]  ;;  %v2057_v3 = vpack.c.bf16 %v225_v0, %v225_v0  ;;  %v1523_v13 = vld [vmem:[%s2052_s17 + $0x10] sm:$0xff]  ;;  %v1792_v14 = vpack.c.bf16 %v1524_v12, %v1524_v12 }
  0x11   : > { %v226_v2 = vld [vmem:[%s2052_s17 + $0x141] sm:$0xff]  ;;  %v1783_v4 = vpack.c.bf16 %v221_v1, %v221_v1  ;;  %v1791_v15 = vpack.c.bf16 %v1523_v13, %v1523_v13  ;;  %v1528_v16 = vld [vmem:[%s2052_s17 + $0x150] sm:$0xff] }
  0x12   : > { %v222_v5 = vld [vmem:[%s2052_s17 + $0x41] sm:$0xff]  ;;  %261 = vrot.lane.b32.xlu1 %v2057_v3, %s2011_s18  ;;  %v1788_v6 = vpack.c.bf16 %v226_v2, %v226_v2  ;;  %v1527_v18 = vld [vmem:[%s2052_s17 + $0x110] sm:$0xff]  ;;  %v1796_v29 = vpack.c.bf16 %v1528_v16, %v1528_v16 }
  0x13   : > { %253 = vrot.lane.b32.xlu0 %v1783_v4, %s2011_s18  ;;  %v1784_v7 = vpack.c.bf16 %v222_v5, %v222_v5  ;;  %v1636_v8 = vld [vmem:[%s2052_s17 + $0x81] sm:$0xff]  ;;  %v2091_v30 = vpack.c.bf16 %v1527_v18, %v1527_v18  ;;  %v1652_v32 = vld [vmem:[%s2052_s17 + $0x90] sm:$0xff] }
  0x14   : > { %v2066_v9 = vpack.c.bf16 %v1636_v8, %v1636_v8  ;;  %v1640_v10 = vld [vmem:[%s2052_s17 + $0x181] sm:$0xff]  ;;  %v1656_v33 = vld [vmem:[%s2052_s17 + $0x190] sm:$0xff]  ;;  %v2107_v34 = vpack.c.bf16 %v1652_v32, %v1652_v32  ;;  %v1976_v8 = vld [vmem:[%s2527_s1 + $0x38] sm:$0xff]  }
  0x15   : > { %v2072_v11 = vpack.c.bf16 %v1640_v10, %v1640_v10  ;;  %v176_v17 = vld [vmem:[%s2052_s17 + $0x100] sm:$0xff]  ;;  %v2112_v35 = vpack.c.bf16 %v1656_v33, %v1656_v33  ;;  %v1540_v36 = vld [vmem:[%s2052_s17 + $0x51] sm:$0xff] }
  0x16   : > { %263 = vrot.lane.b32.xlu1 %v1788_v6, %s2011_s18  ;;  %v1779_v19 = vpack.c.bf16 %v176_v17, %v176_v17  ;;  %v172_v20 = vld [vmem:[%s2052_s17] sm:$0xff]  ;;  %v1539_v37 = vld [vmem:[%s2052_s17 + $0x11] sm:$0xff]  ;;  %v1800_v38 = vpack.c.bf16 %v1540_v36, %v1540_v36  ;;  %v1979_v17 = vld [vmem:[%s2527_s1 + $0x68] sm:$0xff]  }
  0x17   : > { %255 = vrot.lane.b32.xlu0 %v1784_v7, %s2011_s18  ;;  %v177_v21 = vld [vmem:[%s2052_s17 + $0x140] sm:$0xff]  ;;  %v1775_v22 = vpack.c.bf16 %v172_v20, %v172_v20  ;;  %v1799_v39 = vpack.c.bf16 %v1539_v37, %v1539_v37  ;;  %v1544_v40 = vld [vmem:[%s2052_s17 + $0x151] sm:$0xff]  ;;  %v1980_v20 = vld [vmem:[%s2527_s1 + $0x28] sm:$0xff]  }
  0x18   : > { %v1780_v23 = vpack.c.bf16 %v177_v21, %v177_v21  ;;  %v173_v24 = vld [vmem:[%s2052_s17 + $0x40] sm:$0xff]  ;;  %217 = vst.msk [vmem:[#allocation2 + $0x20] sm:$0xf] %vm212_vm0, %v1779_v19  ;;  %723 = vst.msk [vmem:[#allocation2 + $0x1c] sm:$0xf] %vm212_vm0, %v1779_v19  ;;  %v1543_v41 = vld [vmem:[%s2052_s17 + $0x111] sm:$0xff]  ;;  %v1804_v42 = vpack.c.bf16 %v1544_v40, %v1544_v40 }
  0x19   : > { %v1620_v25 = vld [vmem:[%s2052_s17 + $0x80] sm:$0xff]  ;;  %v1776_v26 = vpack.c.bf16 %v173_v24, %v173_v24  ;;  %213 = vst.msk [vmem:[#allocation2] sm:$0xf] %vm212_vm0, %v1775_v22  ;;  %v2123_v43 = vpack.c.bf16 %v1543_v41, %v1543_v41  ;;  %v1668_v44 = vld [vmem:[%s2052_s17 + $0x91] sm:$0xff]  ;;  %v1987_v40 = vld [vmem:[%s2527_s1 + $0x48] sm:$0xff]  }
  0x1a   : > { %762 = vrot.lane.b32.xlu1 %v2066_v9, %s2011_s18  ;;  %v1840_v27 = vpack.c.bf16 %v1620_v25, %v1620_v25  ;;  %v1624_v28 = vld [vmem:[%s2052_s17 + $0x180] sm:$0xff]  ;;  %218 = vst.msk [vmem:[#allocation2 + $0x28] sm:$0xf] %vm212_vm0, %v1780_v23  ;;  %724 = vst.msk [vmem:[#allocation2 + $0x24] sm:$0xf] %vm212_vm0, %v1780_v23  ;;  %v2129_v45 = vpack.c.bf16 %v1668_v44, %v1668_v44  ;;  %v1672_v46 = vld [vmem:[%s2052_s17 + $0x191] sm:$0xff] }
  0x1b   : > { %760 = vrot.lane.b32.xlu0 %v1784_v7, %s2011_s18  ;;  %v1844_v31 = vpack.c.bf16 %v1624_v28, %v1624_v28  ;;  %214 = vst.msk [vmem:[#allocation2 + $0x8] sm:$0xf] %vm212_vm0, %v1776_v26  ;;  %720 = vst.msk [vmem:[#allocation2 + $0x4] sm:$0xf] %vm212_vm0, %v1776_v26  ;;  %v2135_v47 = vpack.c.bf16 %v1672_v46, %v1672_v46  ;;  %v1556_v48 = vld [vmem:[%s2052_s17 + $0x60] sm:$0xff]  ;;  %v1977_v12 = vld [vmem:[%s2527_s1 + $0x70] sm:$0xff]  }
  0x1c   : > { %721 = vst.msk [vmem:[#allocation2 + $0xc] sm:$0xf] %vm212_vm0, %v1840_v27  ;;  %215 = vst.msk [vmem:[#allocation2 + $0x10] sm:$0xf] %vm212_vm0, %v1840_v27  ;;  %v1555_v49 = vld [vmem:[%s2052_s17 + $0x20] sm:$0xff]  ;;  %v1808_v50 = vpack.c.bf16 %v1556_v48, %v1556_v48  ;;  %v1587_v16 = vld [vmem:[%s2052_s17 + $0x30] sm:$0xff] }
  0x1d   : > { %725 = vst.msk [vmem:[#allocation2 + $0x2c] sm:$0xf] %vm212_vm0, %v1844_v31  ;;  %219 = vst.msk [vmem:[#allocation2 + $0x30] sm:$0xf] %vm212_vm0, %v1844_v31  ;;  %v1807_v51 = vpack.c.bf16 %v1555_v49, %v1555_v49  ;;  %v1560_v52 = vld [vmem:[%s2052_s17 + $0x160] sm:$0xff]  ;;  %v1823_v19 = vpack.c.bf16 %v1587_v16, %v1587_v16  ;;  %v1592_v21 = vld [vmem:[%s2052_s17 + $0x170] sm:$0xff] }
  0x1e   : > { %770 = vrot.lane.b32.xlu1 %v2072_v11, %s2011_s18  ;;  %v1559_v53 = vld [vmem:[%s2052_s17 + $0x120] sm:$0xff]  ;;  %v1812_v54 = vpack.c.bf16 %v1560_v52, %v1560_v52  ;;  %v1591_v22 = vld [vmem:[%s2052_s17 + $0x130] sm:$0xff]  ;;  %v1828_v24 = vpack.c.bf16 %v1592_v21, %v1592_v21  ;;  %v1983_v28 = vld [vmem:[%s2527_s1 + $0x58] sm:$0xff]  }
  0x1f   : > { %768 = vrot.lane.b32.xlu0 %v1788_v6, %s2011_s18  ;;  %v2146_v55 = vpack.c.bf16 %v1559_v53, %v1559_v53  ;;  %v1684_v56 = vld [vmem:[%s2052_s17 + $0xa0] sm:$0xff]  ;;  %v1975_v6 = vld [vmem:[%s2527_s1 + $0x78] sm:$0xff]   ;;  %v2213_v25 = vpack.c.bf16 %v1591_v22, %v1591_v22  ;;  %v1716_v27 = vld [vmem:[%s2052_s17 + $0xb0] sm:$0xff] }
  0x20   : > { %v2152_v57 = vpack.c.bf16 %v1684_v56, %v1684_v56  ;;  %v1688_v58 = vld [vmem:[%s2052_s17 + $0x1a0] sm:$0xff]  ;;  %1903 = vmatprep.subr.bf16.mxu0 %v1975_v6  ;;  %1943 = vmatprep.subr.bf16.mxu1 %v1975_v6  ;;  %v1984_v31 = vld [vmem:[%s2527_s1 + $0x18] sm:$0xff]   ;;  %v1720_v32 = vld [vmem:[%s2052_s17 + $0x1b0] sm:$0xff] }
  0x21   : > { %v2158_v59 = vpack.c.bf16 %v1688_v58, %v1688_v58  ;;  %v1572_v60 = vld [vmem:[%s2052_s17 + $0x61] sm:$0xff]  ;;  %1904 = vmatpush3.bf16.msra.mxu0 %v1976_v8  ;;  %1951 = vmatpush3.bf16.msra.mxu1 %v1976_v8  ;;  %v1985_v33 = vld [vmem:[%s2527_s1 + $0x50] sm:$0xff]   ;;  %v2237_v36 = vpack.c.bf16 %v1720_v32, %v1720_v32 }
  0x22   : > { %321 = vrot.lane.b32.xlu1 %v1792_v14, %s2012_s19  ;;  %v1571_v61 = vld [vmem:[%s2052_s17 + $0x21] sm:$0xff]  ;;  %v1816_v62 = vpack.c.bf16 %v1572_v60, %v1572_v60  ;;  %1905 = vmatprep.subr.bf16.mxu0 %v1977_v12  ;;  %v1986_v37 = vld [vmem:[%s2527_s1 + $0x10] sm:$0xff]  }
  0x23   : > { %319 = vrot.lane.b32.xlu0 %v1791_v15, %s2012_s19  ;;  %v1815_v63 = vpack.c.bf16 %v1571_v61, %v1571_v61  ;;  %v1576_v0 = vld [vmem:[%s2052_s17 + $0x161] sm:$0xff]  ;;  %v1588_v15 = vld [vmem:[%s2052_s17 + $0x70] sm:$0xff]  ;;  %1944 = vmatprep.subr.bf16.mxu1 %v1977_v12 }
  0x24   : > { %v1575_v1 = vld [vmem:[%s2052_s17 + $0x121] sm:$0xff]  ;;  %v1820_v2 = vpack.c.bf16 %v1576_v0, %v1576_v0  ;;  %v1824_v18 = vpack.c.bf16 %v1588_v15, %v1588_v15  ;;  %v1608_v46 = vld [vmem:[%s2052_s17 + $0x171] sm:$0xff] }
  0x25   : > { %v2169_v4 = vpack.c.bf16 %v1575_v1, %v1575_v1  ;;  %v1700_v5 = vld [vmem:[%s2052_s17 + $0xa1] sm:$0xff]  ;;  %v1607_v48 = vld [vmem:[%s2052_s17 + $0x131] sm:$0xff] }
  0x26   : > { %329 = vrot.lane.b32.xlu1 %v1796_v29, %s2012_s19  ;;  %v2178_v7 = vpack.c.bf16 %v1700_v5, %v1700_v5  ;;  %v1704_v10 = vld [vmem:[%s2052_s17 + $0x1a1] sm:$0xff]  ;;  %v2261_v52 = vpack.c.bf16 %v1607_v48, %v1607_v48  ;;  %v1732_v56 = vld [vmem:[%s2052_s17 + $0xb1] sm:$0xff] }
  0x27   : > { %327 = vrot.lane.b32.xlu0 %v2091_v30, %s2012_s19  ;;  %v2190_v13 = vpack.c.bf16 %v1704_v10, %v1704_v10  ;;  %v1981_v23 = vld [vmem:[%s2527_s1 + $0x60] sm:$0xff]   ;;  %v1988_v44 = vld [vmem:[%s2527_s1 + $0x8] sm:$0xff]   ;;  %v2272_v58 = vpack.c.bf16 %v1732_v56, %v1732_v56  ;;  %v1736_v61 = vld [vmem:[%s2052_s17 + $0x1b1] sm:$0xff] }
  0x28   : > { %v1982_v26 = vld [vmem:[%s2527_s1 + $0x20] sm:$0xff]  }
  0x29   : > { %v1989_v49 = vld [vmem:[%s2527_s1 + $0x40] sm:$0xff]  }
  0x2a   : > { %827 = vrot.lane.b32.xlu1 %v2107_v34, %s2012_s19  ;;  %v179_v60 = vld [vmem:[%s2052_s17 + $0x1c0] sm:$0xff] }
  0x2b   : > { %825 = vrot.lane.b32.xlu0 %v1792_v14, %s2012_s19  ;;  %v1978_v14 = vld [vmem:[%s2527_s1 + $0x30] sm:$0xff]   ;;  %v224_v0 = vld [vmem:[%s2052_s17 + $0xc1] sm:$0xff] }
  0x2c   : > { %1906 = vmatpush3.bf16.msra.mxu0 %v1978_v14  ;;  %1952 = vmatpush3.bf16.msra.mxu1 %v1978_v14  ;;  %v1626_v1 = vld [vmem:[%s2052_s17 + $0x200] sm:$0xff] }
  0x2d   : > { %1907 = vmatprep.subr.bf16.mxu0 %v1979_v17  ;;  %1945 = vmatprep.subr.bf16.mxu1 %v1979_v17  ;;  %v1846_v5 = vpack.c.bf16 %v1626_v1, %v1626_v1  ;;  %v228_v6 = vld [vmem:[%s2052_s17 + $0x1c1] sm:$0xff]  ;;  %v1526_v17 = vld [vmem:[%s2052_s17 + $0xd0] sm:$0xff] }
  0x2e   : > { %835 = vrot.lane.b32.xlu1 %v2112_v35, %s2012_s19  ;;  %v1790_v8 = vpack.c.bf16 %v228_v6, %v228_v6  ;;  %v1642_v14 = vld [vmem:[%s2052_s17 + $0x201] sm:$0xff] }
  0x2f   : > { %833 = vrot.lane.b32.xlu0 %v1796_v29, %s2012_s19  ;;  %v2225_v29 = vpack.c.bf16 %v1716_v27, %v1716_v27  ;;  %727 = vst.msk [vmem:[#allocation2 + $0x3c] sm:$0xf] %vm212_vm0, %v1846_v5  ;;  %v1558_v48 = vld [vmem:[%s2052_s17 + $0xe0] sm:$0xff] }
  0x30   : > { %1908 = vmatpush3.bf16.msra.mxu0 %v1980_v20  ;;  %1953 = vmatpush3.bf16.msra.mxu1 %v1980_v20  ;;  %v1530_v20 = vld [vmem:[%s2052_s17 + $0x1d0] sm:$0xff]  ;;  %v1574_v1 = vld [vmem:[%s2052_s17 + $0xe1] sm:$0xff] }
  0x31   : > { %1909 = vmatprep.subr.bf16.mxu0 %v1981_v23  ;;  %1946 = vmatprep.subr.bf16.mxu1 %v1981_v23  ;;  %v1578_v6 = vld [vmem:[%s2052_s17 + $0x1e1] sm:$0xff] }
  0x32   : > { %386 = vrot.lane.b32.xlu1 %v1800_v38, %s2013_s20 }
  0x33   : > { %384 = vrot.lane.b32.xlu0 %v1799_v39, %s2013_s20  ;;  %v1603_v39 = vld [vmem:[%s2052_s17 + $0x31] sm:$0xff] }
  0x34   : > { %1910 = vmatpush3.bf16.msra.mxu0 %v1982_v26  ;;  %1954 = vmatpush3.bf16.msra.mxu1 %v1982_v26  ;;  %v1658_v26 = vld [vmem:[%s2052_s17 + $0x210] sm:$0xff] }
  0x35   : > { %1911 = vmatprep.subr.bf16.mxu0 %v1983_v28  ;;  %1947 = vmatprep.subr.bf16.mxu1 %v1983_v28 }
  0x36   : > { %394 = vrot.lane.b32.xlu1 %v1804_v42, %s2013_s20 }
  0x37   : > { %392 = vrot.lane.b32.xlu0 %v2123_v43, %s2013_s20 }
  0x38   : > { %1912 = vmatpush3.bf16.msra.mxu0 %v1984_v31  ;;  %1955 = vmatpush3.bf16.msra.mxu1 %v1984_v31  ;;  %v1542_v31 = vld [vmem:[%s2052_s17 + $0xd1] sm:$0xff] }
  0x39   : > { %1913 = vmatprep.subr.bf16.mxu0 %v1985_v33  ;;  %1948 = vmatprep.subr.bf16.mxu1 %v1985_v33 }
  0x3a   : > { %891 = vrot.lane.b32.xlu1 %v2129_v45, %s2013_s20 }
  0x3b   : > { %889 = vrot.lane.b32.xlu0 %v1800_v38, %s2013_s20  ;;  %v1604_v38 = vld [vmem:[%s2052_s17 + $0x71] sm:$0xff] }
  0x3c   : > { %1914 = vmatpush3.bf16.msra.mxu0 %v1986_v37  ;;  %1956 = vmatpush3.bf16.msra.mxu1 %v1986_v37  ;;  %v1832_v41 = vpack.c.bf16 %v1604_v38, %v1604_v38  ;;  %v1546_v37 = vld [vmem:[%s2052_s17 + $0x1d1] sm:$0xff] }
  0x3d   : > { %1915 = vmatprep.subr.bf16.mxu0 %v1987_v40  ;;  %1949 = vmatprep.subr.bf16.mxu1 %v1987_v40 }
  0x3e   : > { %899 = vrot.lane.b32.xlu1 %v2135_v47, %s2013_s20 }
  0x3f   : > { %897 = vrot.lane.b32.xlu0 %v1804_v42, %s2013_s20  ;;  %v1831_v42 = vpack.c.bf16 %v1603_v39, %v1603_v39 }
  0x40   : > { %1916 = vmatpush3.bf16.msra.mxu0 %v1988_v44  ;;  %1957 = vmatpush3.bf16.msra.mxu1 %v1988_v44 }
  0x41   : > { %1917 = vmatprep.subr.bf16.mxu0 %v1989_v49  ;;  %1950 = vmatprep.subr.bf16.mxu1 %v1989_v49 }
  0x42   : > { %452 = vrot.lane.b32.xlu1 %v1808_v50, %s2014_s21 }
  0x43   : > { %450 = vrot.lane.b32.xlu0 %v1807_v51, %s2014_s21  ;;  %v1836_v51 = vpack.c.bf16 %v1608_v46, %v1608_v46 }
  0x46   : > { %460 = vrot.lane.b32.xlu1 %v1812_v54, %s2014_s21 }
  0x47   : > { %458 = vrot.lane.b32.xlu0 %v2146_v55, %s2014_s21 }
  0x4a   : > { %956 = vrot.lane.b32.xlu1 %v2152_v57, %s2014_s21 }
  0x4b   : > { %954 = vrot.lane.b32.xlu0 %v1808_v50, %s2014_s21  ;;  %v175_v50 = vld [vmem:[%s2052_s17 + $0xc0] sm:$0xff] }
  0x4c   : > { %v1778_v53 = vpack.c.bf16 %v175_v50, %v175_v50 }
  0x4e   : > { %964 = vrot.lane.b32.xlu1 %v2158_v59, %s2014_s21  ;;  %216 = vst.msk [vmem:[#allocation2 + $0x18] sm:$0xf] %vm212_vm0, %v1778_v53  ;;  %722 = vst.msk [vmem:[#allocation2 + $0x14] sm:$0xf] %vm212_vm0, %v1778_v53 }
  0x4f   : > { %962 = vrot.lane.b32.xlu0 %v1812_v54, %s2014_s21  ;;  %v1990_v54 = vld [vmem:[%s2527_s1] sm:$0xff]  }
  0x50   : > { %1918 = vmatpush3.bf16.msra.mxu0 %v1990_v54  ;;  %1958 = vmatpush3.bf16.msra.mxu1 %v1990_v54 }
  0x52   : > { %517 = vrot.lane.b32.xlu1 %v1816_v62, %s2015_s22 }
  0x53   : > { %515 = vrot.lane.b32.xlu0 %v1815_v63, %s2015_s22  ;;  %v2281_v63 = vpack.c.bf16 %v1736_v61, %v1736_v61  ;;  %v1690_v61 = vld [vmem:[%s2052_s17 + $0x220] sm:$0xff] }
  0x56   : > { %525 = vrot.lane.b32.xlu1 %v1820_v2, %s2015_s22 }
  0x57   : > { %523 = vrot.lane.b32.xlu0 %v2169_v4, %s2015_s22 }
  0x5a   : > { %1020 = vrot.lane.b32.xlu1 %v2178_v7, %s2015_s22 }
  0x5b   : > { %1018 = vrot.lane.b32.xlu0 %v1816_v62, %s2015_s22  ;;  %v1782_v62 = vpack.c.bf16 %v179_v60, %v179_v60 }
  0x5d   : > { %220 = vst.msk [vmem:[#allocation2 + $0x38] sm:$0xf] %vm212_vm0, %v1782_v62  ;;  %726 = vst.msk [vmem:[#allocation2 + $0x34] sm:$0xf] %vm212_vm0, %v1782_v62 }
  0x5e   : > { %1028 = vrot.lane.b32.xlu1 %v2190_v13, %s2015_s22 }
  0x5f   : > { %1026 = vrot.lane.b32.xlu0 %v1820_v2, %s2015_s22  ;;  %v1786_v2 = vpack.c.bf16 %v224_v0, %v224_v0 }
  0x62   : > { %583 = vrot.lane.b32.xlu1 %v1824_v18, %s2016_s10 }
  0x63   : > { %581 = vrot.lane.b32.xlu0 %v1823_v19, %s2016_s10 }
  0x66   : > { %591 = vrot.lane.b32.xlu1 %v1828_v24, %s2016_s10 }
  0x67   : > { %589 = vrot.lane.b32.xlu0 %v2213_v25, %s2016_s10 }
  0x6a   : > { %1085 = vrot.lane.b32.xlu1 %v2225_v29, %s2016_s10 }
  0x6b   : > { %1083 = vrot.lane.b32.xlu0 %v1824_v18, %s2016_s10 }
  0x6e   : > { %1093 = vrot.lane.b32.xlu1 %v2237_v36, %s2016_s10 }
  0x6f   : > { %1091 = vrot.lane.b32.xlu0 %v1828_v24, %s2016_s10 }
  0x72   : > { %648 = vrot.lane.b32.xlu1 %v1832_v41, %s2017_s8 }
  0x73   : > { %646 = vrot.lane.b32.xlu0 %v1831_v42, %s2017_s8  ;;  %v1674_v42 = vld [vmem:[%s2052_s17 + $0x211] sm:$0xff] }
  0x76   : > { %656 = vrot.lane.b32.xlu1 %v1836_v51, %s2017_s8 }
  0x77   : > { %654 = vrot.lane.b32.xlu0 %v2261_v52, %s2017_s8 }
  0x7a   : > { %1149 = vrot.lane.b32.xlu1 %v2272_v58, %s2017_s8 }
  0x7b   : > { %1147 = vrot.lane.b32.xlu0 %v1832_v41, %s2017_s8 }
  0x7e   : > { %1157 = vrot.lane.b32.xlu1 %v2281_v63, %s2017_s8 }
  0x7f   : > { %1155 = vrot.lane.b32.xlu0 %v1836_v51, %s2017_s8  ;;  %v1562_v51 = vld [vmem:[%s2052_s17 + $0x1e0] sm:$0xff] }
  0x82   : > { %259 = vrot.lane.b32.xlu1 %v1786_v2, %s2011_s18 }
  0x83   : > { %257 = vrot.lane.b32.xlu0 %v2066_v9, %s2011_s18  ;;  %v1854_v9 = vpack.c.bf16 %v1642_v14, %v1642_v14 }
  0x84   : > { %v262_v10 = vpop.permute.xlu1 %261 }
  0x85   : > { %v254_v12 = vpop.permute.xlu0 %253  ;;  %282 = vst.msk [vmem:[#allocation2 + $0x20] sm:$0xf] %vm277_vm1, %v262_v10 }
  0x86   : > { %278 = vst.msk [vmem:[#allocation2] sm:$0xf] %vm277_vm1, %v254_v12  ;;  %267 = vrot.lane.b32.xlu1 %v1790_v8, %s2011_s18 }
  0x87   : > { %265 = vrot.lane.b32.xlu0 %v2072_v11, %s2011_s18  ;;  %v1794_v11 = vpack.c.bf16 %v1526_v17, %v1526_v17  ;;  %v1590_v17 = vld [vmem:[%s2052_s17 + $0xf0] sm:$0xff] }
  0x88   : > { %v264_v15 = vpop.permute.xlu1 %263 }
  0x89   : > { %v256_v16 = vpop.permute.xlu0 %255  ;;  %283 = vst.msk [vmem:[#allocation2 + $0x28] sm:$0xf] %vm277_vm1, %v264_v15  ;;  %v1706_v15 = vld [vmem:[%s2052_s17 + $0x221] sm:$0xff] }
  0x8a   : > { %279 = vst.msk [vmem:[#allocation2 + $0x8] sm:$0xf] %vm277_vm1, %v256_v16  ;;  %766 = vrot.lane.b32.xlu1 %v2057_v3, %s2011_s18  ;;  %v1798_v3 = vpack.c.bf16 %v1530_v20, %v1530_v20 }
  0x8b   : > { %764 = vrot.lane.b32.xlu0 %v1786_v2, %s2011_s18 }
  0x8c   : > { %v763_v18 = vpop.permute.xlu1 %762 }
  0x8d   : > { %v761_v19 = vpop.permute.xlu0 %760  ;;  %785 = vst.msk [vmem:[#allocation2 + $0xc] sm:$0xf] %vm277_vm1, %v763_v18 }
  0x8e   : > { %784 = vst.msk [vmem:[#allocation2 + $0x4] sm:$0xf] %vm277_vm1, %v761_v19  ;;  %774 = vrot.lane.b32.xlu1 %v1854_v9, %s2011_s18 }
  0x8f   : > { %772 = vrot.lane.b32.xlu0 %v1790_v8, %s2011_s18 }
  0x90   : > { %v771_v21 = vpop.permute.xlu1 %770 }
  0x91   : > { %v769_v22 = vpop.permute.xlu0 %768  ;;  %789 = vst.msk [vmem:[#allocation2 + $0x2c] sm:$0xf] %vm277_vm1, %v771_v21 }
  0x92   : > { %788 = vst.msk [vmem:[#allocation2 + $0x24] sm:$0xf] %vm277_vm1, %v769_v22  ;;  %325 = vrot.lane.b32.xlu1 %v1794_v11, %s2012_s19 }
  0x93   : > { %323 = vrot.lane.b32.xlu0 %v2107_v34, %s2012_s19  ;;  %v1862_v34 = vpack.c.bf16 %v1658_v26, %v1658_v26 }
  0x94   : > { %v322_v23 = vpop.permute.xlu1 %321 }
  0x95   : > { %v320_v24 = vpop.permute.xlu0 %319  ;;  %345 = vst.msk [vmem:[#allocation2 + $0x8] sm:$0xf] %vm343_vm2, %v322_v23  ;;  %v1722_v23 = vld [vmem:[%s2052_s17 + $0x230] sm:$0xff] }
  0x96   : > { %344 = vst.msk [vmem:[#allocation2] sm:$0xf] %vm343_vm2, %v320_v24  ;;  %333 = vrot.lane.b32.xlu1 %v1798_v3, %s2012_s19 }
  0x97   : > { %331 = vrot.lane.b32.xlu0 %v2112_v35, %s2012_s19  ;;  %v1802_v35 = vpack.c.bf16 %v1542_v31, %v1542_v31  ;;  %v1610_v31 = vld [vmem:[%s2052_s17 + $0x1f1] sm:$0xff] }
  0x98   : > { %v330_v27 = vpop.permute.xlu1 %329 }
  0x99   : > { %v328_v28 = vpop.permute.xlu0 %327  ;;  %349 = vst.msk [vmem:[#allocation2 + $0x28] sm:$0xf] %vm343_vm2, %v330_v27  ;;  %v1606_v27 = vld [vmem:[%s2052_s17 + $0xf1] sm:$0xff] }
  0x9a   : > { %348 = vst.msk [vmem:[#allocation2 + $0x20] sm:$0xf] %vm343_vm2, %v328_v28  ;;  %831 = vrot.lane.b32.xlu1 %v2091_v30, %s2012_s19  ;;  %v1806_v30 = vpack.c.bf16 %v1546_v37, %v1546_v37 }
  0x9b   : > { %829 = vrot.lane.b32.xlu0 %v1794_v11, %s2012_s19  ;;  %v1594_v11 = vld [vmem:[%s2052_s17 + $0x1f0] sm:$0xff] }
  0x9c   : > { %v828_v32 = vpop.permute.xlu1 %827 }
  0x9d   : > { %v826_v33 = vpop.permute.xlu0 %825  ;;  %850 = vst.msk [vmem:[#allocation2 + $0xc] sm:$0xf] %vm343_vm2, %v828_v32 }
  0x9e   : > { %849 = vst.msk [vmem:[#allocation2 + $0x4] sm:$0xf] %vm343_vm2, %v826_v33  ;;  %839 = vrot.lane.b32.xlu1 %v1862_v34, %s2012_s19 }
  0x9f   : > { %837 = vrot.lane.b32.xlu0 %v1798_v3, %s2012_s19  ;;  %s1774_s19 = sshll.u32 %s2531_s13, 6 }
  0xa0   : > { %v836_v38 = vpop.permute.xlu1 %835 }
  0xa1   : > { %v834_v39 = vpop.permute.xlu0 %833  ;;  %854 = vst.msk [vmem:[#allocation2 + $0x2c] sm:$0xf] %vm343_vm2, %v836_v38  ;;  %v1738_v38 = vld [vmem:[%s2052_s17 + $0x231] sm:$0xff] }
  0xa2   : > { %853 = vst.msk [vmem:[#allocation2 + $0x24] sm:$0xf] %vm343_vm2, %v834_v39  ;;  %390 = vrot.lane.b32.xlu1 %v1802_v35, %s2013_s20 }
  0xa3   : > { %388 = vrot.lane.b32.xlu0 %v2129_v45, %s2013_s20  ;;  %v1870_v45 = vpack.c.bf16 %v1674_v42, %v1674_v42 }
  0xa4   : > { %v387_v40 = vpop.permute.xlu1 %386 }
  0xa5   : > { %v385_v41 = vpop.permute.xlu0 %384  ;;  %410 = vst.msk [vmem:[#allocation2 + $0x8] sm:$0xf] %vm408_vm3, %v387_v40 }
  0xa6   : > { %409 = vst.msk [vmem:[#allocation2] sm:$0xf] %vm408_vm3, %v385_v41  ;;  %398 = vrot.lane.b32.xlu1 %v1806_v30, %s2013_s20 }
  0xa7   : > { %396 = vrot.lane.b32.xlu0 %v2135_v47, %s2013_s20  ;;  %v1810_v47 = vpack.c.bf16 %v1558_v48, %v1558_v48 }
  0xa8   : > { %v395_v44 = vpop.permute.xlu1 %394 }
  0xa9   : > { %v393_v46 = vpop.permute.xlu0 %392  ;;  %414 = vst.msk [vmem:[#allocation2 + $0x28] sm:$0xf] %vm408_vm3, %v395_v44 }
  0xaa   : > { %413 = vst.msk [vmem:[#allocation2 + $0x20] sm:$0xf] %vm408_vm3, %v393_v46  ;;  %895 = vrot.lane.b32.xlu1 %v2123_v43, %s2013_s20  ;;  %v1814_v43 = vpack.c.bf16 %v1562_v51, %v1562_v51 }
  0xab   : > { %893 = vrot.lane.b32.xlu0 %v1802_v35, %s2013_s20 }
  0xac   : > { %v892_v49 = vpop.permute.xlu1 %891 }
  0xad   : > { %v890_v50 = vpop.permute.xlu0 %889  ;;  %914 = vst.msk [vmem:[#allocation2 + $0xc] sm:$0xf] %vm408_vm3, %v892_v49 }
  0xae   : > { %913 = vst.msk [vmem:[#allocation2 + $0x4] sm:$0xf] %vm408_vm3, %v890_v50  ;;  %903 = vrot.lane.b32.xlu1 %v1870_v45, %s2013_s20 }
  0xaf   : > { %901 = vrot.lane.b32.xlu0 %v1806_v30, %s2013_s20 }
  0xb0   : > { %v900_v53 = vpop.permute.xlu1 %899 }
  0xb1   : > { %v898_v54 = vpop.permute.xlu0 %897  ;;  %918 = vst.msk [vmem:[#allocation2 + $0x2c] sm:$0xf] %vm408_vm3, %v900_v53 }
  0xb2   : > { %917 = vst.msk [vmem:[#allocation2 + $0x24] sm:$0xf] %vm408_vm3, %v898_v54  ;;  %456 = vrot.lane.b32.xlu1 %v1810_v47, %s2014_s21 }
  0xb3   : > { %454 = vrot.lane.b32.xlu0 %v2152_v57, %s2014_s21  ;;  %v1878_v57 = vpack.c.bf16 %v1690_v61, %v1690_v61 }
  0xb4   : > { %v453_v56 = vpop.permute.xlu1 %452 }
  0xb5   : > { %v451_v60 = vpop.permute.xlu0 %450  ;;  %476 = vst.msk [vmem:[#allocation2 + $0x8] sm:$0xf] %vm474_vm4, %v453_v56 }
  0xb6   : > { %475 = vst.msk [vmem:[#allocation2] sm:$0xf] %vm474_vm4, %v451_v60  ;;  %464 = vrot.lane.b32.xlu1 %v1814_v43, %s2014_s21 }
  0xb7   : > { %462 = vrot.lane.b32.xlu0 %v2158_v59, %s2014_s21  ;;  %v1818_v59 = vpack.c.bf16 %v1574_v1, %v1574_v1 }
  0xb8   : > { %v461_v62 = vpop.permute.xlu1 %460 }
  0xb9   : > { %v459_v0 = vpop.permute.xlu0 %458  ;;  %480 = vst.msk [vmem:[#allocation2 + $0x28] sm:$0xf] %vm474_vm4, %v461_v62 }
  0xba   : > { %479 = vst.msk [vmem:[#allocation2 + $0x20] sm:$0xf] %vm474_vm4, %v459_v0  ;;  %960 = vrot.lane.b32.xlu1 %v2146_v55, %s2014_s21  ;;  %v1822_v55 = vpack.c.bf16 %v1578_v6, %v1578_v6 }
  0xbb   : > { %958 = vrot.lane.b32.xlu0 %v1810_v47, %s2014_s21 }
  0xbc   : > { %v957_v2 = vpop.permute.xlu1 %956 }
  0xbd   : > { %v955_v5 = vpop.permute.xlu0 %954  ;;  %979 = vst.msk [vmem:[#allocation2 + $0xc] sm:$0xf] %vm474_vm4, %v957_v2 }
  0xbe   : > { %978 = vst.msk [vmem:[#allocation2 + $0x4] sm:$0xf] %vm474_vm4, %v955_v5  ;;  %968 = vrot.lane.b32.xlu1 %v1878_v57, %s2014_s21 }
  0xbf   : > { %966 = vrot.lane.b32.xlu0 %v1814_v43, %s2014_s21 }
  0xc0   : > { %v965_v8 = vpop.permute.xlu1 %964 }
  0xc1   : > { %v963_v10 = vpop.permute.xlu0 %962  ;;  %983 = vst.msk [vmem:[#allocation2 + $0x2c] sm:$0xf] %vm474_vm4, %v965_v8 }
  0xc2   : > { %982 = vst.msk [vmem:[#allocation2 + $0x24] sm:$0xf] %vm474_vm4, %v963_v10  ;;  %521 = vrot.lane.b32.xlu1 %v1818_v59, %s2015_s22 }
  0xc3   : > { %519 = vrot.lane.b32.xlu0 %v2178_v7, %s2015_s22  ;;  %v1886_v7 = vpack.c.bf16 %v1706_v15, %v1706_v15 }
  0xc4   : > { %v518_v12 = vpop.permute.xlu1 %517 }
  0xc5   : > { %v516_v14 = vpop.permute.xlu0 %515  ;;  %541 = vst.msk [vmem:[#allocation2 + $0x8] sm:$0xf] %vm539_vm5, %v518_v12 }
  0xc6   : > { %540 = vst.msk [vmem:[#allocation2] sm:$0xf] %vm539_vm5, %v516_v14  ;;  %529 = vrot.lane.b32.xlu1 %v1822_v55, %s2015_s22 }
  0xc7   : > { %527 = vrot.lane.b32.xlu0 %v2190_v13, %s2015_s22  ;;  %v1826_v13 = vpack.c.bf16 %v1590_v17, %v1590_v17 }
  0xc8   : > { %v526_v16 = vpop.permute.xlu1 %525 }
  0xc9   : > { %v524_v9 = vpop.permute.xlu0 %523  ;;  %545 = vst.msk [vmem:[#allocation2 + $0x28] sm:$0xf] %vm539_vm5, %v526_v16 }
  0xca   : > { %544 = vst.msk [vmem:[#allocation2 + $0x20] sm:$0xf] %vm539_vm5, %v524_v9  ;;  %1024 = vrot.lane.b32.xlu1 %v2169_v4, %s2015_s22  ;;  %v1830_v4 = vpack.c.bf16 %v1594_v11, %v1594_v11 }
  0xcb   : > { %1022 = vrot.lane.b32.xlu0 %v1818_v59, %s2015_s22 }
  0xcc   : > { %v1021_v18 = vpop.permute.xlu1 %1020 }
  0xcd   : > { %v1019_v19 = vpop.permute.xlu0 %1018  ;;  %1043 = vst.msk [vmem:[#allocation2 + $0xc] sm:$0xf] %vm539_vm5, %v1021_v18 }
  0xce   : > { %1042 = vst.msk [vmem:[#allocation2 + $0x4] sm:$0xf] %vm539_vm5, %v1019_v19  ;;  %1032 = vrot.lane.b32.xlu1 %v1886_v7, %s2015_s22 }
  0xcf   : > { %1030 = vrot.lane.b32.xlu0 %v1822_v55, %s2015_s22  ;;  %s2505_s22 = scalar_lea.vmem %s2529_s3, %s1774_s19 }
  0xd0   : > { %v1029_v20 = vpop.permute.xlu1 %1028 }
  0xd1   : > { %v1027_v21 = vpop.permute.xlu0 %1026  ;;  %1047 = vst.msk [vmem:[#allocation2 + $0x2c] sm:$0xf] %vm539_vm5, %v1029_v20 }
  0xd2   : > { %1046 = vst.msk [vmem:[#allocation2 + $0x24] sm:$0xf] %vm539_vm5, %v1027_v21  ;;  %587 = vrot.lane.b32.xlu1 %v1826_v13, %s2016_s10 }
  0xd3   : > { %585 = vrot.lane.b32.xlu0 %v2225_v29, %s2016_s10  ;;  %v1894_v29 = vpack.c.bf16 %v1722_v23, %v1722_v23 }
  0xd4   : > { %v584_v22 = vpop.permute.xlu1 %583 }
  0xd5   : > { %v582_v3 = vpop.permute.xlu0 %581  ;;  %607 = vst.msk [vmem:[#allocation2 + $0x8] sm:$0xf] %vm605_vm6, %v584_v22 }
  0xd6   : > { %606 = vst.msk [vmem:[#allocation2] sm:$0xf] %vm605_vm6, %v582_v3  ;;  %595 = vrot.lane.b32.xlu1 %v1830_v4, %s2016_s10 }
  0xd7   : > { %593 = vrot.lane.b32.xlu0 %v2237_v36, %s2016_s10  ;;  %v1834_v36 = vpack.c.bf16 %v1606_v27, %v1606_v27 }
  0xd8   : > { %v592_v24 = vpop.permute.xlu1 %591 }
  0xd9   : > { %v590_v26 = vpop.permute.xlu0 %589  ;;  %611 = vst.msk [vmem:[#allocation2 + $0x28] sm:$0xf] %vm605_vm6, %v592_v24 }
  0xda   : > { %610 = vst.msk [vmem:[#allocation2 + $0x20] sm:$0xf] %vm605_vm6, %v590_v26  ;;  %1089 = vrot.lane.b32.xlu1 %v2213_v25, %s2016_s10  ;;  %v1838_v25 = vpack.c.bf16 %v1610_v31, %v1610_v31 }
  0xdb   : > { %1087 = vrot.lane.b32.xlu0 %v1826_v13, %s2016_s10 }
  0xdc   : > { %v1086_v28 = vpop.permute.xlu1 %1085 }
  0xdd   : > { %v1084_v34 = vpop.permute.xlu0 %1083  ;;  %1108 = vst.msk [vmem:[#allocation2 + $0xc] sm:$0xf] %vm605_vm6, %v1086_v28 }
  0xde   : > { %1107 = vst.msk [vmem:[#allocation2 + $0x4] sm:$0xf] %vm605_vm6, %v1084_v34  ;;  %1097 = vrot.lane.b32.xlu1 %v1894_v29, %s2016_s10 }
  0xdf   : > { %1095 = vrot.lane.b32.xlu0 %v1830_v4, %s2016_s10 }
  0xe0   : > { %v1094_v32 = vpop.permute.xlu1 %1093 }
  0xe1   : > { %v1092_v33 = vpop.permute.xlu0 %1091  ;;  %1112 = vst.msk [vmem:[#allocation2 + $0x2c] sm:$0xf] %vm605_vm6, %v1094_v32 }
  0xe2   : > { %1111 = vst.msk [vmem:[#allocation2 + $0x24] sm:$0xf] %vm605_vm6, %v1092_v33  ;;  %652 = vrot.lane.b32.xlu1 %v1834_v36, %s2017_s8 }
  0xe3   : > { %650 = vrot.lane.b32.xlu0 %v2272_v58, %s2017_s8  ;;  %v1902_v58 = vpack.c.bf16 %v1738_v38, %v1738_v38 }
  0xe4   : > { %v649_v35 = vpop.permute.xlu1 %648 }
  0xe5   : > { %v647_v37 = vpop.permute.xlu0 %646  ;;  %672 = vst.msk [vmem:[#allocation2 + $0x8] sm:$0xf] %vm670_vm7, %v649_v35 }
  0xe6   : > { %671 = vst.msk [vmem:[#allocation2] sm:$0xf] %vm670_vm7, %v647_v37  ;;  %660 = vrot.lane.b32.xlu1 %v1838_v25, %s2017_s8 }
  0xe7   : > { %658 = vrot.lane.b32.xlu0 %v2281_v63, %s2017_s8 }
  0xe8   : > { %v657_v39 = vpop.permute.xlu1 %656 }
  0xe9   : > { %v655_v30 = vpop.permute.xlu0 %654  ;;  %676 = vst.msk [vmem:[#allocation2 + $0x28] sm:$0xf] %vm670_vm7, %v657_v39 }
  0xea   : > { %675 = vst.msk [vmem:[#allocation2 + $0x20] sm:$0xf] %vm670_vm7, %v655_v30  ;;  %1153 = vrot.lane.b32.xlu1 %v2261_v52, %s2017_s8 }
  0xeb   : > { %1151 = vrot.lane.b32.xlu0 %v1834_v36, %s2017_s8 }
  0xec   : > { %v1150_v40 = vpop.permute.xlu1 %1149 }
  0xed   : > { %v1148_v41 = vpop.permute.xlu0 %1147  ;;  %1172 = vst.msk [vmem:[#allocation2 + $0xc] sm:$0xf] %vm670_vm7, %v1150_v40  ;;  %v1991_v46 = vld [vmem:[#allocation2] ss:$8 sps:$4 sm:$0xff]  }
  0xee   : > { %1171 = vst.msk [vmem:[#allocation2 + $0x4] sm:$0xf] %vm670_vm7, %v1148_v41  ;;  %1161 = vrot.lane.b32.xlu1 %v1902_v58, %s2017_s8 }
  0xef   : > { %1159 = vrot.lane.b32.xlu0 %v1838_v25, %s2017_s8 }
  0xf0   : > { %v1158_v63 = vpop.permute.xlu1 %1157 }
  0xf1   : > { %v1156_v42 = vpop.permute.xlu0 %1155  ;;  %1176 = vst.msk [vmem:[#allocation2 + $0x2c] sm:$0xf] %vm670_vm7, %v1158_v63  ;;  %v1994_v50 = vld [vmem:[#allocation2 + $0x20] ss:$8 sps:$4 sm:$0xff]  }
  0xf2   : > { %1175 = vst.msk [vmem:[#allocation2 + $0x24] sm:$0xf] %vm670_vm7, %v1156_v42 }
  0xf4   : > { %v260_v52 = vpop.permute.xlu1 %259 }
  0xf5   : > { %v258_v44 = vpop.permute.xlu0 %257  ;;  %281 = vst.msk [vmem:[#allocation2 + $0x18] sm:$0xf] %vm277_vm1, %v260_v52  ;;  %v1993_v45 = vld [vmem:[#allocation2 + $0x4] ss:$8 sps:$4 sm:$0xff]  }
  0xf6   : > { %280 = vst.msk [vmem:[#allocation2 + $0x10] sm:$0xf] %vm277_vm1, %v258_v44  ;;  %1394 = vmatprep.mubr.bf16.mxu0 %v1993_v45  ;;  %v1747_v44 = vld [vmem:[%s2528_s2] ss:$0 sm:$0xff] }
  0xf7   : > { %1395 = vmatmul.mubr.bf16.vlgmr.msra.gmra.mxu0 %v1991_v46 }
  0xf8   : > { %v268_v48 = vpop.permute.xlu1 %267 }
  0xf9   : > { %v266_v49 = vpop.permute.xlu0 %265  ;;  %285 = vst.msk [vmem:[#allocation2 + $0x38] sm:$0xf] %vm277_vm1, %v268_v48  ;;  %v1996_v47 = vld [vmem:[#allocation2 + $0x24] ss:$8 sps:$4 sm:$0xff]  }
  0xfa   : > { %284 = vst.msk [vmem:[#allocation2 + $0x30] sm:$0xf] %vm277_vm1, %v266_v49  ;;  %1410 = vmatprep.mubr.bf16.mxu1 %v1996_v47 }
  0xfb   : > { %1411 = vmatmul.mubr.bf16.vlgmr.msra.gmra.mxu1 %v1994_v50 }
  0xfc   : > { %v767_v51 = vpop.permute.xlu1 %766 }
  0xfd   : > { %v765_v53 = vpop.permute.xlu0 %764  ;;  %787 = vst.msk [vmem:[#allocation2 + $0x1c] sm:$0xf] %vm277_vm1, %v767_v51 }
  0xfe   : > { %786 = vst.msk [vmem:[#allocation2 + $0x14] sm:$0xf] %vm277_vm1, %v765_v53 }
 0x100   : > { %v775_v54 = vpop.permute.xlu1 %774 }
 0x101   : > { %v773_v43 = vpop.permute.xlu0 %772  ;;  %791 = vst.msk [vmem:[#allocation2 + $0x3c] sm:$0xf] %vm277_vm1, %v775_v54 }
 0x102   : > { %790 = vst.msk [vmem:[#allocation2 + $0x34] sm:$0xf] %vm277_vm1, %v773_v43 }
 0x104   : > { %v326_v56 = vpop.permute.xlu1 %325 }
 0x105   : > { %v324_v60 = vpop.permute.xlu0 %323  ;;  %347 = vst.msk [vmem:[#allocation2 + $0x18] sm:$0xf] %vm343_vm2, %v326_v56 }
 0x106   : > { %346 = vst.msk [vmem:[#allocation2 + $0x10] sm:$0xf] %vm343_vm2, %v324_v60 }
 0x108   : > { %v334_v61 = vpop.permute.xlu1 %333 }
 0x109   : > { %v332_v62 = vpop.permute.xlu0 %331  ;;  %351 = vst.msk [vmem:[#allocation2 + $0x38] sm:$0xf] %vm343_vm2, %v334_v61 }
 0x10a   : > { %350 = vst.msk [vmem:[#allocation2 + $0x30] sm:$0xf] %vm343_vm2, %v332_v62 }
 0x10c   : > { %v832_v0 = vpop.permute.xlu1 %831 }
 0x10d   : > { %v830_v57 = vpop.permute.xlu0 %829  ;;  %852 = vst.msk [vmem:[#allocation2 + $0x1c] sm:$0xf] %vm343_vm2, %v832_v0 }
 0x10e   : > { %851 = vst.msk [vmem:[#allocation2 + $0x14] sm:$0xf] %vm343_vm2, %v830_v57 }
 0x110   : > { %v840_v1 = vpop.permute.xlu1 %839 }
 0x111   : > { %v838_v2 = vpop.permute.xlu0 %837  ;;  %856 = vst.msk [vmem:[#allocation2 + $0x3c] sm:$0xf] %vm343_vm2, %v840_v1 }
 0x112   : > { %855 = vst.msk [vmem:[#allocation2 + $0x34] sm:$0xf] %vm343_vm2, %v838_v2 }
 0x114   : > { %v391_v5 = vpop.permute.xlu1 %390 }
 0x115   : > { %v389_v59 = vpop.permute.xlu0 %388  ;;  %412 = vst.msk [vmem:[#allocation2 + $0x18] sm:$0xf] %vm408_vm3, %v391_v5 }
 0x116   : > { %411 = vst.msk [vmem:[#allocation2 + $0x10] sm:$0xf] %vm408_vm3, %v389_v59 }
 0x118   : > { %v399_v6 = vpop.permute.xlu1 %398 }
 0x119   : > { %v397_v8 = vpop.permute.xlu0 %396  ;;  %416 = vst.msk [vmem:[#allocation2 + $0x38] sm:$0xf] %vm408_vm3, %v399_v6 }
 0x11a   : > { %415 = vst.msk [vmem:[#allocation2 + $0x30] sm:$0xf] %vm408_vm3, %v397_v8 }
 0x11c   : > { %v896_v10 = vpop.permute.xlu1 %895 }
 0x11d   : > { %v894_v55 = vpop.permute.xlu0 %893  ;;  %916 = vst.msk [vmem:[#allocation2 + $0x1c] sm:$0xf] %vm408_vm3, %v896_v10 }
 0x11e   : > { %915 = vst.msk [vmem:[#allocation2 + $0x14] sm:$0xf] %vm408_vm3, %v894_v55 }
 0x120   : > { %v904_v12 = vpop.permute.xlu1 %903 }
 0x121   : > { %v902_v14 = vpop.permute.xlu0 %901  ;;  %920 = vst.msk [vmem:[#allocation2 + $0x3c] sm:$0xf] %vm408_vm3, %v904_v12 }
 0x122   : > { %919 = vst.msk [vmem:[#allocation2 + $0x34] sm:$0xf] %vm408_vm3, %v902_v14 }
 0x124   : > { %v457_v15 = vpop.permute.xlu1 %456 }
 0x125   : > { %v455_v16 = vpop.permute.xlu0 %454  ;;  %478 = vst.msk [vmem:[#allocation2 + $0x18] sm:$0xf] %vm474_vm4, %v457_v15 }
 0x126   : > { %477 = vst.msk [vmem:[#allocation2 + $0x10] sm:$0xf] %vm474_vm4, %v455_v16 }
 0x128   : > { %v465_v9 = vpop.permute.xlu1 %464 }
 0x129   : > { %v463_v7 = vpop.permute.xlu0 %462  ;;  %482 = vst.msk [vmem:[#allocation2 + $0x38] sm:$0xf] %vm474_vm4, %v465_v9 }
 0x12a   : > { %481 = vst.msk [vmem:[#allocation2 + $0x30] sm:$0xf] %vm474_vm4, %v463_v7 }
 0x12c   : > { %v961_v17 = vpop.permute.xlu1 %960 }
 0x12d   : > { %v959_v18 = vpop.permute.xlu0 %958  ;;  %981 = vst.msk [vmem:[#allocation2 + $0x1c] sm:$0xf] %vm474_vm4, %v961_v17 }
 0x12e   : > { %980 = vst.msk [vmem:[#allocation2 + $0x14] sm:$0xf] %vm474_vm4, %v959_v18 }
 0x130   : > { %v969_v19 = vpop.permute.xlu1 %968 }
 0x131   : > { %v967_v13 = vpop.permute.xlu0 %966  ;;  %985 = vst.msk [vmem:[#allocation2 + $0x3c] sm:$0xf] %vm474_vm4, %v969_v19 }
 0x132   : > { %984 = vst.msk [vmem:[#allocation2 + $0x34] sm:$0xf] %vm474_vm4, %v967_v13 }
 0x134   : > { %v522_v11 = vpop.permute.xlu1 %521 }
 0x135   : > { %v520_v20 = vpop.permute.xlu0 %519  ;;  %543 = vst.msk [vmem:[#allocation2 + $0x18] sm:$0xf] %vm539_vm5, %v522_v11 }
 0x136   : > { %542 = vst.msk [vmem:[#allocation2 + $0x10] sm:$0xf] %vm539_vm5, %v520_v20 }
 0x138   : > { %v530_v21 = vpop.permute.xlu1 %529 }
 0x139   : > { %v528_v4 = vpop.permute.xlu0 %527  ;;  %547 = vst.msk [vmem:[#allocation2 + $0x38] sm:$0xf] %vm539_vm5, %v530_v21 }
 0x13a   : > { %546 = vst.msk [vmem:[#allocation2 + $0x30] sm:$0xf] %vm539_vm5, %v528_v4 }
 0x13c   : > { %v1025_v22 = vpop.permute.xlu1 %1024 }
 0x13d   : > { %v1023_v3 = vpop.permute.xlu0 %1022  ;;  %1045 = vst.msk [vmem:[#allocation2 + $0x1c] sm:$0xf] %vm539_vm5, %v1025_v22 }
 0x13e   : > { %1044 = vst.msk [vmem:[#allocation2 + $0x14] sm:$0xf] %vm539_vm5, %v1023_v3 }
 0x140   : > { %v1033_v23 = vpop.permute.xlu1 %1032 }
 0x141   : > { %v1031_v24 = vpop.permute.xlu0 %1030  ;;  %1049 = vst.msk [vmem:[#allocation2 + $0x3c] sm:$0xf] %vm539_vm5, %v1033_v23 }
 0x142   : > { %1048 = vst.msk [vmem:[#allocation2 + $0x34] sm:$0xf] %vm539_vm5, %v1031_v24 }
 0x144   : > { %v588_v26 = vpop.permute.xlu1 %587 }
 0x145   : > { %v586_v29 = vpop.permute.xlu0 %585  ;;  %609 = vst.msk [vmem:[#allocation2 + $0x18] sm:$0xf] %vm605_vm6, %v588_v26 }
 0x146   : > { %608 = vst.msk [vmem:[#allocation2 + $0x10] sm:$0xf] %vm605_vm6, %v586_v29 }
 0x148   : > { %v596_v27 = vpop.permute.xlu1 %595 }
 0x149   : > { %v594_v28 = vpop.permute.xlu0 %593  ;;  %613 = vst.msk [vmem:[#allocation2 + $0x38] sm:$0xf] %vm605_vm6, %v596_v27 }
 0x14a   : > { %612 = vst.msk [vmem:[#allocation2 + $0x30] sm:$0xf] %vm605_vm6, %v594_v28 }
 0x14c   : > { %v1090_v34 = vpop.permute.xlu1 %1089 }
 0x14d   : > { %v1088_v36 = vpop.permute.xlu0 %1087  ;;  %1110 = vst.msk [vmem:[#allocation2 + $0x1c] sm:$0xf] %vm605_vm6, %v1090_v34 }
 0x14e   : > { %1109 = vst.msk [vmem:[#allocation2 + $0x14] sm:$0xf] %vm605_vm6, %v1088_v36 }
 0x150   : > { %v1098_v31 = vpop.permute.xlu1 %1097 }
 0x151   : > { %v1096_v32 = vpop.permute.xlu0 %1095  ;;  %1114 = vst.msk [vmem:[#allocation2 + $0x3c] sm:$0xf] %vm605_vm6, %v1098_v31 }
 0x152   : > { %1113 = vst.msk [vmem:[#allocation2 + $0x34] sm:$0xf] %vm605_vm6, %v1096_v32 }
 0x154   : > { %v653_v33 = vpop.permute.xlu1 %652 }
 0x155   : > { %v651_v25 = vpop.permute.xlu0 %650  ;;  %674 = vst.msk [vmem:[#allocation2 + $0x18] sm:$0xf] %vm670_vm7, %v653_v33 }
 0x156   : > { %673 = vst.msk [vmem:[#allocation2 + $0x10] sm:$0xf] %vm670_vm7, %v651_v25 }
 0x158   : > { %v661_v35 = vpop.permute.xlu1 %660 }
 0x159   : > { %v659_v37 = vpop.permute.xlu0 %658  ;;  %678 = vst.msk [vmem:[#allocation2 + $0x38] sm:$0xf] %vm670_vm7, %v661_v35 }
 0x15a   : > { %677 = vst.msk [vmem:[#allocation2 + $0x30] sm:$0xf] %vm670_vm7, %v659_v37 }
 0x15c   : > { %v1154_v38 = vpop.permute.xlu1 %1153 }
 0x15d   : > { %v1152_v39 = vpop.permute.xlu0 %1151  ;;  %1174 = vst.msk [vmem:[#allocation2 + $0x1c] sm:$0xf] %vm670_vm7, %v1154_v38  ;;  %v1999_v41 = vld [vmem:[#allocation2 + $0x10] ss:$8 sps:$4 sm:$0xff]  }
 0x15e   : > { %1173 = vst.msk [vmem:[#allocation2 + $0x14] sm:$0xf] %vm670_vm7, %v1152_v39 }
 0x160   : > { %v1162_v30 = vpop.permute.xlu1 %1161 }
 0x161   : > { %v1160_v58 = vpop.permute.xlu0 %1159  ;;  %1178 = vst.msk [vmem:[#allocation2 + $0x3c] sm:$0xf] %vm670_vm7, %v1162_v30  ;;  %v2002_v42 = vld [vmem:[#allocation2 + $0x30] ss:$8 sps:$4 sm:$0xff]  }
 0x162   : > { %1177 = vst.msk [vmem:[#allocation2 + $0x34] sm:$0xf] %vm670_vm7, %v1160_v58 }
 0x165   : > { %v1997_v40 = vld [vmem:[#allocation2 + $0x14] ss:$8 sps:$4 sm:$0xff]  }
 0x166   : > { %1402 = vmatprep.mubr.bf16.mxu0 %v1997_v40 }
 0x167   : > { %1403 = vmatmul.mubr.bf16.gmra.mxu0 %v1999_v41 }
 0x169   : > { %v2000_v63 = vld [vmem:[#allocation2 + $0x34] ss:$8 sps:$4 sm:$0xff]  }
 0x16a   : > { %1418 = vmatprep.mubr.bf16.mxu1 %v2000_v63 }
 0x16b   : > { %1419 = vmatmul.mubr.bf16.gmra.mxu1 %v2002_v42 }
 0x1b7   : > { %v1919_v52 = vpop.f32.mrf.mxu0 }
 0x1b9   : > { %v1920_v46 = vpop.f32.mrf.mxu0 }
 0x1ba   : > { %v1921_v45 = vadd.f32 %v1920_v46, %v1919_v52 }
 0x1bb   : > { %v1922_v48 = vpop.f32.mrf.mxu0  ;;  %v1931_v49 = vpop.f32.mrf.mxu1 }
 0x1bc   : > { %v1397_v50 = vadd.f32 %v1921_v45, %v1747_v44 }
 0x1bd   : > { %v1923_v47 = vpop.f32.mrf.mxu0  ;;  %v1932_v51 = vpop.f32.mrf.mxu1 }
 0x1be   : > { %v1427_v53 = vmax.f32 %v1397_v50, 0.0  ;;  %v1924_v54 = vadd.f32 %v1923_v47, %v1922_v48  ;;  %v1933_v43 = vadd.f32 %v1932_v51, %v1931_v49 }
 0x1bf   : > { %v1934_v56 = vpop.f32.mrf.mxu1 }
 0x1c0   : > { %1436 = vst.msk [vmem:[%s2505_s22] sm:$0xff] %vm1435_vm8, %v1427_v53  ;;  %v1400_v60 = vadd.f32 %v1924_v54, %v1747_v44  ;;  %v1413_v61 = vadd.f32 %v1933_v43, %v1747_v44 }
 0x1c1   : > { %v1935_v62 = vpop.f32.mrf.mxu1 }
 0x1c2   : > { %v1428_v0 = vmax.f32 %v1400_v60, 0.0  ;;  %v1431_v57 = vmax.f32 %v1413_v61, 0.0  ;;  %v1936_v1 = vadd.f32 %v1935_v62, %v1934_v56 }
 0x1c4   : > { %1437 = vst.msk [vmem:[%s2505_s22 + $0x8] sm:$0xff] %vm1435_vm8, %v1428_v0  ;;  %1440 = vst.msk [vmem:[%s2505_s22 + $0x20] sm:$0xff] %vm1435_vm8, %v1431_v57  ;;  %v1416_v2 = vadd.f32 %v1936_v1, %v1747_v44 }
 0x1c6   : > { %v1432_v5 = vmax.f32 %v1416_v2, 0.0 }
 0x1c8   : > { %1441 = vst.msk [vmem:[%s2505_s22 + $0x28] sm:$0xff] %vm1435_vm8, %v1432_v5 }
 0x227   : > { %v1925_v59 = vpop.f32.mrf.mxu0 }
 0x229   : > { %v1926_v6 = vpop.f32.mrf.mxu0 }
 0x22a   : > { %v1927_v8 = vadd.f32 %v1926_v6, %v1925_v59 }
 0x22b   : > { %v1928_v10 = vpop.f32.mrf.mxu0  ;;  %v1937_v55 = vpop.f32.mrf.mxu1 }
 0x22c   : > { %v1405_v12 = vadd.f32 %v1927_v8, %v1747_v44 }
 0x22d   : > { %v1929_v14 = vpop.f32.mrf.mxu0  ;;  %v1938_v15 = vpop.f32.mrf.mxu1 }
 0x22e   : > { %v1429_v16 = vmax.f32 %v1405_v12, 0.0  ;;  %v1930_v9 = vadd.f32 %v1929_v14, %v1928_v10  ;;  %v1939_v7 = vadd.f32 %v1938_v15, %v1937_v55 }
 0x22f   : > { %v1940_v17 = vpop.f32.mrf.mxu1 }
 0x230   : > { %1438 = vst.msk [vmem:[%s2505_s22 + $0x10] sm:$0xff] %vm1435_vm8, %v1429_v16  ;;  %v1408_v18 = vadd.f32 %v1930_v9, %v1747_v44  ;;  %v1421_v19 = vadd.f32 %v1939_v7, %v1747_v44 }
 0x231   : > { %v1941_v13 = vpop.f32.mrf.mxu1 }
 0x232   : > { %v1430_v11 = vmax.f32 %v1408_v18, 0.0  ;;  %v1433_v20 = vmax.f32 %v1421_v19, 0.0  ;;  %v1942_v21 = vadd.f32 %v1941_v13, %v1940_v17 }
 0x234   : > { %1439 = vst.msk [vmem:[%s2505_s22 + $0x18] sm:$0xff] %vm1435_vm8, %v1430_v11  ;;  %1442 = vst.msk [vmem:[%s2505_s22 + $0x30] sm:$0xff] %vm1435_vm8, %v1433_v20  ;;  %v1424_v4 = vadd.f32 %v1942_v21, %v1747_v44 }
 0x236   : > { %v1434_v22 = vmax.f32 %v1424_v4, 0.0 }
 0x238   : > { %1443 = vst.msk [vmem:[%s2505_s22 + $0x38] sm:$0xff] %vm1435_vm8, %v1434_v22 }
 0x239 PF: > { %s13_s12 = sadd.s32 1, %s2009_s12  }
 0x23a   : > { %p10_p4 = scmp.ge.s32.totalorder %s13_s12, 4  }
 0x23c   :  { %12 = sbr.rel (!%p10_p4) target bundleno = 1 (0x1), region = 69 }

// kernel: _lambda_.5
= control target key start
LH: loop header
LB: loop body
LE: loop exit
PB: predicated region body
PF: predicated region fallthrough
CT: control target
= control target key end

     0   :  { %s2227_s12 = smov 0   ;;  %s2655_s0 = inlined_call_operand.vmem [shape: f32[2,4,2,4,64], index: 0, kind: input, shape index: {}]   ;;  %s2656_s1 = inlined_call_operand.vmem [shape: bf16[512,64], index: 1, kind: input, shape index: {}]   ;;  %s2657_s2 = inlined_call_operand.vmem [shape: f32[1,64], index: 2, kind: input, shape index: {}]   ;;  %s2658_s3 = inlined_call_operand.vmem [shape: f32[2,3,3,64], index: 3, kind: output, shape index: {}]  }
   0x1 LB: > { %s1981_s13 = sadd.s32 4294967295, %s2203_s12   ;;  %p1985_p0 = scmp.ge.s32.totalorder %s2203_s12, 1  ;;  %s2203_s12 = sphi %s2227_s12, %s13_s12  }
   0x2   : > { %p137_p1 = scmp.lt.s32.totalorder %s2203_s12, 3 }
   0x4   : > { %p138_p2 = pnand %p1985_p0, %p137_p1 }
   0x5   : > { %p161_p3 = scmp.lt.s32.totalorder (!%p138_p2), %s1981_s13, 1  ;;  %s2206_s11 = smov (!%p138_p2), 64  }
   0x6   : > { %141 = sbr.rel (%p138_p2) target bundleno = 391 (0x187), region = 32 }
   0xb   : > { %v189_v0 = vlaneseq  ;;  %v2205_v1 = vmov 1966171168   ;;  %v2159_v3 = vld [vmem:[%s2656_s1 + $0x78] sm:$0xff]   ;;  %s2664_s13 = smov (!%p161_p3, %s1981_s13), 1  ;;  %v2161_v6 = vld [vmem:[%s2656_s1 + $0x70] sm:$0xff]   ;;  %v2165_v16 = vld [vmem:[%s2656_s1 + $0x68] sm:$0xff]  }
   0xc   : > { %v187_v2 = vunpack.c.l.s4 %v2205_v1  ;;  %v2160_v5 = vld [vmem:[%s2656_s1 + $0x38] sm:$0xff]   ;;  %2104 = vmatprep.subr.bf16.mxu0 %v2159_v3  ;;  %s2087_s20 = sshll.u32 %s2664_s13, 5  ;;  %v2163_v10 = vld [vmem:[%s2656_s1 + $0x30] sm:$0xff]   ;;  %v2167_v41 = vld [vmem:[%s2656_s1 + $0x28] sm:$0xff]   ;;  %vm322_vm0 = vcmask 516096   ;;  %vm320_vm3 = vcmask 519168  }
   0xd   : > { %v190_v4 = vshrl.u32 %v189_v0, 7  ;;  %2105 = vmatpush3.bf16.msra.mxu0 %v2160_v5  ;;  %v2162_v8 = vld [vmem:[%s2656_s1 + $0xf8] sm:$0xff]   ;;  %s2253_s25 = scalar_lea.vmem %s2655_s0, %s2087_s20  ;;  %v2166_v40 = vld [vmem:[%s2656_s1 + $0xf0] sm:$0xff]   ;;  %v2169_v0 = vld [vmem:[%s2656_s1 + $0x60] sm:$0xff]   ;;  %vm323_vm1 = vsmask.f32 256 }
   0xe   : > { %v188_v7 = vunpack.c.0.s8 %v187_v2  ;;  %2106 = vmatprep.subr.bf16.mxu0 %v2161_v6  ;;  %v1996_v11 = vld.sshfl [vmem:[%s2253_s25 + $0x11] sm:$0x13 pattern:$0x75316420]  ;;  %2126 = vmatprep.subr.bf16.mxu1 %v2162_v8  ;;  %v2164_v15 = vld [vmem:[%s2656_s1 + $0xb8] sm:$0xff]   ;;  %v2170_v5 = vld [vmem:[%s2656_s1 + $0xe8] sm:$0xff]  }
   0xf   : > { %v387_v13 = vcombine.high %v1996_v11, %v1996_v11  ;;  %v2044_v14 = vld.sshfl [vmem:[%s2253_s25 + $0x1d] sm:$0x13 pattern:$0x75316420]  ;;  %2127 = vmatpush3.bf16.msra.mxu1 %v2164_v15  ;;  %v2168_v55 = vld [vmem:[%s2656_s1 + $0xb0] sm:$0xff]   ;;  %vm2448_vm2 = vmand %vm322_vm0, %vm323_vm1  ;;  %vm482_vm4 = vcmask 1040896  }
  0x10   : > { %v2255_v9 = vsub.s32 %v188_v7, %v190_v4  ;;  %v1317_v18 = vcombine.high %v2044_v14, %v2044_v14  ;;  %v2275_v19 = vld.sshfl [vmem:[%s2253_s25 + $0x15] sm:$0x13 pattern:$0x75316420]  ;;  %2128 = vmatprep.subr.bf16.mxu1 %v2166_v40  ;;  %vm2616_vm5 = vmand %vm482_vm4, %vm323_vm1  ;;  %vm480_vm6 = vcmask 1043968   ;;  %s2148_s9 = smul.u32 12, %s2664_s13 }
  0x11   : > { %2107 = vmatpush3.bf16.msra.mxu0 %v2163_v10  ;;  %v699_v22 = vcombine.high %v2275_v19, %v2275_v19  ;;  %v1994_v24 = vld.sshfl [vmem:[%s2253_s25 + $0x1] sm:$0x13 pattern:$0x75316420]  ;;  %vm1922_vm7 = vcmask 518144  }
  0x12   : > { %v2262_v12 = vrot.slane %v1996_v11, %v2255_v9  ;;  %v2272_v17 = vrot.slane %v2044_v14, %v2255_v9  ;;  %v2282_v21 = vrot.slane %v387_v13, %v2255_v9  ;;  %v2288_v23 = vrot.slane %v2275_v19, %v2255_v9  ;;  %v1995_v27 = vld.sshfl [vmem:[%s2253_s25 + $0x9] sm:$0x13 pattern:$0x75316420]  ;;  %2108 = vmatprep.subr.bf16.mxu0 %v2165_v16  ;;  %v2171_v16 = vld [vmem:[%s2656_s1 + $0x20] sm:$0xff]   ;;  %s170_s13 = scalar_lea.vmem %s2658_s3, %s2148_s9 }
  0x13   : > { %v2294_v26 = vrot.slane %v1317_v18, %v2255_v9  ;;  %v341_v28 = vcombine.high %v1994_v24, %v1994_v24  ;;  %v348_v29 = vrot.slane %v1994_v24, %v2255_v9  ;;  %v364_v33 = vcombine.high %v1995_v27, %v1995_v27  ;;  %v2307_v34 = vld.sshfl [vmem:[%s2253_s25 + $0x19] sm:$0x13 pattern:$0x75316420]  ;;  %2129 = vmatpush3.bf16.msra.mxu1 %v2168_v55 }
  0x14   : > { %v2279_v20 = vcombine.high %v2262_v12, %v2262_v12  ;;  %v1332_v25 = vcombine.high %v2272_v17, %v2272_v17  ;;  %v406_v31 = vcombine.low %v2262_v12, %v2282_v21  ;;  %v2304_v32 = vcombine.high %v2288_v23, %v2288_v23  ;;  %v2010_v39 = vld.sshfl [vmem:[%s2253_s25 + $0x5] sm:$0x13 pattern:$0x75316420]  ;;  %2130 = vmatprep.subr.bf16.mxu1 %v2170_v5 }
  0x15   : > { %v1336_v36 = vcombine.low %v2272_v17, %v2294_v26  ;;  %v355_v37 = vrot.slane %v341_v28, %v2255_v9  ;;  %v356_v38 = vcombine.high %v348_v29, %v348_v29  ;;  %v2324_v44 = vrot.slane %v1995_v27, %v2255_v9  ;;  %v2011_v46 = vld.sshfl [vmem:[%s2253_s25 + $0xd] sm:$0x13 pattern:$0x75316420]  ;;  %2109 = vmatpush3.bf16.msra.mxu0 %v2167_v41  ;;  %v2173_v27 = vld [vmem:[%s2656_s1 + $0x58] sm:$0xff]  }
  0x16   : > { %v458_v30 = vrot.slane %v2279_v20, %v2255_v9  ;;  %v1388_v35 = vrot.slane %v1332_v25, %v2255_v9  ;;  %v770_v43 = vrot.slane %v2304_v32, %v2255_v9  ;;  %v2327_v45 = vrot.slane %v364_v33, %v2255_v9  ;;  %2110 = vmatprep.subr.bf16.mxu0 %v2169_v0  ;;  %v2172_v25 = vld [vmem:[%s2656_s1 + $0xa8] sm:$0xff]   ;;  %v2417_v55 = vld.sshfl [vmem:[%s2253_s25 + $0x14] sm:$0x13 pattern:$0x75316420] }
  0x17   : > { %v403_v48 = vcombine.low %v348_v29, %v355_v37  ;;  %v434_v49 = vrot.slane %v406_v31, %v2255_v9  ;;  %v1008_v50 = vcombine.high %v2307_v34, %v2307_v34  ;;  %v2337_v53 = vcombine.high %v2324_v44, %v2324_v44  ;;  %2131 = vmatpush3.bf16.msra.mxu1 %v2172_v25 }
  0x18   : > { %v465_v42 = vrot.slane %v458_v30, %v2255_v9  ;;  %v1395_v47 = vrot.slane %v1388_v35, %v2255_v9  ;;  %v777_v52 = vrot.slane %v770_v43, %v2255_v9  ;;  %v404_v54 = vcombine.low %v356_v38, %v2324_v44  ;;  %v2174_v38 = vld [vmem:[%s2656_s1 + $0xe0] sm:$0xff]  }
  0x19   : > { %v413_v57 = vrot.slane %v403_v48, %v2255_v9  ;;  %v2346_v58 = vrot.slane %v2307_v34, %v2255_v9  ;;  %v653_v59 = vcombine.high %v2010_v39, %v2010_v39  ;;  %v405_v61 = vcombine.low %v2327_v45, %v2337_v53  ;;  %2111 = vmatpush3.bf16.msra.mxu0 %v2171_v16 }
  0x1a   : > { %v2091_v51 = vpack.c.bf16 %v465_v42, %v465_v42  ;;  %v2103_v56 = vpack.c.bf16 %v1395_v47, %v1395_v47  ;;  %v2095_v60 = vpack.c.bf16 %v777_v52, %v777_v52  ;;  %v420_v62 = vrot.slane %v404_v54, %v2255_v9  ;;  %v2402_v47 = vld.sshfl [vmem:[%s2253_s25 + $0x10] sm:$0x13 pattern:$0x75316420]  ;;  %2112 = vmatprep.subr.bf16.mxu0 %v2173_v27  ;;  %v2181_v27 = vld [vmem:[%s2656_s1 + $0x48] sm:$0xff]  }
  0x1b   : > { %v660_v63 = vrot.slane %v2010_v39, %v2255_v9  ;;  %v1023_v1 = vcombine.high %v2346_v58, %v2346_v58  ;;  %v667_v2 = vrot.slane %v653_v59, %v2255_v9  ;;  %v676_v3 = vcombine.high %v2011_v46, %v2011_v46  ;;  %2132 = vmatprep.subr.bf16.mxu1 %v2174_v38 }
  0x1c   : > { %476 = vrot.lane.b32.xlu0 %v2091_v51, %s2206_s11  ;;  %1406 = vrot.lane.b32.xlu1 %v2103_v56, %s2206_s11  ;;  %v683_v4 = vrot.slane %v2011_v46, %v2255_v9  ;;  %v427_v6 = vrot.slane %v405_v61, %v2255_v9  ;;  %v435_v7 = vcombine.low %v413_v57, %v420_v62  ;;  %v2176_v56 = vld [vmem:[%s2656_s1 + $0xa0] sm:$0xff]   ;;  %v2177_v57 = vld [vmem:[%s2656_s1 + $0x50] sm:$0xff]  }
  0x1d   : > { %v668_v8 = vcombine.high %v660_v63, %v660_v63  ;;  %v2366_v10 = vrot.slane %v699_v22, %v2255_v9  ;;  %v1079_v11 = vrot.slane %v1023_v1, %v2255_v9  ;;  %v690_v13 = vrot.slane %v676_v3, %v2255_v9  ;;  %2133 = vmatpush3.bf16.msra.mxu1 %v2176_v56  ;;  %v1989_v3 = vld.sshfl [vmem:[%s2253_s25] sm:$0x13 pattern:$0x75316420] }
  0x1e   : > { %v691_v14 = vcombine.high %v683_v4, %v683_v4  ;;  %v715_v15 = vcombine.low %v660_v63, %v667_v2  ;;  %v436_v18 = vcombine.low %v427_v6, %v434_v49  ;;  %v443_v19 = vrot.slane %v435_v7, %v2255_v9  ;;  %v1990_v7 = vld.sshfl [vmem:[%s2253_s25 + $0x8] sm:$0x13 pattern:$0x75316420] }
  0x1f   : > { %v716_v22 = vcombine.low %v668_v8, %v683_v4  ;;  %v718_v24 = vcombine.low %v2288_v23, %v2366_v10  ;;  %v1086_v28 = vrot.slane %v1079_v11, %v2255_v9  ;;  %v1022_v31 = vrot.slane %v1008_v50, %v2255_v9 }
  0x20   : > { %788 = vrot.lane.b32.xlu0 %v2095_v60, %s2206_s11  ;;  %v717_v29 = vcombine.low %v690_v13, %v691_v14  ;;  %v725_v30 = vrot.slane %v715_v15, %v2255_v9  ;;  %v450_v33 = vrot.slane %v436_v18, %v2255_v9  ;;  %v1024_v37 = vcombine.low %v2324_v44, %v2327_v45 }
  0x21   : > { %v732_v34 = vrot.slane %v716_v22, %v2255_v9  ;;  %v746_v35 = vrot.slane %v718_v24, %v2255_v9  ;;  %v2099_v39 = vpack.c.bf16 %v1086_v28, %v1086_v28  ;;  %v1025_v41 = vcombine.low %v2337_v53, %v2262_v12 }
  0x22   : > { %v739_v40 = vrot.slane %v717_v29, %v2255_v9  ;;  %v1026_v42 = vcombine.low %v2282_v21, %v2279_v20  ;;  %v451_v43 = vcombine.low %v443_v19, %v450_v33  ;;  %v1027_v44 = vcombine.low %v2346_v58, %v1022_v31  ;;  %v2408_v20 = vld.sshfl [vmem:[%s2253_s25 + $0x1c] sm:$0x13 pattern:$0x75316420]  ;;  %v325_v29 = vld [vmem:[#allocation2 + $0x10] sm:$0x1] }
  0x23   : > { %v747_v46 = vcombine.low %v725_v30, %v732_v34  ;;  %v1034_v45 = vrot.slane %v1024_v37, %v2255_v9  ;;  %v1041_v49 = vrot.slane %v1025_v41, %v2255_v9  ;;  %v1333_v50 = vcombine.low %v683_v4, %v690_v13  ;;  %v2175_v21 = vld [vmem:[%s2656_s1 + $0x18] sm:$0xff]   ;;  %v2179_v13 = vld [vmem:[%s2656_s1 + $0x10] sm:$0xff]  }
  0x24   : > { %1097 = vrot.lane.b32.xlu0 %v2099_v39, %s2206_s11  ;;  %v748_v48 = vcombine.low %v739_v40, %v746_v35  ;;  %v1048_v12 = vrot.slane %v1026_v42, %v2255_v9  ;;  %v2090_v51 = vpack.c.bf16 %v451_v43, %v451_v43  ;;  %v1055_v53 = vrot.slane %v1027_v44, %v2255_v9  ;;  %v2178_v4 = vld [vmem:[%s2656_s1 + $0xd8] sm:$0xff]   ;;  %v2182_v35 = vld [vmem:[%s2656_s1 + $0xd0] sm:$0xff]   ;;  %v2183_v43 = vld [vmem:[%s2656_s1 + $0x8] sm:$0xff]  }
  0x25   : > { %v755_v52 = vrot.slane %v747_v46, %v2255_v9  ;;  %v1334_v54 = vcombine.low %v691_v14, %v2288_v23  ;;  %v1056_v59 = vcombine.low %v1034_v45, %v1041_v49  ;;  %v1335_v60 = vcombine.low %v2366_v10, %v2304_v32  ;;  %2113 = vmatpush3.bf16.msra.mxu0 %v2175_v21  ;;  %v2180_v19 = vld [vmem:[%s2656_s1 + $0x98] sm:$0xff]   ;;  %v637_v40 = vld [vmem:[#allocation2 + $0x14] sm:$0x1] }
  0x26   : > { %v762_v58 = vrot.slane %v748_v48, %v2255_v9  ;;  %v1343_v23 = vrot.slane %v1333_v50, %v2255_v9  ;;  %474 = vrot.lane.b32.xlu1 %v2090_v51, %s2206_s11  ;;  %v1057_v61 = vcombine.low %v1048_v12, %v1055_v53  ;;  %v1364_v63 = vrot.slane %v1336_v36, %v2255_v9  ;;  %v2490_v34 = vld.sshfl [vmem:[%s2253_s25 + $0x18] sm:$0x13 pattern:$0x75316420]  ;;  %v1255_v39 = vld [vmem:[#allocation2 + $0x1c] sm:$0x1] }
  0x27   : > { %v1350_v62 = vrot.slane %v1334_v54, %v2255_v9  ;;  %v1064_v1 = vrot.slane %v1056_v59, %v2255_v9  ;;  %v1357_v32 = vrot.slane %v1335_v60, %v2255_v9  ;;  %v2439_v2 = vrot.slane %v2402_v47, %v2255_v9  ;;  %2114 = vmatprep.subr.bf16.mxu0 %v2177_v57  ;;  %v2002_v49 = vld.sshfl [vmem:[%s2253_s25 + $0x4] sm:$0x13 pattern:$0x75316420]  ;;  %v2184_v12 = vld [vmem:[%s2656_s1 + $0x90] sm:$0xff]   ;;  %v2186_v60 = vld [vmem:[%s2656_s1 + $0xc8] sm:$0xff]  }
  0x28   : > { %v763_v0 = vcombine.low %v755_v52, %v762_v58  ;;  %v1071_v17 = vrot.slane %v1057_v61, %v2255_v9  ;;  %v2454_v5 = vrot.slane %v2408_v20, %v2255_v9  ;;  %v2458_v6 = vrot.slane %v2417_v55, %v2255_v9  ;;  %2134 = vmatprep.subr.bf16.mxu1 %v2178_v4  ;;  %v2003_v53 = vld.sshfl [vmem:[%s2253_s25 + $0xc] sm:$0x13 pattern:$0x75316420]  ;;  %v2185_v54 = vld [vmem:[%s2656_s1 + $0x40] sm:$0xff]  }
  0x29   : > { %v1365_v26 = vcombine.low %v1343_v23, %v1350_v62  ;;  %v1366_v10 = vcombine.low %v1357_v32, %v1364_v63  ;;  %v2463_v11 = vcombine.high %v2439_v2, %v2439_v2  ;;  %v185_v25 = vcombine.high %v1989_v3, %v1989_v3  ;;  %2115 = vmatpush3.bf16.msra.mxu0 %v2179_v13  ;;  %v2187_v63 = vld [vmem:[%s2656_s1] sm:$0xff]   ;;  %v2188_v4 = vld [vmem:[%s2656_s1 + $0x88] sm:$0xff]  }
  0x2a   : > { %v2094_v8 = vpack.c.bf16 %v763_v0, %v763_v0  ;;  %v1072_v14 = vcombine.low %v1064_v1, %v1071_v17  ;;  %v1180_v16 = vcombine.high %v2454_v5, %v2454_v5  ;;  %v2473_v18 = vcombine.high %v2458_v6, %v2458_v6  ;;  %2135 = vmatpush3.bf16.msra.mxu1 %v2180_v19 }
  0x2b   : > { %v1373_v15 = vrot.slane %v1365_v26, %v2255_v9  ;;  %v1380_v22 = vrot.slane %v1366_v10, %v2255_v9  ;;  %v302_v24 = vrot.slane %v2463_v11, %v2255_v9  ;;  %v192_v33 = vrot.slane %v1989_v3, %v2255_v9  ;;  %2116 = vmatprep.subr.bf16.mxu0 %v2181_v27  ;;  %v2192_v10 = vld [vmem:[%s2656_s1 + $0xc0] sm:$0xff]  }
  0x2c   : > { %786 = vrot.lane.b32.xlu1 %v2094_v8, %s2206_s11  ;;  %v2098_v28 = vpack.c.bf16 %v1072_v14, %v1072_v14  ;;  %v1236_v30 = vrot.slane %v1180_v16, %v2255_v9  ;;  %v618_v31 = vrot.slane %v2473_v18, %v2255_v9  ;;  %v199_v41 = vrot.slane %v185_v25, %v2255_v9 }
  0x2d   : > { %v1381_v37 = vcombine.low %v1373_v15, %v1380_v22  ;;  %v309_v38 = vrot.slane %v302_v24, %v2255_v9  ;;  %v208_v42 = vcombine.high %v1990_v7, %v1990_v7  ;;  %v200_v45 = vcombine.high %v192_v33, %v192_v33  ;;  %2136 = vmatprep.subr.bf16.mxu1 %v2182_v35 }
  0x2e   : > { %1095 = vrot.lane.b32.xlu0 %v2098_v28, %s2206_s11  ;;  %v1243_v46 = vrot.slane %v1236_v30, %v2255_v9  ;;  %v625_v44 = vrot.slane %v618_v31, %v2255_v9  ;;  %v2504_v48 = vrot.slane %v1990_v7, %v2255_v9  ;;  %v231_v52 = vcombine.high %v2402_v47, %v2402_v47  ;;  %v2193_v31 = vld [vmem:[%s2656_s1 + $0x80] sm:$0xff]  }
  0x2f   : > { %v2102_v50 = vpack.c.bf16 %v1381_v37, %v1381_v37  ;;  %v2089_v21 = vpack.c.bf16 %v309_v38, %v309_v38  ;;  %v2511_v51 = vrot.slane %v208_v42, %v2255_v9  ;;  %v247_v59 = vcombine.low %v192_v33, %v199_v41  ;;  %2117 = vmatpush3.bf16.msra.mxu0 %v2183_v43 }
  0x30   : > { %v2101_v56 = vpack.c.bf16 %v1243_v46, %v1243_v46  ;;  %v2093_v57 = vpack.c.bf16 %v625_v44, %v625_v44  ;;  %v2521_v58 = vcombine.high %v2504_v48, %v2504_v48  ;;  %v2530_v23 = vrot.slane %v231_v52, %v2255_v9  ;;  %2137 = vmatpush3.bf16.msra.mxu1 %v2184_v12 }
  0x31   : > { %1404 = vrot.lane.b32.xlu1 %v2102_v50, %s2206_s11  ;;  %v326_v47 = vsel %vm2448_vm2, %v2089_v21, %v325_v29  ;;  %v248_v61 = vcombine.low %v200_v45, %v2504_v48  ;;  %v2535_v62 = vrot.slane %v2490_v34, %v2255_v9  ;;  %v257_v3 = vrot.slane %v247_v59, %v2255_v9 }
  0x32   : > { %327 = vst [vmem:[#allocation2 + $0x10] sm:$0x1] %v326_v47  ;;  %v1256_v0 = vsel %vm2448_vm2, %v2101_v56, %v1255_v39  ;;  %v638_v1 = vsel %vm2448_vm2, %v2093_v57, %v637_v40  ;;  %v249_v32 = vcombine.low %v2511_v51, %v2521_v58  ;;  %v250_v17 = vcombine.low %v2439_v2, %v2530_v23  ;;  %v946_v39 = vld [vmem:[#allocation2 + $0x18] sm:$0x1] }
  0x33   : > { %1257 = vst [vmem:[#allocation2 + $0x1c] sm:$0x1] %v1256_v0  ;;  %639 = vst [vmem:[#allocation2 + $0x14] sm:$0x1] %v638_v1  ;;  %v264_v26 = vrot.slane %v248_v61, %v2255_v9  ;;  %v871_v7 = vcombine.high %v2535_v62, %v2535_v62  ;;  %v501_v8 = vcombine.high %v2002_v49, %v2002_v49  ;;  %2118 = vmatprep.subr.bf16.mxu0 %v2185_v54 }
  0x34   : > { %v271_v13 = vrot.slane %v249_v32, %v2255_v9  ;;  %v508_v14 = vrot.slane %v2002_v49, %v2255_v9  ;;  %v524_v15 = vcombine.high %v2003_v53, %v2003_v53  ;;  %v531_v16 = vrot.slane %v2003_v53, %v2255_v9  ;;  %2138 = vmatprep.subr.bf16.mxu1 %v2186_v60 }
  0x35   : > { %v278_v19 = vrot.slane %v250_v17, %v2255_v9  ;;  %v279_v22 = vcombine.low %v257_v3, %v264_v26  ;;  %v927_v24 = vrot.slane %v871_v7, %v2255_v9  ;;  %v515_v25 = vrot.slane %v501_v8, %v2255_v9  ;;  %2119 = vmatpush3.bf16.msra.mxu0 %v2187_v63 }
  0x36   : > { %v516_v27 = vcombine.high %v508_v14, %v508_v14  ;;  %v538_v28 = vrot.slane %v524_v15, %v2255_v9  ;;  %v539_v29 = vcombine.high %v531_v16, %v531_v16  ;;  %v547_v30 = vcombine.high %v2417_v55, %v2417_v55  ;;  %2139 = vmatpush3.bf16.msra.mxu1 %v2188_v4 }
  0x37   : > { %v280_v33 = vcombine.low %v271_v13, %v278_v19  ;;  %v287_v35 = vrot.slane %v279_v22, %v2255_v9  ;;  %v934_v37 = vrot.slane %v927_v24, %v2255_v9  ;;  %v563_v38 = vcombine.low %v508_v14, %v515_v25  ;;  %2140 = vmatprep.subr.bf16.mxu1 %v2192_v10 }
  0x38   : > { %v561_v40 = vrot.slane %v547_v30, %v2255_v9  ;;  %v564_v41 = vcombine.low %v516_v27, %v531_v16  ;;  %v565_v42 = vcombine.low %v538_v28, %v539_v29  ;;  %v856_v55 = vcombine.high %v2490_v34, %v2490_v34 }
  0x39   : > { %v294_v43 = vrot.slane %v280_v33, %v2255_v9  ;;  %v2097_v46 = vpack.c.bf16 %v934_v37, %v934_v37  ;;  %v573_v44 = vrot.slane %v563_v38, %v2255_v9  ;;  %v872_v45 = vcombine.low %v2504_v48, %v2511_v51  ;;  %v484_v25 = vld [vmem:[#allocation2 + $0x10] sm:$0x1] }
  0x3a   : > { %v566_v49 = vcombine.low %v2458_v6, %v561_v40  ;;  %v580_v12 = vrot.slane %v564_v41, %v2255_v9  ;;  %v587_v50 = vrot.slane %v565_v42, %v2255_v9  ;;  %v870_v21 = vrot.slane %v856_v55, %v2255_v9  ;;  %2141 = vmatpush3.bf16.msra.mxu1 %v2193_v31  ;;  %v1411_v27 = vld [vmem:[#allocation2 + $0x1c] sm:$0x1]  ;;  %v793_v33 = vld [vmem:[#allocation2 + $0x14] sm:$0x1] }
  0x3b   : > { %v295_v52 = vcombine.low %v287_v35, %v294_v43  ;;  %v947_v34 = vsel %vm2448_vm2, %v2097_v46, %v946_v39  ;;  %v873_v53 = vcombine.low %v2521_v58, %v2439_v2  ;;  %v874_v54 = vcombine.low %v2530_v23, %v2463_v11 }
  0x3c   : > { %948 = vst [vmem:[#allocation2 + $0x18] sm:$0x1] %v947_v34  ;;  %v594_v48 = vrot.slane %v566_v49, %v2255_v9  ;;  %v595_v51 = vcombine.low %v573_v44, %v580_v12  ;;  %v875_v56 = vcombine.low %v2535_v62, %v870_v21  ;;  %v882_v57 = vrot.slane %v872_v45, %v2255_v9  ;;  %v2047_v34 = vld [vmem:[%s2657_s2] ss:$0 sm:$0xff] }
  0x3d   : > { %v2088_v59 = vpack.c.bf16 %v295_v52, %v295_v52  ;;  %v889_v60 = vrot.slane %v873_v53, %v2255_v9  ;;  %v896_v36 = vrot.slane %v874_v54, %v2255_v9  ;;  %v1165_v47 = vcombine.high %v2408_v20, %v2408_v20 }
  0x3e   : > { %v596_v2 = vcombine.low %v587_v50, %v594_v48  ;;  %v603_v58 = vrot.slane %v595_v51, %v2255_v9  ;;  %v903_v11 = vrot.slane %v875_v56, %v2255_v9  ;;  %v1181_v23 = vcombine.low %v531_v16, %v538_v28 }
  0x3f   : > { %321 = vst.msk [vmem:[#allocation2] sm:$0xf] %vm320_vm3, %v2088_v59  ;;  %v904_v61 = vcombine.low %v882_v57, %v889_v60  ;;  %v1179_v62 = vrot.slane %v1165_v47, %v2255_v9  ;;  %v1182_v63 = vcombine.low %v539_v29, %v2458_v6  ;;  %v1183_v0 = vcombine.low %v561_v40, %v2473_v18 }
  0x40   : > { %v610_v1 = vrot.slane %v596_v2, %v2255_v9  ;;  %v905_v32 = vcombine.low %v896_v36, %v903_v11  ;;  %v1191_v20 = vrot.slane %v1181_v23, %v2255_v9 }
  0x41   : > { %v912_v3 = vrot.slane %v904_v61, %v2255_v9  ;;  %v1184_v4 = vcombine.low %v2454_v5, %v1179_v62  ;;  %v1198_v17 = vrot.slane %v1182_v63, %v2255_v9  ;;  %v1205_v26 = vrot.slane %v1183_v0, %v2255_v9 }
  0x42   : > { %v611_v7 = vcombine.low %v603_v58, %v610_v1  ;;  %v919_v8 = vrot.slane %v905_v32, %v2255_v9 }
  0x43   : > { %v1212_v6 = vrot.slane %v1184_v4, %v2255_v9  ;;  %v1213_v10 = vcombine.low %v1191_v20, %v1198_v17  ;;  %v1102_v38 = vld [vmem:[#allocation2 + $0x18] sm:$0x1] }
  0x44   : > { %v2092_v18 = vpack.c.bf16 %v611_v7, %v611_v7  ;;  %v920_v13 = vcombine.low %v912_v3, %v919_v8 }
  0x45   : > { %v1214_v14 = vcombine.low %v1205_v26, %v1212_v6  ;;  %v1221_v15 = vrot.slane %v1213_v10, %v2255_v9 }
  0x46   : > { %636 = vst.msk [vmem:[#allocation2 + $0x4] sm:$0xf] %vm320_vm3, %v2092_v18  ;;  %v2096_v16 = vpack.c.bf16 %v920_v13, %v920_v13 }
  0x47   : > { %v1228_v5 = vrot.slane %v1214_v14, %v2255_v9 }
  0x48   : > { %945 = vst.msk [vmem:[#allocation2 + $0x8] sm:$0xf] %vm320_vm3, %v2096_v16 }
  0x49   : > { %v1229_v19 = vcombine.low %v1221_v15, %v1228_v5 }
  0x4b   : > { %v2100_v22 = vpack.c.bf16 %v1229_v19, %v1229_v19 }
  0x4d   : > { %1254 = vst.msk [vmem:[#allocation2 + $0xc] sm:$0xf] %vm320_vm3, %v2100_v22 }
  0x8e   : > { %v477_v28 = vpop.permute.xlu0 %476  ;;  %v1407_v30 = vpop.permute.xlu1 %1406 }
  0x8f   : > { %v485_v29 = vsel %vm2616_vm5, %v477_v28, %v484_v25  ;;  %v1412_v31 = vsel %vm2616_vm5, %v1407_v30, %v1411_v27 }
  0x90   : > { %486 = vst [vmem:[#allocation2 + $0x10] sm:$0x1] %v485_v29  ;;  %1413 = vst [vmem:[#allocation2 + $0x1c] sm:$0x1] %v1412_v31 }
  0x92   : > { %v789_v35 = vpop.permute.xlu0 %788 }
  0x93   : > { %v794_v37 = vsel %vm2616_vm5, %v789_v35, %v793_v33 }
  0x94   : > { %795 = vst [vmem:[#allocation2 + $0x14] sm:$0x1] %v794_v37 }
  0x96   : > { %v1098_v39 = vpop.permute.xlu0 %1097 }
  0x97   : > { %v1103_v40 = vsel %vm2616_vm5, %v1098_v39, %v1102_v38 }
  0x98   : > { %1104 = vst [vmem:[#allocation2 + $0x18] sm:$0x1] %v1103_v40  ;;  %v475_v41 = vpop.permute.xlu1 %474 }
  0x99   : > { %481 = vst.msk [vmem:[#allocation2] sm:$0xf] %vm480_vm6, %v475_v41 }
  0x9e   : > { %v787_v42 = vpop.permute.xlu1 %786 }
  0x9f   : > { %792 = vst.msk [vmem:[#allocation2 + $0x4] sm:$0xf] %vm480_vm6, %v787_v42 }
  0xa0   : > { %v1096_v55 = vpop.permute.xlu0 %1095  ;;  %v2189_v46 = vld [vmem:[#allocation2] ss:$16 sps:$4 sm:$0x1f]  }
  0xa1   : > { %1101 = vst.msk [vmem:[#allocation2 + $0x8] sm:$0xf] %vm480_vm6, %v1096_v55 }
  0xa3   : > { %v1405_v43 = vpop.permute.xlu1 %1404 }
  0xa4   : > { %1410 = vst.msk [vmem:[#allocation2 + $0xc] sm:$0xf] %vm480_vm6, %v1405_v43 }
  0xa6   : > { %v2191_v44 = vld [vmem:[#allocation2 + $0x4] ss:$16 sps:$4 sm:$0x1f]  }
  0xa7   : > { %1733 = vmatprep.mubr.bf16.mxu0 %v2191_v44 }
  0xa8   : > { %1734 = vmatmul.mubr.bf16.vlgmr.msra.gmra.mxu0 %v2189_v46  ;;  %v2194_v45 = vld [vmem:[#allocation2 + $0x8] ss:$16 sps:$4 sm:$0x1f]  }
  0xab   : > { %v2196_v49 = vld [vmem:[#allocation2 + $0xc] ss:$16 sps:$4 sm:$0x1f]  }
  0xac   : > { %1774 = vmatprep.mubr.bf16.mxu1 %v2196_v49 }
  0xad   : > { %1775 = vmatmul.mubr.bf16.vlgmr.msra.gmra.mxu1 %v2194_v45 }
 0x168   : > { %v2120_v12 = vpop.f32.mrf.mxu0 }
 0x16a   : > { %v2121_v50 = vpop.f32.mrf.mxu0 }
 0x16b   : > { %v2122_v52 = vadd.f32 %v2121_v50, %v2120_v12 }
 0x16c   : > { %v2123_v21 = vpop.f32.mrf.mxu0 }
 0x16d   : > { %v2142_v53 = vpop.f32.mrf.mxu1  ;;  %v1736_v51 = vadd.f32 %v2122_v52, %v2047_v34 }
 0x16e   : > { %v2124_v54 = vpop.f32.mrf.mxu0 }
 0x16f   : > { %v2143_v48 = vpop.f32.mrf.mxu1  ;;  %v2125_v56 = vadd.f32 %v2124_v54, %v2123_v21 }
 0x170   : > { %v2144_v57 = vadd.f32 %v2143_v48, %v2142_v53 }
 0x171   : > { %v2145_v59 = vpop.f32.mrf.mxu1  ;;  %v1739_v47 = vadd.f32 %v2125_v56, %v2047_v34 }
 0x172   : > { %v1777_v60 = vadd.f32 %v2144_v57, %v1736_v51 }
 0x173   : > { %v2146_v36 = vpop.f32.mrf.mxu1 }
 0x174   : > { %v1783_v2 = vmax.f32 %v1777_v60, 0.0  ;;  %v2147_v58 = vadd.f32 %v2146_v36, %v2145_v59 }
 0x176   : > { %v1787_v11 = vcombine.high %v1783_v2, %v1783_v2  ;;  %v1794_v23 = vrot.slane %v1783_v2, %v2255_v9  ;;  %v1780_v61 = vadd.f32 %v2147_v58, %v1739_v47 }
 0x178   : > { %v1801_v62 = vrot.slane %v1787_v11, %v2255_v9  ;;  %v1802_v63 = vcombine.high %v1794_v23, %v1794_v23  ;;  %v1810_v0 = vrot.slane %v1794_v23, %v2255_v9  ;;  %v1784_v1 = vmax.f32 %v1780_v61, 0.0 }
 0x17a   : > { %v1803_v32 = vcombine.high %v1801_v62, %v1801_v62  ;;  %v1824_v20 = vrot.slane %v1802_v63, %v2255_v9  ;;  %v1832_v3 = vcombine.high %v1810_v0, %v1810_v0  ;;  %v1842_v4 = vrot.slane %v1784_v1, %v2255_v9 }
 0x17b   : > { %v1817_v17 = vrot.slane %v1801_v62, %v2255_v9 }
 0x17c   : > { %v1831_v26 = vrot.slane %v1803_v32, %v2255_v9  ;;  %v1834_v7 = vcombine.high %v1824_v20, %v1824_v20  ;;  %v1850_v8 = vcombine.low %v1810_v0, %v1824_v20  ;;  %v1849_v6 = vrot.slane %v1842_v4, %v2255_v9 }
 0x17d   : > { %v1864_v18 = vrot.slane %v1832_v3, %v2255_v9 }
 0x17e   : > { %v1857_v10 = vrot.slane %v1850_v8, %v2255_v9  ;;  %v1873_v13 = vcombine.low %v1834_v7, %v1817_v17  ;;  %v2084_v14 = vcombine.high %v1817_v17, %v1831_v26  ;;  %v1887_v15 = vrot.slane %v1831_v26, %v2255_v9 }
 0x17f   : > { %v1910_v22 = vrot.slane %v1849_v6, %v2255_v9 }
 0x180   : > { %v1865_v16 = vcombine.low %v1857_v10, %v1864_v18  ;;  %v1880_v5 = vrot.slane %v1873_v13, %v2255_v9  ;;  %v1903_v19 = vrot.slane %v2084_v14, %v2255_v9 }
 0x182   : > { %v1872_v24 = vrot.slane %v1865_v16, %v2255_v9  ;;  %v1888_v25 = vcombine.low %v1880_v5, %v1887_v15  ;;  %v1911_v27 = vcombine.low %v1903_v19, %v1910_v22 }
 0x184   : > { %v1895_v28 = vrot.slane %v1888_v25, %v2255_v9  ;;  %1923 = vst.msk [vmem:[%s170_s13] sm:$0x7] %vm1922_vm7, %v1872_v24  ;;  %v1918_v29 = vrot.slane %v1911_v27, %v2255_v9 }
 0x186   : > { %1924 = vst.msk [vmem:[%s170_s13 + $0x4] sm:$0x7] %vm1922_vm7, %v1895_v28  ;;  %1925 = vst.msk [vmem:[%s170_s13 + $0x8] sm:$0x7] %vm1922_vm7, %v1918_v29 }
 0x187 PF: > { %s13_s12 = sadd.s32 1, %s2203_s12  }
 0x188   : > { %p10_p4 = scmp.ge.s32.totalorder %s13_s12, 4  }
 0x18a   :  { %12 = sbr.rel (!%p10_p4) target bundleno = 1 (0x1), region = 65 }

// kernel: _lambda_.6
= control target key start
LH: loop header
LB: loop body
LE: loop exit
PB: predicated region body
PF: predicated region fallthrough
CT: control target
= control target key end

     0   :  { %s996_s12 = smov 0   ;;  %s1184_s0 = inlined_call_operand.vmem [shape: f32[2,3,1,3,64], index: 0, kind: input, shape index: {}]   ;;  %s1185_s1 = inlined_call_operand.vmem [shape: bf16[576,64], index: 1, kind: input, shape index: {}]   ;;  %s1186_s2 = inlined_call_operand.vmem [shape: f32[1,64], index: 2, kind: input, shape index: {}]   ;;  %s1187_s3 = inlined_call_operand.vmem [shape: bf16[2,1,1,64], index: 3, kind: output, shape index: {}]  }
   0x1 LB: > { %s802_s13 = sadd.s32 4294967295, %s970_s12   ;;  %p806_p0 = scmp.ge.s32.totalorder %s970_s12, 1  ;;  %s970_s12 = sphi %s996_s12, %s13_s12  }
   0x2   : > { %p137_p1 = scmp.lt.s32.totalorder %s970_s12, 3 }
   0x4   : > { %p138_p2 = pnand %p806_p0, %p137_p1 }
   0x5   : > { %p159_p3 = scmp.lt.s32.totalorder (!%p138_p2), %s802_s13, 1  ;;  %s973_s17 = smov (!%p138_p2), 64  }
   0x6   : > { %141 = sbr.rel (%p138_p2) target bundleno = 374 (0x176), region = 32 }
   0xb   : > { %v182_v0 = vlaneseq  ;;  %v972_v1 = vmov 1966171168   ;;  %v927_v3 = vld [vmem:[%s1185_s1 + $0x78] sm:$0xff]   ;;  %s1193_s13 = smov (!%p159_p3, %s802_s13), 1  ;;  %v930_v8 = vld [vmem:[%s1185_s1 + $0x70] sm:$0xff]   ;;  %v934_v21 = vld [vmem:[%s1185_s1 + $0x68] sm:$0xff]  }
   0xc   : > { %v180_v2 = vunpack.c.l.s4 %v972_v1  ;;  %v928_v5 = vld [vmem:[%s1185_s1 + $0x38] sm:$0xff]   ;;  %853 = vmatprep.subr.bf16.mxu0 %v927_v3  ;;  %s914_s20 = smul.u32 12, %s1193_s13  ;;  %v932_v11 = vld [vmem:[%s1185_s1 + $0x30] sm:$0xff]   ;;  %v936_v27 = vld [vmem:[%s1185_s1 + $0x28] sm:$0xff]   ;;  %vm170_vm0 = vcmask 516096   ;;  %vm196_vm3 = vcmask 1040896  }
   0xd   : > { %v183_v4 = vshrl.u32 %v182_v0, 7  ;;  %v929_v6 = vld [vmem:[%s1185_s1 + $0xf8] sm:$0xff]   ;;  %854 = vmatpush3.bf16.msra.mxu0 %v928_v5  ;;  %v933_v19 = vld [vmem:[%s1185_s1 + $0xf0] sm:$0xff]   ;;  %v937_v30 = vld [vmem:[%s1185_s1 + $0xe8] sm:$0xff]   ;;  %vm171_vm1 = vsmask.f32 256 }
   0xe   : > { %v181_v7 = vunpack.c.0.s8 %v180_v2  ;;  %875 = vmatprep.subr.bf16.mxu1 %v929_v6  ;;  %v931_v9 = vld [vmem:[%s1185_s1 + $0xb8] sm:$0xff]   ;;  %s1025_s27 = scalar_lea.vmem %s1184_s0, %s914_s20  ;;  %855 = vmatprep.subr.bf16.mxu0 %v930_v8  ;;  %v935_v25 = vld [vmem:[%s1185_s1 + $0xb0] sm:$0xff]   ;;  %v938_v31 = vld [vmem:[%s1185_s1 + $0x60] sm:$0xff]   ;;  %vm975_vm5 = vmmov 0   ;;  %vm626_vm6 = vcmask 523264   ;;  %s166_s20 = scalar_lea.vmem %s1187_s3, %s1193_s13 }
   0xf   : > { %v810_v12 = vld [vmem:[%s1025_s27 + $0x6] sm:$0x1]  ;;  %v176_v13 = vld [vmem:[%s1025_s27 + $0x1] sm:$0x1]  ;;  %v812_v14 = vld [vmem:[%s1025_s27 + $0x9] sm:$0x1]  ;;  %876 = vmatpush3.bf16.msra.mxu1 %v931_v9 }
  0x10   : > { %v1027_v10 = vsub.s32 %v181_v7, %v183_v4  ;;  %v236_v15 = vpack.c.bf16 %v810_v12, %v810_v12  ;;  %v177_v16 = vpack.c.bf16 %v176_v13, %v176_v13  ;;  %v265_v17 = vpack.c.bf16 %v812_v14, %v812_v14  ;;  %v808_v18 = vld [vmem:[%s1025_s27 + $0x4] sm:$0x1]  ;;  %877 = vmatprep.subr.bf16.mxu1 %v933_v19  ;;  %v939_v34 = vld [vmem:[%s1185_s1 + $0xa8] sm:$0xff]   ;;  %vm1066_vm2 = vmand %vm170_vm0, %vm171_vm1 }
  0x11   : > { %856 = vmatpush3.bf16.msra.mxu0 %v932_v11  ;;  %v208_v20 = vpack.c.bf16 %v808_v18, %v808_v18  ;;  %v232_v36 = vld [vmem:[#allocation2 + $0x2] sm:$0x1]  ;;  %v813_v37 = vld [vmem:[%s1025_s27 + $0xa] sm:$0x1]  ;;  %v289_v38 = vld [vmem:[#allocation2 + $0x4] sm:$0x1] }
  0x12   : > { %v244_v22 = vrot.slane %v236_v15, %v1027_v10  ;;  %v185_v23 = vrot.slane %v177_v16, %v1027_v10  ;;  %v273_v24 = vrot.slane %v265_v17, %v1027_v10  ;;  %857 = vmatprep.subr.bf16.mxu0 %v934_v21  ;;  %v288_v39 = vpack.c.bf16 %v813_v37, %v813_v37  ;;  %v809_v40 = vld [vmem:[%s1025_s27 + $0x5] sm:$0x1]  ;;  %v173_v41 = vld [vmem:[#allocation2] sm:$0x1]  ;;  %v261_v50 = vld [vmem:[#allocation2 + $0x3] sm:$0x1] }
  0x13   : > { %v216_v26 = vrot.slane %v208_v20, %v1027_v10  ;;  %878 = vmatpush3.bf16.msra.mxu1 %v935_v25  ;;  %v168_v42 = vld [vmem:[%s1025_s27] sm:$0x1]  ;;  %v231_v43 = vpack.c.bf16 %v809_v40, %v809_v40  ;;  %v942_v51 = vld [vmem:[%s1185_s1 + $0x58] sm:$0xff]   ;;  %v811_v53 = vld [vmem:[%s1025_s27 + $0x8] sm:$0x1]  ;;  %v974_v12 = vmov 0.0  }
  0x14   : > { %v251_v28 = vrot.slane %v244_v22, %v1027_v10  ;;  %v192_v29 = vrot.slane %v185_v23, %v1027_v10  ;;  %v280_v32 = vrot.slane %v273_v24, %v1027_v10  ;;  %879 = vmatprep.subr.bf16.mxu1 %v937_v30  ;;  %v169_v44 = vpack.c.bf16 %v168_v42, %v168_v42  ;;  %v940_v46 = vld [vmem:[%s1185_s1 + $0x20] sm:$0xff]   ;;  %v944_v58 = vld [vmem:[%s1185_s1 + $0x18] sm:$0xff]   ;;  %v946_v62 = vld [vmem:[%s1185_s1 + $0x50] sm:$0xff]  }
  0x15   : > { %858 = vmatpush3.bf16.msra.mxu0 %v936_v27  ;;  %v223_v33 = vrot.slane %v216_v26, %v1027_v10  ;;  %v290_v45 = vsel %vm1066_vm2, %v288_v39, %v289_v38  ;;  %v233_v47 = vsel %vm1066_vm2, %v231_v43, %v232_v36  ;;  %v941_v49 = vld [vmem:[%s1185_s1 + $0xe0] sm:$0xff]   ;;  %v260_v55 = vpack.c.bf16 %v811_v53, %v811_v53  ;;  %v945_v61 = vld [vmem:[%s1185_s1 + $0xd8] sm:$0xff]   ;;  %v948_v0 = vld [vmem:[%s1185_s1 + $0x10] sm:$0xff]  }
  0x16   : > { %252 = vrot.lane.b32.xlu1 %v251_v28, %s973_s17  ;;  %193 = vrot.lane.b32.xlu0 %v192_v29, %s973_s17  ;;  %291 = vst [vmem:[#allocation2 + $0x4] sm:$0x1] %v290_v45  ;;  %v174_v48 = vsel %vm1066_vm2, %v169_v44, %v173_v41  ;;  %234 = vst [vmem:[#allocation2 + $0x2] sm:$0x1] %v233_v47  ;;  %v943_v52 = vld [vmem:[%s1185_s1 + $0xa0] sm:$0xff]   ;;  %v947_v63 = vld [vmem:[%s1185_s1 + $0x98] sm:$0xff]  }
  0x17   : > { %859 = vmatprep.subr.bf16.mxu0 %v938_v31  ;;  %880 = vmatpush3.bf16.msra.mxu1 %v939_v34  ;;  %175 = vst [vmem:[#allocation2] sm:$0x1] %v174_v48  ;;  %v201_v54 = vld [vmem:[%s1025_s27 + $0x2] sm:$0x1]  ;;  %v203_v57 = vld [vmem:[#allocation2 + $0x1] sm:$0x1]  ;;  %v262_v59 = vsel %vm1066_vm2, %v260_v55, %v261_v50  ;;  %vm1143_vm4 = vmand %vm196_vm3, %vm171_vm1 }
  0x18   : > { %881 = vmatprep.subr.bf16.mxu1 %v941_v49  ;;  %v202_v56 = vpack.c.bf16 %v201_v54, %v201_v54  ;;  %263 = vst [vmem:[#allocation2 + $0x3] sm:$0x1] %v262_v59  ;;  %v949_v1 = vld [vmem:[%s1185_s1 + $0xd0] sm:$0xff]   ;;  %v950_v2 = vld [vmem:[%s1185_s1 + $0x48] sm:$0xff]   ;;  %v954_v6 = vld [vmem:[%s1185_s1 + $0x40] sm:$0xff]  }
  0x19   : > { %860 = vmatpush3.bf16.msra.mxu0 %v940_v46  ;;  %v951_v3 = vld [vmem:[%s1185_s1 + $0x90] sm:$0xff]   ;;  %v952_v4 = vld [vmem:[%s1185_s1 + $0x8] sm:$0xff]   ;;  %v956_v8 = vld [vmem:[%s1185_s1] sm:$0xff]  }
  0x1a   : > { %281 = vrot.lane.b32.xlu1 %v280_v32, %s973_s17  ;;  %224 = vrot.lane.b32.xlu0 %v223_v33, %s973_s17  ;;  %v204_v60 = vsel %vm1066_vm2, %v202_v56, %v203_v57  ;;  %v953_v5 = vld [vmem:[%s1185_s1 + $0xc8] sm:$0xff]   ;;  %v957_v9 = vld [vmem:[%s1185_s1 + $0xc0] sm:$0xff]  }
  0x1b   : > { %861 = vmatprep.subr.bf16.mxu0 %v942_v51  ;;  %882 = vmatpush3.bf16.msra.mxu1 %v943_v52  ;;  %205 = vst [vmem:[#allocation2 + $0x1] sm:$0x1] %v204_v60  ;;  %v955_v7 = vld [vmem:[%s1185_s1 + $0x88] sm:$0xff]   ;;  %v959_v11 = vld [vmem:[%s1185_s1 + $0x80] sm:$0xff]   ;;  %v960_v31 = vld [vmem:[%s1185_s1 + $0x118] sm:$0xff]  }
  0x1c   : > { %883 = vmatprep.subr.bf16.mxu1 %v945_v61  ;;  %v961_v34 = vld [vmem:[%s1185_s1 + $0x110] sm:$0xff]   ;;  %v962_v36 = vld [vmem:[%s1185_s1 + $0x108] sm:$0xff]   ;;  %v963_v38 = vld [vmem:[%s1185_s1 + $0x100] sm:$0xff]  }
  0x1d   : > { %862 = vmatpush3.bf16.msra.mxu0 %v944_v58  ;;  %v255_v14 = vld [vmem:[#allocation2 + $0x2] sm:$0x1]  ;;  %v365_v49 = vld [vmem:[%s1186_s2] sm:$0x1] }
  0x1e   : > { %863 = vmatprep.subr.bf16.mxu0 %v946_v62  ;;  %v198_v15 = vld [vmem:[#allocation2] sm:$0x1] }
  0x1f   : > { %884 = vmatpush3.bf16.msra.mxu1 %v947_v63  ;;  %v284_v20 = vld [vmem:[#allocation2 + $0x3] sm:$0x1]  ;;  %v752_v57 = vld [vmem:[%s166_s20] sm:$0x1] }
  0x20   : > { %885 = vmatprep.subr.bf16.mxu1 %v949_v1 }
  0x21   : > { %864 = vmatpush3.bf16.msra.mxu0 %v948_v0 }
  0x22   : > { %865 = vmatprep.subr.bf16.mxu0 %v950_v2  ;;  %v227_v21 = vld [vmem:[#allocation2 + $0x1] sm:$0x1] }
  0x23   : > { %886 = vmatpush3.bf16.msra.mxu1 %v951_v3 }
  0x24   : > { %887 = vmatprep.subr.bf16.mxu1 %v953_v5 }
  0x25   : > { %866 = vmatpush3.bf16.msra.mxu0 %v952_v4 }
  0x26   : > { %867 = vmatprep.subr.bf16.mxu0 %v954_v6 }
  0x27   : > { %888 = vmatpush3.bf16.msra.mxu1 %v955_v7 }
  0x28   : > { %889 = vmatprep.subr.bf16.mxu1 %v957_v9 }
  0x29   : > { %868 = vmatpush3.bf16.msra.mxu0 %v956_v8 }
  0x2a   : > { %902 = vmatprep.subr.bf16.mxu0 %v974_v12 }
  0x2b   : > { %890 = vmatpush3.bf16.msra.mxu1 %v959_v11 }
  0x88   : > { %v253_v16 = vpop.permute.xlu1 %252  ;;  %v194_v17 = vpop.permute.xlu0 %193 }
  0x89   : > { %v256_v18 = vsel %vm1143_vm4, %v253_v16, %v255_v14  ;;  %v199_v19 = vsel %vm1143_vm4, %v194_v17, %v198_v15 }
  0x8a   : > { %257 = vst [vmem:[#allocation2 + $0x2] sm:$0x1] %v256_v18  ;;  %200 = vst [vmem:[#allocation2] sm:$0x1] %v199_v19 }
  0x8c   : > { %v282_v22 = vpop.permute.xlu1 %281  ;;  %v225_v23 = vpop.permute.xlu0 %224 }
  0x8d   : > { %v285_v24 = vsel %vm1143_vm4, %v282_v22, %v284_v20  ;;  %v228_v25 = vsel %vm1143_vm4, %v225_v23, %v227_v21 }
  0x8e   : > { %286 = vst [vmem:[#allocation2 + $0x3] sm:$0x1] %v285_v24  ;;  %229 = vst [vmem:[#allocation2 + $0x1] sm:$0x1] %v228_v25 }
  0x95   : > { %v292_v26 = vld [vmem:[#allocation2] sm:$0x1f] }
  0x96   : > { %v374_v27 = vrot.slane %v292_v26, %v1027_v10  ;;  %v367_v37 = vcombine.high %v292_v26, %v292_v26 }
  0x98   : > { %v382_v28 = vcombine.high %v374_v27, %v374_v27  ;;  %v389_v29 = vrot.slane %v374_v27, %v1027_v10  ;;  %v381_v39 = vrot.slane %v367_v37, %v1027_v10 }
  0x9a   : > { %v403_v30 = vrot.slane %v382_v28, %v1027_v10  ;;  %v404_v33 = vcombine.high %v389_v29, %v389_v29  ;;  %v396_v40 = vrot.slane %v381_v39, %v1027_v10 }
  0x9c   : > { %662 = vmatprep.mubr.bf16.mxu0 %v403_v30  ;;  %v405_v32 = vcombine.high %v403_v30, %v403_v30 }
  0x9d   : > { %663 = vmatmul.mubr.bf16.vlgmr.msra.gmra.mxu0 %v389_v29 }
  0x9e   : > { %903 = vmatpush3.bf16.msra.mxu0 %v960_v31  ;;  %702 = vmatprep.mubr.bf16.mxu1 %v405_v32 }
  0x9f   : > { %703 = vmatmul.mubr.bf16.vlgmr.msra.gmra.mxu1 %v404_v33  ;;  %904 = vmatprep.subr.bf16.mxu0 %v974_v12 }
  0xa0   : > { %910 = vmatprep.mubr.msk.bf16.mxu0 %vm975_vm5, %v974_v12 }
  0xa2   : > { %905 = vmatpush3.bf16.msra.mxu0 %v961_v34 }
  0xa3   : > { %906 = vmatprep.subr.bf16.mxu0 %v974_v12 }
  0xa6   : > { %907 = vmatpush3.bf16.msra.mxu0 %v962_v36 }
  0xa7   : > { %908 = vmatprep.subr.bf16.mxu0 %v974_v12 }
  0xaa   : > { %909 = vmatpush3.bf16.msra.mxu0 %v963_v38 }
  0xad   : > { %911 = vmatmul.mubr.msk.bf16.vlgmr.msra.gmra.mxu0 %vm626_vm6, %v396_v40 }
 0x15d   : > { %v869_v41 = vpop.f32.mrf.mxu0 }
 0x15f   : > { %v870_v42 = vpop.f32.mrf.mxu0  ;;  %v891_v43 = vpop.f32.mrf.mxu1 }
 0x160   : > { %v871_v48 = vadd.f32 %v870_v42, %v869_v41 }
 0x161   : > { %v872_v44 = vpop.f32.mrf.mxu0  ;;  %v892_v45 = vpop.f32.mrf.mxu1 }
 0x162   : > { %v665_v51 = vadd.f32 %v871_v48, %v365_v49  ;;  %v893_v52 = vadd.f32 %v892_v45, %v891_v43 }
 0x163   : > { %v873_v46 = vpop.f32.mrf.mxu0  ;;  %v894_v47 = vpop.f32.mrf.mxu1 }
 0x164   : > { %v705_v53 = vadd.f32 %v893_v52, %v665_v51 }
 0x165   : > { %v895_v50 = vpop.f32.mrf.mxu1 }
 0x16d   : > { %v744_v54 = vpop.f32.mrf.mxu0 }
 0x16e   : > { %v745_v10 = vadd.f32 %v744_v54, %v705_v53 }
 0x16f   : > { %v912_v55 = vpop.f32.mrf.mxu0 }
 0x170   : > { %v750_v56 = vmax.f32 %v745_v10, 0.0 }
 0x171   : > { %v747_v58 = vpop.f32.mrf.mxu0 }
 0x172   : > { %v751_v59 = vpack.c.bf16 %v750_v56, %v750_v56 }
 0x173   : > { %v913_v60 = vpop.f32.mrf.mxu0 }
 0x174   : > { %v753_v61 = vsel %vm1066_vm2, %v751_v59, %v752_v57 }
 0x175   : > { %754 = vst [vmem:[%s166_s20] sm:$0x1] %v753_v61 }
 0x176 PF: > { %s13_s12 = sadd.s32 1, %s970_s12  }
 0x177   : > { %p10_p4 = scmp.ge.s32.totalorder %s13_s12, 4  }
 0x179   :  { %12 = sbr.rel (!%p10_p4) target bundleno = 1 (0x1), region = 64 }

// kernel: _lambda_.7
= control target key start
LH: loop header
LB: loop body
LE: loop exit
PB: predicated region body
PF: predicated region fallthrough
CT: control target
= control target key end

     0   :  { %v768_v2 = vmov 0   ;;  %vm141_vm0 = vcmask 523264   ;;  %s956_s0 = inlined_call_operand.vmem [shape: bf16[2,64], index: 0, kind: input, shape index: {}]   ;;  %s957_s1 = inlined_call_operand.vmem [shape: bf16[64,512], index: 1, kind: input, shape index: {}]   ;;  %s958_s2 = inlined_call_operand.vmem [shape: f32[1,512], index: 2, kind: input, shape index: {}]   ;;  %s959_s3 = inlined_call_operand.vmem [shape: bf16[512,128], index: 3, kind: input, shape index: {}]   ;;  %s960_s4 = inlined_call_operand.vmem [shape: f32[1,128], index: 4, kind: input, shape index: {}]   ;;  %s961_s5 = inlined_call_operand.hbm [shape: f32[2,128], index: 5, kind: output, shape index: {}]  }
   0x1   :  { %v690_v0 = vld [vmem:[%s957_s1 + $0x64] ss:$16 sps:$4 sm:$0xff]   ;;  %v692_v1 = vld [vmem:[%s957_s1 + $0x6c] ss:$16 sps:$4 sm:$0xff]   ;;  %177 = vmatprep.mubr.bf16.mxu0 %v768_v2  ;;  %218 = vmatprep.mubr.bf16.mxu1 %v768_v2  ;;  %v694_v3 = vld [vmem:[%s957_s1 + $0x60] ss:$16 sps:$4 sm:$0xff]  }
   0x2   :  { %153 = vmatprep.subr.bf16.mxu0 %v690_v0  ;;  %v695_v4 = vld [vmem:[%s957_s1 + $0x68] ss:$16 sps:$4 sm:$0xff]   ;;  %194 = vmatprep.subr.bf16.mxu1 %v692_v1  ;;  %v696_v5 = vld [vmem:[%s957_s1 + $0x44] ss:$16 sps:$4 sm:$0xff]   ;;  %v698_v6 = vld [vmem:[%s957_s1 + $0x4c] ss:$16 sps:$4 sm:$0xff]  }
   0x3   :  { %154 = vmatpush1.bf16.msra.mxu0 %v694_v3  ;;  %195 = vmatpush1.bf16.msra.mxu1 %v695_v4  ;;  %v700_v7 = vld [vmem:[%s957_s1 + $0x40] ss:$16 sps:$4 sm:$0xff]   ;;  %v701_v8 = vld [vmem:[%s957_s1 + $0x48] ss:$16 sps:$4 sm:$0xff]   ;;  %v702_v9 = vld [vmem:[%s957_s1 + $0x24] ss:$16 sps:$4 sm:$0xff]  }
   0x4   :  { %155 = vmatprep.subr.bf16.mxu0 %v696_v5  ;;  %196 = vmatprep.subr.bf16.mxu1 %v698_v6  ;;  %v704_v10 = vld [vmem:[%s957_s1 + $0x2c] ss:$16 sps:$4 sm:$0xff]   ;;  %v706_v11 = vld [vmem:[%s957_s1 + $0x20] ss:$16 sps:$4 sm:$0xff]   ;;  %v707_v12 = vld [vmem:[%s957_s1 + $0x28] ss:$16 sps:$4 sm:$0xff]  }
   0x5   :  { %v708_v13 = vld [vmem:[%s957_s1 + $0x4] ss:$16 sps:$4 sm:$0xff]   ;;  %v710_v14 = vld [vmem:[%s957_s1 + $0xc] ss:$16 sps:$4 sm:$0xff]   ;;  %v712_v15 = vld [vmem:[%s957_s1] ss:$16 sps:$4 sm:$0xff]  }
   0x6   :  { %v713_v16 = vld [vmem:[%s957_s1 + $0x8] ss:$16 sps:$4 sm:$0xff]   ;;  %v22_v19 = vld [vmem:[%s956_s0] sm:$0x1]  ;;  %v718_v22 = vld [vmem:[%s959_s3 + $0x70] sm:$0xff]  }
   0x7   :  { %156 = vmatpush1.bf16.msra.mxu0 %v700_v7  ;;  %197 = vmatpush1.bf16.msra.mxu1 %v701_v8  ;;  %v714_v17 = vld [vmem:[%s959_s3 + $0x78] sm:$0xff]   ;;  %v719_v23 = vld [vmem:[%s959_s3 + $0xf0] sm:$0xff]   ;;  %v722_v26 = vld [vmem:[%s959_s3 + $0x68] sm:$0xff]  }
   0x8   :  { %157 = vmatprep.subr.bf16.mxu0 %v702_v9  ;;  %198 = vmatprep.subr.bf16.mxu1 %v704_v10  ;;  %v715_v18 = vld [vmem:[%s959_s3 + $0xf8] sm:$0xff]   ;;  %v720_v24 = vld [vmem:[%s959_s3 + $0x30] sm:$0xff]   ;;  %v723_v27 = vld [vmem:[%s959_s3 + $0xe8] sm:$0xff]  }
   0x9   :  { %v716_v20 = vld [vmem:[%s959_s3 + $0x38] sm:$0xff]   ;;  %v721_v25 = vld [vmem:[%s959_s3 + $0xb0] sm:$0xff]   ;;  %v724_v28 = vld [vmem:[%s959_s3 + $0x28] sm:$0xff]  }
   0xa   :  { %v717_v21 = vld [vmem:[%s959_s3 + $0xb8] sm:$0xff]   ;;  %v725_v29 = vld [vmem:[%s959_s3 + $0xa8] sm:$0xff]   ;;  %v726_v30 = vld [vmem:[%s959_s3 + $0x60] sm:$0xff]  }
   0xb   :  { %158 = vmatpush1.bf16.msra.mxu0 %v706_v11  ;;  %199 = vmatpush1.bf16.msra.mxu1 %v707_v12  ;;  %v727_v31 = vld [vmem:[%s959_s3 + $0xe0] sm:$0xff]   ;;  %v730_v34 = vld [vmem:[%s959_s3 + $0x58] sm:$0xff]   ;;  %v734_v38 = vld [vmem:[%s959_s3 + $0x50] sm:$0xff]  }
   0xc   :  { %159 = vmatprep.subr.bf16.mxu0 %v708_v13  ;;  %200 = vmatprep.subr.bf16.mxu1 %v710_v14  ;;  %v728_v32 = vld [vmem:[%s959_s3 + $0x20] sm:$0xff]   ;;  %v731_v35 = vld [vmem:[%s959_s3 + $0xd8] sm:$0xff]   ;;  %v735_v39 = vld [vmem:[%s959_s3 + $0xd0] sm:$0xff]  }
   0xd   :  { %v729_v33 = vld [vmem:[%s959_s3 + $0xa0] sm:$0xff]   ;;  %v732_v36 = vld [vmem:[%s959_s3 + $0x18] sm:$0xff]   ;;  %v736_v40 = vld [vmem:[%s959_s3 + $0x10] sm:$0xff]  }
   0xe   :  { %v733_v37 = vld [vmem:[%s959_s3 + $0x98] sm:$0xff]   ;;  %v737_v41 = vld [vmem:[%s959_s3 + $0x90] sm:$0xff]  }
   0xf   :  { %160 = vmatpush1.bf16.msra.mxu0 %v712_v15  ;;  %201 = vmatpush1.bf16.msra.mxu1 %v713_v16 }
  0x10   :  { %644 = vmatprep.subr.bf16.mxu0 %v714_v17  ;;  %666 = vmatprep.subr.bf16.mxu1 %v715_v18 }
  0x12   :  { %609 = vmatmul.mubr.msk.bf16.vlgmr.msra.gmra.mxu0 %vm141_vm0, %v22_v19  ;;  %610 = vmatmul.mubr.msk.bf16.vlgmr.msra.gmra.mxu1 %vm141_vm0, %v22_v19 }
  0x13   :  { %645 = vmatpush3.bf16.msra.mxu0 %v716_v20  ;;  %667 = vmatpush3.bf16.msra.mxu1 %v717_v21 }
  0x14   :  { %646 = vmatprep.subr.bf16.mxu0 %v718_v22  ;;  %668 = vmatprep.subr.bf16.mxu1 %v719_v23 }
  0x17   :  { %647 = vmatpush3.bf16.msra.mxu0 %v720_v24  ;;  %669 = vmatpush3.bf16.msra.mxu1 %v721_v25 }
  0x18   :  { %648 = vmatprep.subr.bf16.mxu0 %v722_v26  ;;  %670 = vmatprep.subr.bf16.mxu1 %v723_v27 }
  0x1b   :  { %649 = vmatpush3.bf16.msra.mxu0 %v724_v28  ;;  %671 = vmatpush3.bf16.msra.mxu1 %v725_v29 }
  0x1c   :  { %650 = vmatprep.subr.bf16.mxu0 %v726_v30  ;;  %672 = vmatprep.subr.bf16.mxu1 %v727_v31 }
  0x1f   :  { %651 = vmatpush3.bf16.msra.mxu0 %v728_v32  ;;  %673 = vmatpush3.bf16.msra.mxu1 %v729_v33 }
  0x20   :  { %652 = vmatprep.subr.bf16.mxu0 %v730_v34  ;;  %674 = vmatprep.subr.bf16.mxu1 %v731_v35 }
  0x23   :  { %653 = vmatpush3.bf16.msra.mxu0 %v732_v36  ;;  %675 = vmatpush3.bf16.msra.mxu1 %v733_v37 }
  0x24   :  { %654 = vmatprep.subr.bf16.mxu0 %v734_v38  ;;  %676 = vmatprep.subr.bf16.mxu1 %v735_v39 }
  0x27   :  { %655 = vmatpush3.bf16.msra.mxu0 %v736_v40  ;;  %677 = vmatpush3.bf16.msra.mxu1 %v737_v41 }
  0x28   :  { %10 = vsyncpa [#allocation3], 0  ;;  %v738_v42 = vld [vmem:[%s959_s3 + $0x48] sm:$0xff]   ;;  %v742_v46 = vld [vmem:[%s959_s3 + $0x40] sm:$0xff]   ;;  %v41_v50 = vlaneseq  ;;  %s769_s0 = smov [#allocation2]  }
  0x29   :  { %v739_v43 = vld [vmem:[%s959_s3 + $0xc8] sm:$0xff]   ;;  %656 = vmatprep.subr.bf16.mxu0 %v738_v42  ;;  %v743_v47 = vld [vmem:[%s959_s3 + $0xc0] sm:$0xff]   ;;  %s585_s13 = sshll.u32 %s769_s0, 4  ;;  %s586_s13 = int_to_ptr.vmem [resolvable:$true] %s585_s13 }
  0x2a   :  { %v740_v44 = vld [vmem:[%s959_s3 + $0x8] sm:$0xff]   ;;  %678 = vmatprep.subr.bf16.mxu1 %v739_v43  ;;  %v744_v48 = vld [vmem:[%s959_s3] sm:$0xff]   ;;  %v42_v51 = vshrl.u32 %v41_v50, 7  ;;  %s746_s14 = scalar_lea.vmem %s586_s13, 32  ;;  %p751_p1 = scmp.lt.s32.totalorder %s586_s13, %s586_s13 }
  0x2b   :  { %v741_v45 = vld [vmem:[%s959_s3 + $0x88] sm:$0xff]   ;;  %657 = vmatpush3.bf16.msra.mxu0 %v740_v44  ;;  %v745_v49 = vld [vmem:[%s959_s3 + $0x80] sm:$0xff]   ;;  %p747_p0 = scmp.ne.s32.totalorder %s586_s13, %s746_s14  ;;  %p752_p2 = scmp.lt.s32.totalorder %s746_s14, %s746_s14 }
  0x2c   :  { %679 = vmatpush3.bf16.msra.mxu1 %v741_v45  ;;  %658 = vmatprep.subr.bf16.mxu0 %v742_v46  ;;  %v43_v52 = vsub.s32 0, %v42_v51  ;;  %v51_v53 = vsub.s32 2, %v42_v51  ;;  %v39_v54 = vld [vmem:[%s958_s2] sm:$0xf]  ;;  %v47_v55 = vsub.s32 1, %v42_v51  ;;  %v55_v56 = vsub.s32 3, %v42_v51 }
  0x2d   :  { %680 = vmatprep.subr.bf16.mxu1 %v743_v47  ;;  %v611_v19 = vld [vmem:[%s960_s4] ss:$0 sm:$0xff]  ;;  %p753_p3 = por %p752_p2, %p751_p1 }
  0x2e   :  { %v44_v57 = vrot.slane %v39_v54, %v43_v52  ;;  %v52_v58 = vrot.slane %v39_v54, %v51_v53  ;;  %v48_v59 = vrot.slane %v39_v54, %v47_v55  ;;  %v56_v60 = vrot.slane %v39_v54, %v55_v56 }
  0x2f   :  { %659 = vmatpush3.bf16.msra.mxu0 %v744_v48  ;;  %p754_p4 = pnand %p753_p3, %p747_p0 }
  0x30   :  { %681 = vmatpush3.bf16.msra.mxu1 %v745_v49 }
  0xd2   :  { %v179_v61 = vpop.f32.mrf.mxu0  ;;  %v220_v62 = vpop.f32.mrf.mxu1 }
  0xd3   :  { %v180_v63 = vadd.f32 %v179_v61, %v44_v57  ;;  %v221_v0 = vadd.f32 %v220_v62, %v52_v58 }
  0xd4   :  { %v181_v1 = vpop.f32.mrf.mxu0  ;;  %v222_v2 = vpop.f32.mrf.mxu1 }
  0xd5   :  { %v229_v3 = vmax.f32 %v221_v0, 0.0  ;;  %v182_v4 = vadd.f32 %v181_v1, %v48_v59  ;;  %v223_v5 = vadd.f32 %v222_v2, %v56_v60  ;;  %v227_v6 = vmax.f32 %v180_v63, 0.0 }
  0xd6   :  { %v183_v7 = vpop.f32.mrf.mxu0  ;;  %v224_v8 = vpop.f32.mrf.mxu1 }
  0xd7   :  { %v228_v9 = vmax.f32 %v182_v4, 0.0  ;;  %v230_v10 = vmax.f32 %v223_v5, 0.0  ;;  %v233_v11 = vpack.c.bf16 %v229_v3, %v229_v3  ;;  %v231_v16 = vpack.c.bf16 %v227_v6, %v227_v6 }
  0xd8   :  { %v184_v12 = vpop.f32.mrf.mxu0  ;;  %v225_v13 = vpop.f32.mrf.mxu1 }
  0xd9   :  { %v232_v14 = vpack.c.bf16 %v228_v9, %v228_v9  ;;  %v234_v15 = vpack.c.bf16 %v230_v10, %v230_v10 }
  0xdb   :  { %530 = vmatprep.mubr.bf16.mxu0 %v232_v14  ;;  %570 = vmatprep.mubr.bf16.mxu1 %v234_v15 }
  0xdc   :  { %531 = vmatmul.mubr.bf16.vlgmr.msra.gmra.mxu0 %v231_v16  ;;  %571 = vmatmul.mubr.bf16.vlgmr.msra.gmra.mxu1 %v233_v11 }
 0x19c   :  { %v660_v17 = vpop.f32.mrf.mxu0  ;;  %v682_v18 = vpop.f32.mrf.mxu1 }
 0x19e   :  { %v661_v20 = vpop.f32.mrf.mxu0  ;;  %v683_v21 = vpop.f32.mrf.mxu1 }
 0x19f   :  { %v662_v22 = vadd.f32 %v661_v20, %v660_v17  ;;  %v684_v26 = vadd.f32 %v683_v21, %v682_v18 }
 0x1a0   :  { %v663_v23 = vpop.f32.mrf.mxu0  ;;  %v685_v24 = vpop.f32.mrf.mxu1 }
 0x1a1   :  { %v533_v25 = vadd.f32 %v662_v22, %v611_v19 }
 0x1a2   :  { %v664_v27 = vpop.f32.mrf.mxu0  ;;  %v686_v28 = vpop.f32.mrf.mxu1 }
 0x1a3   :  { %v573_v29 = vadd.f32 %v684_v26, %v533_v25 }
 0x1a5   :  { %578 = vst [vmem:[#allocation2] sm:$0x3] %v573_v29 }
 0x1a6   :  { %757 = shalt.err (!%p754_p4)
}
 0x1a7   :  { %588 = dma.vmem_to_hbm [thread:$0]  %s586_s13, 32, %s961_s5, [#allocation3]  }
 0x1a8   :  { %766 = dma.done.wait [#allocation3], 32  }
 0x1a9   :  { %767 = vsyncadd [#allocation3], 4294967264 }
 0x1aa   :  { %592 = vsyncpa [#allocation3], 1 }

</bundles_post_ra>
